<compile_context>
chip_gen: v7x
topology: tpu7x:2x2x1
jax: 0.10.0
libtpu: 0.0.40
codegen_flags: <defaults>
</compile_context>

<pallas_src>
import functools

import jax
import jax.numpy as jnp
from jax.experimental import pallas as pl
from jax.experimental.pallas import tpu as pltpu

IM_DIM = 784
IM_DIM_PAD = 896          # 7 * 128, lane-aligned K for layer 1
HIDDEN = 128              # hidden_dim from the PyTorch module
DIMS = (IM_DIM, HIDDEN * 4, HIDDEN * 2, HIDDEN, 1)  # 784 -> 512 -> 256 -> 128 -> 1
OUT_PAD = 128             # last layer N padded to one full lane tile
NEG_SLOPE = 0.2


def _leaky_relu(x):
    # negative_slope < 1  =>  max(x, slope*x) == LeakyReLU(x)
    return jnp.maximum(x, NEG_SLOPE * x)


def disc_kernel(x_ref,
                w1_ref, b1_ref,
                w2_ref, b2_ref,
                w3_ref, b3_ref,
                w4_ref, b4_ref,
                o_ref):
    # Layer 1: Linear(896(pad of 784) -> 512) + LeakyReLU(0.2)
    h = jnp.dot(x_ref[...], w1_ref[...], preferred_element_type=jnp.float32)
    h = _leaky_relu(h + b1_ref[...])
    # Layer 2: Linear(512 -> 256) + LeakyReLU(0.2)
    h = jnp.dot(h.astype(jnp.bfloat16), w2_ref[...],
                preferred_element_type=jnp.float32)
    h = _leaky_relu(h + b2_ref[...])
    # Layer 3: Linear(256 -> 128) + LeakyReLU(0.2)
    h = jnp.dot(h.astype(jnp.bfloat16), w3_ref[...],
                preferred_element_type=jnp.float32)
    h = _leaky_relu(h + b3_ref[...])
    # Layer 4: Linear(128 -> 1), N padded to 128 (only column 0 is real)
    out = jnp.dot(h.astype(jnp.bfloat16), w4_ref[...],
                  preferred_element_type=jnp.float32) + b4_ref[...]
    o_ref[...] = out.astype(o_ref.dtype)


@functools.partial(jax.jit, static_argnames=("tile_b",))
def discriminator_forward(x, params, *, tile_b=256):
    """x: (B, 784) float32. params: tuple (w1,b1,w2,b2,w3,b3,w4,b4) in f32.

    Returns (B, 1) float32 logits (matches the PyTorch forward).
    """
    B = x.shape[0]
    w1, b1, w2, b2, w3, b3, w4, b4 = params

    # ---- prep: pad batch to a multiple of tile_b, pad K to 896, pad last N to
    # 128, and cast matmul operands to bf16 (f32 accumulation in-kernel) ----
    padded_b = ((B + tile_b - 1) // tile_b) * tile_b
    x_p = jnp.zeros((padded_b, IM_DIM_PAD), jnp.bfloat16)
    x_p = x_p.at[:B, :IM_DIM].set(x.astype(jnp.bfloat16))

    w1_p = jnp.zeros((IM_DIM_PAD, DIMS[1]), jnp.bfloat16)
    w1_p = w1_p.at[:IM_DIM, :].set(w1.astype(jnp.bfloat16))
    w2_b = w2.astype(jnp.bfloat16)
    w3_b = w3.astype(jnp.bfloat16)
    w4_p = jnp.zeros((DIMS[3], OUT_PAD), jnp.bfloat16)
    w4_p = w4_p.at[:, :1].set(w4.astype(jnp.bfloat16))
    b4_p = jnp.zeros((1, OUT_PAD), jnp.float32)
    b4_p = b4_p.at[:, :1].set(b4)

    def rep(shape):
        # full-array block, replicated across the batch grid
        return pl.BlockSpec(shape, lambda i: (0, 0))

    grid = (padded_b // tile_b,)
    out = pl.pallas_call(
        disc_kernel,
        out_shape=jax.ShapeDtypeStruct((padded_b, OUT_PAD), jnp.float32),
        grid_spec=pltpu.PrefetchScalarGridSpec(
            num_scalar_prefetch=0,
            grid=grid,
            in_specs=[
                pl.BlockSpec((tile_b, IM_DIM_PAD), lambda i: (i, 0)),
                rep(w1_p.shape), rep(b1.shape),
                rep(w2_b.shape), rep(b2.shape),
                rep(w3_b.shape), rep(b3.shape),
                rep(w4_p.shape), rep(b4_p.shape),
            ],
            out_specs=pl.BlockSpec((tile_b, OUT_PAD), lambda i: (i, 0)),
        ),
        compiler_params=pltpu.CompilerParams(
            dimension_semantics=("parallel",),
            vmem_limit_bytes=32 * 1024 * 1024,
        ),
    )(x_p, w1_p, b1, w2_b, b2, w3_b, b3, w4_p, b4_p)

    # slice away batch padding and the 127 padded output lanes
    return out[:B, :1]


def init_params(key):
    """Deterministic init mimicking nn.Linear default U(-1/sqrt(fan_in), +1/sqrt(fan_in)).

    Weights are returned already transposed to (in_features, out_features).
    Biases are (1, out_features) for 2-D broadcast inside the kernel.
    """
    params = []
    keys = jax.random.split(key, 2 * (len(DIMS) - 1))
    for li in range(len(DIMS) - 1):
        fan_in, fan_out = DIMS[li], DIMS[li + 1]
        bound = 1.0 / jnp.sqrt(jnp.float32(fan_in))
        w = jax.random.uniform(keys[2 * li], (fan_in, fan_out),
                               minval=-bound, maxval=bound, dtype=jnp.float32)
        b = jax.random.uniform(keys[2 * li + 1], (1, fan_out),
                               minval=-bound, maxval=bound, dtype=jnp.float32)
        params += [w, b]
    return tuple(params)


def reference_forward(x, params):
    """Pure-JAX reference with the same bf16-operand / f32-accumulate recipe."""
    w1, b1, w2, b2, w3, b3, w4, b4 = params
    h = jnp.dot(x.astype(jnp.bfloat16), w1.astype(jnp.bfloat16),
                preferred_element_type=jnp.float32) + b1
    h = _leaky_relu(h)
    h = jnp.dot(h.astype(jnp.bfloat16), w2.astype(jnp.bfloat16),
                preferred_element_type=jnp.float32) + b2
    h = _leaky_relu(h)
    h = jnp.dot(h.astype(jnp.bfloat16), w3.astype(jnp.bfloat16),
                preferred_element_type=jnp.float32) + b3
    h = _leaky_relu(h)
    return jnp.dot(h.astype(jnp.bfloat16), w4.astype(jnp.bfloat16),
                   preferred_element_type=jnp.float32) + b4


if __name__ == "__main__":
    key = jax.random.PRNGKey(0)
    k_param, k_x = jax.random.split(key)

    params = init_params(k_param)

    B = 16  # small batch of flattened 28x28 images -> (B, 784)
    x = jax.random.normal(k_x, (B, IM_DIM), dtype=jnp.float32)

    out = discriminator_forward(x, params)  # batch is padded to tile_b internally
    out = jax.block_until_ready(out)

    ref = reference_forward(x, params)
    assert out.shape == (B, 1), out.shape
    assert jnp.allclose(out, ref, atol=2e-2, rtol=2e-2), "mismatch vs reference"

    print("KERNEL_OK")
</pallas_src>

<mosaic_0001>
module attributes {stable_mosaic.version = 11 : i64} {
  func.func @disc_kernel(%arg0: i32, %arg1: memref<256x896xbf16, #tpu.memory_space<vmem>>, %arg2: memref<896x512xbf16, #tpu.memory_space<vmem>>, %arg3: memref<1x512xf32, #tpu.memory_space<vmem>>, %arg4: memref<512x256xbf16, #tpu.memory_space<vmem>>, %arg5: memref<1x256xf32, #tpu.memory_space<vmem>>, %arg6: memref<256x128xbf16, #tpu.memory_space<vmem>>, %arg7: memref<1x128xf32, #tpu.memory_space<vmem>>, %arg8: memref<128x128xbf16, #tpu.memory_space<vmem>>, %arg9: memref<1x128xf32, #tpu.memory_space<vmem>>, %arg10: memref<256x128xf32, #tpu.memory_space<vmem>>) attributes {dimension_semantics = [#tpu.dimension_semantics<parallel>], iteration_bounds = array<i64: 1>, scalar_prefetch = 0 : i64, scratch_operands = 0 : i64, tpu.core_type = #tpu.core_type<tc>, window_params = [{transform_indices = @transform_0, window_bounds = array<i64: 256, 896>}, {pipeline_mode = #tpu.pipeline_mode<synchronous>, transform_indices = @transform_1, window_bounds = array<i64: 896, 512>}, {pipeline_mode = #tpu.pipeline_mode<synchronous>, transform_indices = @transform_2, window_bounds = array<i64: 1, 512>}, {pipeline_mode = #tpu.pipeline_mode<synchronous>, transform_indices = @transform_3, window_bounds = array<i64: 512, 256>}, {pipeline_mode = #tpu.pipeline_mode<synchronous>, transform_indices = @transform_4, window_bounds = array<i64: 1, 256>}, {pipeline_mode = #tpu.pipeline_mode<synchronous>, transform_indices = @transform_5, window_bounds = array<i64: 256, 128>}, {pipeline_mode = #tpu.pipeline_mode<synchronous>, transform_indices = @transform_6, window_bounds = array<i64: 1, 128>}, {pipeline_mode = #tpu.pipeline_mode<synchronous>, transform_indices = @transform_7, window_bounds = array<i64: 128, 128>}, {pipeline_mode = #tpu.pipeline_mode<synchronous>, transform_indices = @transform_8, window_bounds = array<i64: 1, 128>}, {transform_indices = @transform_9, window_bounds = array<i64: 256, 128>}]} {
    %c0 = arith.constant 0 : index
    %c0_0 = arith.constant 0 : index
    %0 = vector.load %arg1[%c0, %c0_0] : memref<256x896xbf16, #tpu.memory_space<vmem>>, vector<256x896xbf16>
    %c0_1 = arith.constant 0 : index
    %c0_2 = arith.constant 0 : index
    %1 = vector.load %arg2[%c0_1, %c0_2] : memref<896x512xbf16, #tpu.memory_space<vmem>>, vector<896x512xbf16>
    %cst = arith.constant dense<0.000000e+00> : vector<256x512xf32>
    %2 = tpu.matmul %0, %1, %cst {dimension_numbers = #tpu.dot_dimension_numbers<[1], [0], [0], [1], [0, 0, 1, 1], [], []>} : vector<256x896xbf16>, vector<896x512xbf16>, vector<256x512xf32> -> vector<256x512xf32>
    %c0_3 = arith.constant 0 : index
    %c0_4 = arith.constant 0 : index
    %3 = vector.load %arg3[%c0_3, %c0_4] : memref<1x512xf32, #tpu.memory_space<vmem>>, vector<1x512xf32>
    %4 = vector.broadcast %3 : vector<1x512xf32> to vector<256x512xf32>
    %5 = arith.addf %2, %4 : vector<256x512xf32>
    %cst_5 = arith.constant 2.000000e-01 : f32
    %6 = vector.broadcast %cst_5 : f32 to vector<256x512xf32>
    %7 = arith.mulf %6, %5 : vector<256x512xf32>
    %8 = arith.maximumf %5, %7 : vector<256x512xf32>
    %9 = arith.truncf %8 : vector<256x512xf32> to vector<256x512xbf16>
    %c0_6 = arith.constant 0 : index
    %c0_7 = arith.constant 0 : index
    %10 = vector.load %arg4[%c0_6, %c0_7] : memref<512x256xbf16, #tpu.memory_space<vmem>>, vector<512x256xbf16>
    %cst_8 = arith.constant dense<0.000000e+00> : vector<256x256xf32>
    %11 = tpu.matmul %9, %10, %cst_8 {dimension_numbers = #tpu.dot_dimension_numbers<[1], [0], [0], [1], [0, 0, 1, 1], [], []>} : vector<256x512xbf16>, vector<512x256xbf16>, vector<256x256xf32> -> vector<256x256xf32>
    %c0_9 = arith.constant 0 : index
    %c0_10 = arith.constant 0 : index
    %12 = vector.load %arg5[%c0_9, %c0_10] : memref<1x256xf32, #tpu.memory_space<vmem>>, vector<1x256xf32>
    %13 = vector.broadcast %12 : vector<1x256xf32> to vector<256x256xf32>
    %14 = arith.addf %11, %13 : vector<256x256xf32>
    %cst_11 = arith.constant 2.000000e-01 : f32
    %15 = vector.broadcast %cst_11 : f32 to vector<256x256xf32>
    %16 = arith.mulf %15, %14 : vector<256x256xf32>
    %17 = arith.maximumf %14, %16 : vector<256x256xf32>
    %18 = arith.truncf %17 : vector<256x256xf32> to vector<256x256xbf16>
    %c0_12 = arith.constant 0 : index
    %c0_13 = arith.constant 0 : index
    %19 = vector.load %arg6[%c0_12, %c0_13] : memref<256x128xbf16, #tpu.memory_space<vmem>>, vector<256x128xbf16>
    %cst_14 = arith.constant dense<0.000000e+00> : vector<256x128xf32>
    %20 = tpu.matmul %18, %19, %cst_14 {dimension_numbers = #tpu.dot_dimension_numbers<[1], [0], [0], [1], [0, 0, 1, 1], [], []>} : vector<256x256xbf16>, vector<256x128xbf16>, vector<256x128xf32> -> vector<256x128xf32>
    %c0_15 = arith.constant 0 : index
    %c0_16 = arith.constant 0 : index
    %21 = vector.load %arg7[%c0_15, %c0_16] : memref<1x128xf32, #tpu.memory_space<vmem>>, vector<1x128xf32>
    %22 = vector.broadcast %21 : vector<1x128xf32> to vector<256x128xf32>
    %23 = arith.addf %20, %22 : vector<256x128xf32>
    %cst_17 = arith.constant 2.000000e-01 : f32
    %24 = vector.broadcast %cst_17 : f32 to vector<256x128xf32>
    %25 = arith.mulf %24, %23 : vector<256x128xf32>
    %26 = arith.maximumf %23, %25 : vector<256x128xf32>
    %27 = arith.truncf %26 : vector<256x128xf32> to vector<256x128xbf16>
    %c0_18 = arith.constant 0 : index
    %c0_19 = arith.constant 0 : index
    %28 = vector.load %arg8[%c0_18, %c0_19] : memref<128x128xbf16, #tpu.memory_space<vmem>>, vector<128x128xbf16>
    %cst_20 = arith.constant dense<0.000000e+00> : vector<256x128xf32>
    %29 = tpu.matmul %27, %28, %cst_20 {dimension_numbers = #tpu.dot_dimension_numbers<[1], [0], [0], [1], [0, 0, 1, 1], [], []>} : vector<256x128xbf16>, vector<128x128xbf16>, vector<256x128xf32> -> vector<256x128xf32>
    %c0_21 = arith.constant 0 : index
    %c0_22 = arith.constant 0 : index
    %30 = vector.load %arg9[%c0_21, %c0_22] : memref<1x128xf32, #tpu.memory_space<vmem>>, vector<1x128xf32>
    %31 = vector.broadcast %30 : vector<1x128xf32> to vector<256x128xf32>
    %32 = arith.addf %29, %31 : vector<256x128xf32>
    %c0_23 = arith.constant 0 : index
    %c0_24 = arith.constant 0 : index
    %33 = vector.load %arg10[%c0_23, %c0_24] : memref<256x128xf32, #tpu.memory_space<vmem>>, vector<256x128xf32>
    tpu.vector_store %arg10[%c0_23, %c0_24], %32 {strides = array<i32>} : memref<256x128xf32, #tpu.memory_space<vmem>>, vector<256x128xf32>,
    return
  }
  func.func @transform_0(%arg0: i32) -> (i32, i32) {
    %c0_i32 = arith.constant 0 : i32
    %c0_i32_0 = arith.constant 0 : i32
    return %arg0, %c0_i32 : i32, i32
  }
  func.func @transform_1(%arg0: i32) -> (i32, i32) {
    %c0_i32 = arith.constant 0 : i32
    %c0_i32_0 = arith.constant 0 : i32
    %c0_i32_1 = arith.constant 0 : i32
    return %c0_i32, %c0_i32_0 : i32, i32
  }
  func.func @transform_2(%arg0: i32) -> (i32, i32) {
    %c0_i32 = arith.constant 0 : i32
    %c0_i32_0 = arith.constant 0 : i32
    %c0_i32_1 = arith.constant 0 : i32
    return %c0_i32, %c0_i32_0 : i32, i32
  }
  func.func @transform_3(%arg0: i32) -> (i32, i32) {
    %c0_i32 = arith.constant 0 : i32
    %c0_i32_0 = arith.constant 0 : i32
    %c0_i32_1 = arith.constant 0 : i32
    return %c0_i32, %c0_i32_0 : i32, i32
  }
  func.func @transform_4(%arg0: i32) -> (i32, i32) {
    %c0_i32 = arith.constant 0 : i32
    %c0_i32_0 = arith.constant 0 : i32
    %c0_i32_1 = arith.constant 0 : i32
    return %c0_i32, %c0_i32_0 : i32, i32
  }
  func.func @transform_5(%arg0: i32) -> (i32, i32) {
    %c0_i32 = arith.constant 0 : i32
    %c0_i32_0 = arith.constant 0 : i32
    %c0_i32_1 = arith.constant 0 : i32
    return %c0_i32, %c0_i32_0 : i32, i32
  }
  func.func @transform_6(%arg0: i32) -> (i32, i32) {
    %c0_i32 = arith.constant 0 : i32
    %c0_i32_0 = arith.constant 0 : i32
    %c0_i32_1 = arith.constant 0 : i32
    return %c0_i32, %c0_i32_0 : i32, i32
  }
  func.func @transform_7(%arg0: i32) -> (i32, i32) {
    %c0_i32 = arith.constant 0 : i32
    %c0_i32_0 = arith.constant 0 : i32
    %c0_i32_1 = arith.constant 0 : i32
    return %c0_i32, %c0_i32_0 : i32, i32
  }
  func.func @transform_8(%arg0: i32) -> (i32, i32) {
    %c0_i32 = arith.constant 0 : i32
    %c0_i32_0 = arith.constant 0 : i32
    %c0_i32_1 = arith.constant 0 : i32
    return %c0_i32, %c0_i32_0 : i32, i32
  }
  func.func @transform_9(%arg0: i32) -> (i32, i32) {
    %c0_i32 = arith.constant 0 : i32
    %c0_i32_0 = arith.constant 0 : i32
    return %arg0, %c0_i32 : i32, i32
  }
}

</mosaic_0001>

<bundles_post_ra>
// kernel: discriminator_forward.1
= control target key start
LH: loop header
LB: loop body
LE: loop exit
PB: predicated region body
PF: predicated region fallthrough
CT: control target
= control target key end

     0   :  { %v7476_v1 = vmov 0   ;;  %s9691_s1 = inlined_call_operand.vmem [shape: bf16[896,512], index: 1, kind: input, shape index: {}]   ;;  %s9692_s0 = inlined_call_operand.vmem [shape: bf16[256,896], index: 0, kind: input, shape index: {}]   ;;  %s9693_s3 = inlined_call_operand.vmem [shape: bf16[512,256], index: 3, kind: input, shape index: {}]   ;;  %s9694_s2 = inlined_call_operand.vmem [shape: f32[1,512], index: 2, kind: input, shape index: {}]   ;;  %s9695_s5 = inlined_call_operand.vmem [shape: bf16[256,128], index: 5, kind: input, shape index: {}]   ;;  %s9696_s4 = inlined_call_operand.vmem [shape: f32[1,256], index: 4, kind: input, shape index: {}]   ;;  %s9697_s7 = inlined_call_operand.vmem [shape: bf16[128,128], index: 7, kind: input, shape index: {}]   ;;  %s9698_s6 = inlined_call_operand.vmem [shape: f32[1,128], index: 6, kind: input, shape index: {}]   ;;  %s9699_s8 = inlined_call_operand.vmem [shape: f32[1,128], index: 8, kind: input, shape index: {}]   ;;  %s9700_s9 = inlined_call_operand.vmem [shape: f32[256,128], index: 9, kind: output, shape index: {}]  }
   0x1   :  { %v6836_v0 = vld [vmem:[%s9691_s1 + $0x4] ss:$16 sps:$4 sm:$0xff]   ;;  %2794 = vmatprep.mubr.bf16.mxu1 %v7476_v1  ;;  %v6840_v3 = vld [vmem:[%s9691_s1] ss:$16 sps:$4 sm:$0xff]   ;;  %v6889_v34 = vld [vmem:[%s9691_s1 + $0xc] ss:$16 sps:$4 sm:$0xff]  }
   0x2   :  { %v6838_v2 = vld [vmem:[%s9691_s1 + $0x604] ss:$16 sps:$4 sm:$0xff]   ;;  %2103 = vmatprep.subr.bf16.mxu0 %v6836_v0  ;;  %v6841_v4 = vld [vmem:[%s9691_s1 + $0x600] ss:$16 sps:$4 sm:$0xff]   ;;  %v6887_v36 = vld [vmem:[%s9691_s1 + $0x8] ss:$16 sps:$4 sm:$0xff]  }
   0x3   :  { %6163 = vmatprep.subr.bf16.mxu1 %v6838_v2  ;;  %v6842_v5 = vld [vmem:[%s9691_s1 + $0x24] ss:$16 sps:$4 sm:$0xff]   ;;  %2104 = vmatpush1.bf16.msra.mxu0 %v6840_v3  ;;  %v6846_v7 = vld [vmem:[%s9691_s1 + $0x20] ss:$16 sps:$4 sm:$0xff]   ;;  %v6895_v39 = vld [vmem:[%s9691_s1 + $0x2c] ss:$16 sps:$4 sm:$0xff]  }
   0x4   :  { %6171 = vmatpush1.bf16.msra.mxu1 %v6841_v4  ;;  %v6844_v6 = vld [vmem:[%s9691_s1 + $0x624] ss:$16 sps:$4 sm:$0xff]   ;;  %2105 = vmatprep.subr.bf16.mxu0 %v6842_v5  ;;  %v6847_v8 = vld [vmem:[%s9691_s1 + $0x620] ss:$16 sps:$4 sm:$0xff]   ;;  %v6893_v40 = vld [vmem:[%s9691_s1 + $0x28] ss:$16 sps:$4 sm:$0xff]  }
   0x5   :  { %6164 = vmatprep.subr.bf16.mxu1 %v6844_v6  ;;  %v6848_v9 = vld [vmem:[%s9691_s1 + $0x44] ss:$16 sps:$4 sm:$0xff]   ;;  %v6852_v11 = vld [vmem:[%s9691_s1 + $0x40] ss:$16 sps:$4 sm:$0xff]   ;;  %v6902_v43 = vld [vmem:[%s9691_s1 + $0x4c] ss:$16 sps:$4 sm:$0xff]  }
   0x6   :  { %v6850_v10 = vld [vmem:[%s9691_s1 + $0x644] ss:$16 sps:$4 sm:$0xff]   ;;  %v6853_v12 = vld [vmem:[%s9691_s1 + $0x640] ss:$16 sps:$4 sm:$0xff]   ;;  %v6900_v45 = vld [vmem:[%s9691_s1 + $0x48] ss:$16 sps:$4 sm:$0xff]  }
   0x7   :  { %2106 = vmatpush1.bf16.msra.mxu0 %v6846_v7  ;;  %v6854_v13 = vld [vmem:[%s9691_s1 + $0x64] ss:$16 sps:$4 sm:$0xff]   ;;  %v6858_v15 = vld [vmem:[%s9691_s1 + $0x60] ss:$16 sps:$4 sm:$0xff]   ;;  %v6908_v48 = vld [vmem:[%s9691_s1 + $0x6c] ss:$16 sps:$4 sm:$0xff]  }
   0x8   :  { %6172 = vmatpush1.bf16.msra.mxu1 %v6847_v8  ;;  %2107 = vmatprep.subr.bf16.mxu0 %v6848_v9  ;;  %v6856_v14 = vld [vmem:[%s9691_s1 + $0x664] ss:$16 sps:$4 sm:$0xff]   ;;  %v6859_v16 = vld [vmem:[%s9691_s1 + $0x660] ss:$16 sps:$4 sm:$0xff]   ;;  %v6906_v49 = vld [vmem:[%s9691_s1 + $0x68] ss:$16 sps:$4 sm:$0xff]  }
   0x9   :  { %6165 = vmatprep.subr.bf16.mxu1 %v6850_v10  ;;  %v6860_v17 = vld [vmem:[%s9691_s1 + $0x84] ss:$16 sps:$4 sm:$0xff]   ;;  %v6864_v19 = vld [vmem:[%s9691_s1 + $0x80] ss:$16 sps:$4 sm:$0xff]   ;;  %v6915_v52 = vld [vmem:[%s9691_s1 + $0x8c] ss:$16 sps:$4 sm:$0xff]  }
   0xa   :  { %v6862_v18 = vld [vmem:[%s9691_s1 + $0x684] ss:$16 sps:$4 sm:$0xff]   ;;  %v6865_v20 = vld [vmem:[%s9691_s1 + $0x680] ss:$16 sps:$4 sm:$0xff]   ;;  %v6913_v54 = vld [vmem:[%s9691_s1 + $0x88] ss:$16 sps:$4 sm:$0xff]  }
   0xb   :  { %2108 = vmatpush1.bf16.msra.mxu0 %v6852_v11  ;;  %v6866_v21 = vld [vmem:[%s9691_s1 + $0xa4] ss:$16 sps:$4 sm:$0xff]   ;;  %v6870_v23 = vld [vmem:[%s9691_s1 + $0xa0] ss:$16 sps:$4 sm:$0xff]   ;;  %v6921_v58 = vld [vmem:[%s9691_s1 + $0xac] ss:$16 sps:$4 sm:$0xff]  }
   0xc   :  { %6173 = vmatpush1.bf16.msra.mxu1 %v6853_v12  ;;  %2109 = vmatprep.subr.bf16.mxu0 %v6854_v13  ;;  %v6868_v22 = vld [vmem:[%s9691_s1 + $0x6a4] ss:$16 sps:$4 sm:$0xff]   ;;  %v6871_v24 = vld [vmem:[%s9691_s1 + $0x6a0] ss:$16 sps:$4 sm:$0xff]   ;;  %v6919_v59 = vld [vmem:[%s9691_s1 + $0xa8] ss:$16 sps:$4 sm:$0xff]  }
   0xd   :  { %6166 = vmatprep.subr.bf16.mxu1 %v6856_v14  ;;  %v6872_v25 = vld [vmem:[%s9691_s1 + $0xc4] ss:$16 sps:$4 sm:$0xff]   ;;  %v6876_v27 = vld [vmem:[%s9691_s1 + $0xc0] ss:$16 sps:$4 sm:$0xff]   ;;  %v6928_v62 = vld [vmem:[%s9691_s1 + $0xcc] ss:$16 sps:$4 sm:$0xff]  }
   0xe   :  { %v6874_v26 = vld [vmem:[%s9691_s1 + $0x6c4] ss:$16 sps:$4 sm:$0xff]   ;;  %v6877_v28 = vld [vmem:[%s9691_s1 + $0x6c0] ss:$16 sps:$4 sm:$0xff]   ;;  %v6926_v0 = vld [vmem:[%s9691_s1 + $0xc8] ss:$16 sps:$4 sm:$0xff]  }
   0xf   :  { %2110 = vmatpush1.bf16.msra.mxu0 %v6858_v15  ;;  %v6878_v29 = vld [vmem:[%s9691_s1 + $0xe4] ss:$16 sps:$4 sm:$0xff]   ;;  %v6882_v31 = vld [vmem:[%s9691_s1 + $0xe0] ss:$16 sps:$4 sm:$0xff]   ;;  %v6934_v4 = vld [vmem:[%s9691_s1 + $0xec] ss:$16 sps:$4 sm:$0xff]  }
  0x10   :  { %6174 = vmatpush1.bf16.msra.mxu1 %v6859_v16  ;;  %2111 = vmatprep.subr.bf16.mxu0 %v6860_v17  ;;  %v6880_v30 = vld [vmem:[%s9691_s1 + $0x6e4] ss:$16 sps:$4 sm:$0xff]   ;;  %v6883_v32 = vld [vmem:[%s9691_s1 + $0x6e0] ss:$16 sps:$4 sm:$0xff]   ;;  %v6932_v5 = vld [vmem:[%s9691_s1 + $0xe8] ss:$16 sps:$4 sm:$0xff]  }
  0x11   :  { %6167 = vmatprep.subr.bf16.mxu1 %v6862_v18  ;;  %v6884_v33 = vld [vmem:[%s9691_s1 + $0x104] ss:$16 sps:$4 sm:$0xff]   ;;  %v6890_v37 = vld [vmem:[%s9691_s1 + $0x100] ss:$16 sps:$4 sm:$0xff]   ;;  %v6945_v9 = vld [vmem:[%s9691_s1 + $0x10c] ss:$16 sps:$4 sm:$0xff]  }
  0x12   :  { %v6886_v35 = vld [vmem:[%s9692_s0 + $0x1d8] ss:$28 sps:$4 sm:$0xff]   ;;  %v6896_v41 = vld [vmem:[%s9691_s1 + $0x120] ss:$16 sps:$4 sm:$0xff]   ;;  %v6912_v53 = vld [vmem:[%s9692_s0 + $0x248] ss:$28 sps:$4 sm:$0xff]  }
  0x13   :  { %2112 = vmatpush1.bf16.msra.mxu0 %v6864_v19  ;;  %v6891_v38 = vld [vmem:[%s9691_s1 + $0x124] ss:$16 sps:$4 sm:$0xff]   ;;  %v6899_v44 = vld [vmem:[%s9692_s0 + $0x210] ss:$28 sps:$4 sm:$0xff]   ;;  %v6925_v63 = vld [vmem:[%s9692_s0 + $0x280] ss:$28 sps:$4 sm:$0xff]  }
  0x14   :  { %6175 = vmatpush1.bf16.msra.mxu1 %v6865_v20  ;;  %2113 = vmatprep.subr.bf16.mxu0 %v6866_v21  ;;  %v6897_v42 = vld [vmem:[%s9691_s1 + $0x144] ss:$16 sps:$4 sm:$0xff]   ;;  %v6903_v46 = vld [vmem:[%s9691_s1 + $0x140] ss:$16 sps:$4 sm:$0xff]   ;;  %v6943_v12 = vld [vmem:[%s9691_s1 + $0x108] ss:$16 sps:$4 sm:$0xff]  }
  0x15   :  { %6168 = vmatprep.subr.bf16.mxu1 %v6868_v22  ;;  %v6904_v47 = vld [vmem:[%s9691_s1 + $0x164] ss:$16 sps:$4 sm:$0xff]   ;;  %v6909_v50 = vld [vmem:[%s9691_s1 + $0x160] ss:$16 sps:$4 sm:$0xff]   ;;  %v6948_v13 = vld [vmem:[%s9691_s1 + $0x12c] ss:$16 sps:$4 sm:$0xff]  }
  0x16   :  { %v6910_v51 = vld [vmem:[%s9691_s1 + $0x184] ss:$16 sps:$4 sm:$0xff]   ;;  %v6916_v55 = vld [vmem:[%s9691_s1 + $0x180] ss:$16 sps:$4 sm:$0xff]   ;;  %v7768_v14 = vld [vmem:[%s9692_s0 + $0x3c] ss:$28 sps:$4 sm:$0xff]  }
  0x17   :  { %2114 = vmatpush1.bf16.msra.mxu0 %v6870_v23  ;;  %v7698_v56 = vld [vmem:[%s9692_s0 + $0x4] ss:$28 sps:$4 sm:$0xff]   ;;  %v6942_v11 = vld [vmem:[%s9692_s0 + $0x2b8] ss:$28 sps:$4 sm:$0xff]   ;;  %v6958_v18 = vld [vmem:[%s9691_s1 + $0x14c] ss:$16 sps:$4 sm:$0xff]  }
  0x18   :  { %6176 = vmatpush1.bf16.msra.mxu1 %v6871_v24  ;;  %2115 = vmatprep.subr.bf16.mxu0 %v6872_v25  ;;  %v6917_v57 = vld [vmem:[%s9691_s1 + $0x1a4] ss:$16 sps:$4 sm:$0xff]   ;;  %v6922_v60 = vld [vmem:[%s9691_s1 + $0x1a0] ss:$16 sps:$4 sm:$0xff]   ;;  %v6946_v15 = vld [vmem:[%s9691_s1 + $0x128] ss:$16 sps:$4 sm:$0xff]  }
  0x19   :  { %6169 = vmatprep.subr.bf16.mxu1 %v6874_v26  ;;  %2135 = vmatprep.mubr.bf16.mxu0 %v7698_v56  ;;  %v6923_v61 = vld [vmem:[%s9691_s1 + $0x1c4] ss:$16 sps:$4 sm:$0xff]   ;;  %v6929_v2 = vld [vmem:[%s9691_s1 + $0x1c0] ss:$16 sps:$4 sm:$0xff]   ;;  %v6956_v22 = vld [vmem:[%s9691_s1 + $0x148] ss:$16 sps:$4 sm:$0xff]  }
  0x1a   :  { %v6930_v3 = vld [vmem:[%s9691_s1 + $0x1e4] ss:$16 sps:$4 sm:$0xff]   ;;  %v6935_v6 = vld [vmem:[%s9691_s1 + $0x1e0] ss:$16 sps:$4 sm:$0xff]   ;;  %v6961_v24 = vld [vmem:[%s9691_s1 + $0x16c] ss:$16 sps:$4 sm:$0xff]  }
  0x1b   :  { %2116 = vmatpush1.bf16.msra.mxu0 %v6876_v27  ;;  %v7744_v7 = vld [vmem:[%s9692_s0] ss:$28 sps:$4 sm:$0xff]   ;;  %v6941_v8 = vld [vmem:[%s9691_s1 + $0x204] ss:$16 sps:$4 sm:$0xff]   ;;  %v6955_v21 = vld [vmem:[%s9692_s0 + $0x2f0] ss:$28 sps:$4 sm:$0xff]  }
  0x1c   :  { %6177 = vmatpush1.bf16.msra.mxu1 %v6877_v28  ;;  %2117 = vmatprep.subr.bf16.mxu0 %v6878_v29  ;;  %v6939_v10 = vld [vmem:[%s9691_s1 + $0x200] ss:$16 sps:$4 sm:$0xff]   ;;  %v6954_v16 = vld [vmem:[%s9691_s1 + $0x224] ss:$16 sps:$4 sm:$0xff]   ;;  %v6959_v27 = vld [vmem:[%s9691_s1 + $0x168] ss:$16 sps:$4 sm:$0xff]  }
  0x1d   :  { %6170 = vmatprep.subr.bf16.mxu1 %v6880_v30  ;;  %v6952_v17 = vld [vmem:[%s9691_s1 + $0x220] ss:$16 sps:$4 sm:$0xff]   ;;  %v6967_v19 = vld [vmem:[%s9691_s1 + $0x244] ss:$16 sps:$4 sm:$0xff]   ;;  %v6971_v28 = vld [vmem:[%s9691_s1 + $0x18c] ss:$16 sps:$4 sm:$0xff]  }
  0x1e   :  { %v7791_v20 = vld [vmem:[%s9692_s0 + $0x38] ss:$28 sps:$4 sm:$0xff]   ;;  %v6965_v25 = vld [vmem:[%s9691_s1 + $0x240] ss:$16 sps:$4 sm:$0xff]  }
  0x1f   :  { %2118 = vmatpush1.bf16.msra.mxu0 %v6882_v31  ;;  %v7802_v23 = vld [vmem:[%s9692_s0 + $0x74] ss:$28 sps:$4 sm:$0xff]   ;;  %v6968_v31 = vld [vmem:[%s9692_s0 + $0x328] ss:$28 sps:$4 sm:$0xff]  }
  0x20   :  { %6178 = vmatpush1.bf16.msra.mxu1 %v6883_v32  ;;  %2119 = vmatprep.subr.bf16.mxu0 %v6884_v33  ;;  %v6980_v26 = vld [vmem:[%s9691_s1 + $0x264] ss:$16 sps:$4 sm:$0xff]   ;;  %v7825_v29 = vld [vmem:[%s9692_s0 + $0x70] ss:$28 sps:$4 sm:$0xff]   ;;  %v6969_v32 = vld [vmem:[%s9691_s1 + $0x188] ss:$16 sps:$4 sm:$0xff]  }
  0x21   :  { %2875 = vmatprep.subr.bf16.mxu1 %v6889_v34  ;;  %v6978_v30 = vld [vmem:[%s9691_s1 + $0x260] ss:$16 sps:$4 sm:$0xff]   ;;  %v7839_v33 = vld [vmem:[%s9692_s0 + $0xac] ss:$28 sps:$4 sm:$0xff]  }
  0x22   :  { %v6974_v34 = vld [vmem:[%s9691_s1 + $0x1ac] ss:$16 sps:$4 sm:$0xff]  }
  0x23   :  { %2795 = vmatmul.mubr.bf16.vlgmr.msra.gmra.mrb[0].mxu1 %v6886_v35  ;;  %2120 = vmatpush1.bf16.msra.mxu0 %v6890_v37  ;;  %v6993_v35 = vld [vmem:[%s9691_s1 + $0x284] ss:$16 sps:$4 sm:$0xff]   ;;  %v6991_v37 = vld [vmem:[%s9691_s1 + $0x280] ss:$16 sps:$4 sm:$0xff]  }
  0x24   :  { %2876 = vmatpush1.bf16.msra.mxu1 %v6887_v36  ;;  %2121 = vmatprep.subr.bf16.mxu0 %v6891_v38  ;;  %v6972_v36 = vld [vmem:[%s9691_s1 + $0x1a8] ss:$16 sps:$4 sm:$0xff]   ;;  %v6999_v38 = vld [vmem:[%s9691_s1 + $0x2a4] ss:$16 sps:$4 sm:$0xff]  }
  0x25   :  { %2877 = vmatprep.subr.bf16.mxu1 %v6895_v39  ;;  %2804 = vmatprep.mubr.bf16.mxu1 %v7476_v1  ;;  %v6984_v39 = vld [vmem:[%s9691_s1 + $0x1cc] ss:$16 sps:$4 sm:$0xff]  }
  0x27   :  { %2122 = vmatpush1.bf16.msra.mxu0 %v6896_v41  ;;  %v6981_v41 = vld [vmem:[%s9692_s0 + $0x360] ss:$28 sps:$4 sm:$0xff]  }
  0x28   :  { %2878 = vmatpush1.bf16.msra.mxu1 %v6893_v40  ;;  %2123 = vmatprep.subr.bf16.mxu0 %v6897_v42  ;;  %v7865_v40 = vld [vmem:[%s9692_s0 + $0xa8] ss:$28 sps:$4 sm:$0xff]  }
  0x29   :  { %2879 = vmatprep.subr.bf16.mxu1 %v6902_v43  ;;  %v6982_v42 = vld [vmem:[%s9691_s1 + $0x1c8] ss:$16 sps:$4 sm:$0xff]   ;;  %v7876_v43 = vld [vmem:[%s9692_s0 + $0xe4] ss:$28 sps:$4 sm:$0xff]  }
  0x2b   :  { %2805 = vmatmul.mubr.bf16.gmra.mrb[4].mxu1 %v6899_v44  ;;  %2124 = vmatpush1.bf16.msra.mxu0 %v6903_v46  ;;  %v6987_v44 = vld [vmem:[%s9691_s1 + $0x1ec] ss:$16 sps:$4 sm:$0xff]   ;;  %v7005_v46 = vld [vmem:[%s9691_s1 + $0x2c4] ss:$16 sps:$4 sm:$0xff]  }
  0x2c   :  { %2880 = vmatpush1.bf16.msra.mxu1 %v6900_v45  ;;  %2125 = vmatprep.subr.bf16.mxu0 %v6904_v47  ;;  %v6997_v45 = vld [vmem:[%s9691_s1 + $0x2a0] ss:$16 sps:$4 sm:$0xff]   ;;  %v6985_v47 = vld [vmem:[%s9691_s1 + $0x1e8] ss:$16 sps:$4 sm:$0xff]  }
  0x2d   :  { %2881 = vmatprep.subr.bf16.mxu1 %v6908_v48  ;;  %2814 = vmatprep.mubr.bf16.mxu1 %v7476_v1  ;;  %v7003_v48 = vld [vmem:[%s9691_s1 + $0x2c0] ss:$16 sps:$4 sm:$0xff]  }
  0x2f   :  { %2126 = vmatpush1.bf16.msra.mxu0 %v6909_v50  ;;  %v7904_v50 = vld [vmem:[%s9692_s0 + $0x11c] ss:$28 sps:$4 sm:$0xff]  }
  0x30   :  { %2882 = vmatpush1.bf16.msra.mxu1 %v6906_v49  ;;  %2127 = vmatprep.subr.bf16.mxu0 %v6910_v51  ;;  %v7899_v49 = vld [vmem:[%s9692_s0 + $0xe0] ss:$28 sps:$4 sm:$0xff]   ;;  %v7011_v51 = vld [vmem:[%s9691_s1 + $0x2e4] ss:$16 sps:$4 sm:$0xff]  }
  0x31   :  { %2883 = vmatprep.subr.bf16.mxu1 %v6915_v52  ;;  %v7044_v52 = vld [vmem:[%s9691_s1 + $0x20c] ss:$16 sps:$4 sm:$0xff]  }
  0x33   :  { %2815 = vmatmul.mubr.bf16.gmra.mrb[8].mxu1 %v6912_v53  ;;  %2128 = vmatpush1.bf16.msra.mxu0 %v6916_v55  ;;  %v7009_v53 = vld [vmem:[%s9691_s1 + $0x2e0] ss:$16 sps:$4 sm:$0xff]   ;;  %v7017_v55 = vld [vmem:[%s9691_s1 + $0x304] ss:$16 sps:$4 sm:$0xff]  }
  0x34   :  { %2884 = vmatpush1.bf16.msra.mxu1 %v6913_v54  ;;  %2129 = vmatprep.subr.bf16.mxu0 %v6917_v57  ;;  %v7042_v54 = vld [vmem:[%s9691_s1 + $0x208] ss:$16 sps:$4 sm:$0xff]   ;;  %v7015_v57 = vld [vmem:[%s9691_s1 + $0x300] ss:$16 sps:$4 sm:$0xff]  }
  0x35   :  { %2885 = vmatprep.subr.bf16.mxu1 %v6921_v58  ;;  %2824 = vmatprep.mubr.bf16.mxu1 %v7476_v1  ;;  %v7045_v58 = vld [vmem:[%s9691_s1 + $0x228] ss:$16 sps:$4 sm:$0xff]  }
  0x37   :  { %2130 = vmatpush1.bf16.msra.mxu0 %v6922_v60  ;;  %v7942_v60 = vld [vmem:[%s9692_s0 + $0x154] ss:$28 sps:$4 sm:$0xff]  }
  0x38   :  { %2886 = vmatpush1.bf16.msra.mxu1 %v6919_v59  ;;  %2131 = vmatprep.subr.bf16.mxu0 %v6923_v61  ;;  %v7937_v59 = vld [vmem:[%s9692_s0 + $0x118] ss:$28 sps:$4 sm:$0xff]  }
  0x39   :  { %2887 = vmatprep.subr.bf16.mxu1 %v6928_v62  ;;  %v7023_v61 = vld [vmem:[%s9691_s1 + $0x324] ss:$16 sps:$4 sm:$0xff]   ;;  %v7056_v62 = vld [vmem:[%s9691_s1 + $0x24c] ss:$16 sps:$4 sm:$0xff]  }
  0x3b   :  { %2825 = vmatmul.mubr.bf16.gmra.mrb[12].mxu1 %v6925_v63  ;;  %2132 = vmatpush1.bf16.msra.mxu0 %v6929_v2  ;;  %v7021_v63 = vld [vmem:[%s9691_s1 + $0x320] ss:$16 sps:$4 sm:$0xff]   ;;  %v7029_v2 = vld [vmem:[%s9691_s1 + $0x344] ss:$16 sps:$4 sm:$0xff]  }
  0x3c   :  { %2888 = vmatpush1.bf16.msra.mxu1 %v6926_v0  ;;  %2133 = vmatprep.subr.bf16.mxu0 %v6930_v3  ;;  %v7054_v0 = vld [vmem:[%s9691_s1 + $0x248] ss:$16 sps:$4 sm:$0xff]   ;;  %v7059_v3 = vld [vmem:[%s9691_s1 + $0x26c] ss:$16 sps:$4 sm:$0xff]  }
  0x3d   :  { %2889 = vmatprep.subr.bf16.mxu1 %v6934_v4  ;;  %2834 = vmatprep.mubr.bf16.mxu1 %v7476_v1  ;;  %v7027_v4 = vld [vmem:[%s9691_s1 + $0x340] ss:$16 sps:$4 sm:$0xff]  }
  0x3f   :  { %2134 = vmatpush1.bf16.msra.mxu0 %v6935_v6  ;;  %v7975_v6 = vld [vmem:[%s9692_s0 + $0x150] ss:$28 sps:$4 sm:$0xff]  }
  0x40   :  { %2890 = vmatpush1.bf16.msra.mxu1 %v6932_v5  ;;  %2296 = vmatprep.subr.bf16.mxu0 %v6941_v8  ;;  %v7057_v5 = vld [vmem:[%s9691_s1 + $0x268] ss:$16 sps:$4 sm:$0xff]   ;;  %v7035_v8 = vld [vmem:[%s9691_s1 + $0x364] ss:$16 sps:$4 sm:$0xff]  }
  0x41   :  { %2891 = vmatprep.subr.bf16.mxu1 %v6945_v9  ;;  %v7068_v9 = vld [vmem:[%s9691_s1 + $0x28c] ss:$16 sps:$4 sm:$0xff]  }
  0x42   :  { %2136 = vmatmul.mubr.bf16.vlgmr.msra.gmra.mrb[0].mxu0 %v7744_v7 }
  0x43   :  { %2835 = vmatmul.mubr.bf16.gmra.mrb[16].mxu1 %v6942_v11  ;;  %2297 = vmatpush1.bf16.msra.mxu0 %v6939_v10  ;;  %v7033_v10 = vld [vmem:[%s9691_s1 + $0x360] ss:$16 sps:$4 sm:$0xff]   ;;  %v7066_v11 = vld [vmem:[%s9691_s1 + $0x288] ss:$16 sps:$4 sm:$0xff]  }
  0x44   :  { %2892 = vmatpush1.bf16.msra.mxu1 %v6943_v12  ;;  %2145 = vmatprep.mubr.bf16.mxu0 %v7768_v14  ;;  %v7041_v12 = vld [vmem:[%s9691_s1 + $0x384] ss:$16 sps:$4 sm:$0xff]  }
  0x45   :  { %2893 = vmatprep.subr.bf16.mxu1 %v6948_v13  ;;  %2844 = vmatprep.mubr.bf16.mxu1 %v7476_v1  ;;  %v7071_v13 = vld [vmem:[%s9691_s1 + $0x2ac] ss:$16 sps:$4 sm:$0xff]  }
  0x46   :  { %2298 = vmatprep.subr.bf16.mxu0 %v6954_v16  ;;  %v8013_v16 = vld [vmem:[%s9692_s0 + $0x188] ss:$28 sps:$4 sm:$0xff]  }
  0x47   :  { %2299 = vmatpush1.bf16.msra.mxu0 %v6952_v17  ;;  %v8018_v17 = vld [vmem:[%s9692_s0 + $0x1c4] ss:$28 sps:$4 sm:$0xff]  }
  0x48   :  { %2894 = vmatpush1.bf16.msra.mxu1 %v6946_v15  ;;  %2300 = vmatprep.subr.bf16.mxu0 %v6967_v19  ;;  %v7069_v15 = vld [vmem:[%s9691_s1 + $0x2a8] ss:$16 sps:$4 sm:$0xff]   ;;  %v7080_v19 = vld [vmem:[%s9691_s1 + $0x2cc] ss:$16 sps:$4 sm:$0xff]  }
  0x49   :  { %2895 = vmatprep.subr.bf16.mxu1 %v6958_v18  ;;  %v7053_v18 = vld [vmem:[%s9691_s1 + $0x3a4] ss:$16 sps:$4 sm:$0xff]  }
  0x4a   :  { %2146 = vmatmul.mubr.bf16.gmra.mrb[4].mxu0 %v7791_v20 }
  0x4b   :  { %2845 = vmatmul.mubr.bf16.gmra.mrb[20].mxu1 %v6955_v21  ;;  %2155 = vmatprep.mubr.bf16.mxu0 %v7802_v23  ;;  %v7078_v21 = vld [vmem:[%s9691_s1 + $0x2c8] ss:$16 sps:$4 sm:$0xff]  }
  0x4c   :  { %2896 = vmatpush1.bf16.msra.mxu1 %v6956_v22  ;;  %2854 = vmatprep.mubr.bf16.mxu1 %v7476_v1  ;;  %v7065_v22 = vld [vmem:[%s9691_s1 + $0x3c4] ss:$16 sps:$4 sm:$0xff]  }
  0x4d   :  { %2897 = vmatprep.subr.bf16.mxu1 %v6961_v24  ;;  %2301 = vmatpush1.bf16.msra.mxu0 %v6965_v25  ;;  %v7063_v24 = vld [vmem:[%s9691_s1 + $0x3c0] ss:$16 sps:$4 sm:$0xff]   ;;  %v7081_v25 = vld [vmem:[%s9691_s1 + $0x2e8] ss:$16 sps:$4 sm:$0xff]  }
  0x4e   :  { %2302 = vmatprep.subr.bf16.mxu0 %v6980_v26  ;;  %v8051_v26 = vld [vmem:[%s9692_s0 + $0x1c0] ss:$28 sps:$4 sm:$0xff]  }
  0x50   :  { %2898 = vmatpush1.bf16.msra.mxu1 %v6959_v27  ;;  %v8056_v27 = vld [vmem:[%s9692_s0 + $0x1fc] ss:$28 sps:$4 sm:$0xff]  }
  0x51   :  { %2899 = vmatprep.subr.bf16.mxu1 %v6971_v28  ;;  %2303 = vmatpush1.bf16.msra.mxu0 %v6978_v30  ;;  %v7077_v28 = vld [vmem:[%s9691_s1 + $0x3e4] ss:$16 sps:$4 sm:$0xff]   ;;  %v7075_v30 = vld [vmem:[%s9691_s1 + $0x3e0] ss:$16 sps:$4 sm:$0xff]  }
  0x52   :  { %2156 = vmatmul.mubr.bf16.gmra.mrb[8].mxu0 %v7825_v29  ;;  %2304 = vmatprep.subr.bf16.mxu0 %v6993_v35  ;;  %v7020_v35 = vld [vmem:[%s9692_s0 + $0x1f8] ss:$28 sps:$4 sm:$0xff]  }
  0x53   :  { %2855 = vmatmul.mubr.bf16.gmra.mrb[24].mxu1 %v6968_v31  ;;  %2165 = vmatprep.mubr.bf16.mxu0 %v7839_v33  ;;  %v7090_v31 = vld [vmem:[%s9691_s1 + $0x308] ss:$16 sps:$4 sm:$0xff]  }
  0x54   :  { %2900 = vmatpush1.bf16.msra.mxu1 %v6969_v32  ;;  %2864 = vmatprep.mubr.bf16.mxu1 %v7476_v1  ;;  %v7089_v32 = vld [vmem:[%s9691_s1 + $0x404] ss:$16 sps:$4 sm:$0xff]  }
  0x55   :  { %2901 = vmatprep.subr.bf16.mxu1 %v6974_v34  ;;  %2305 = vmatpush1.bf16.msra.mxu0 %v6991_v37  ;;  %v7093_v34 = vld [vmem:[%s9691_s1 + $0x328] ss:$16 sps:$4 sm:$0xff]   ;;  %v7104_v37 = vld [vmem:[%s9691_s1 + $0x34c] ss:$16 sps:$4 sm:$0xff]  }
  0x56   :  { %2306 = vmatprep.subr.bf16.mxu0 %v6999_v38  ;;  %v7102_v38 = vld [vmem:[%s9691_s1 + $0x348] ss:$16 sps:$4 sm:$0xff]  }
  0x58   :  { %2902 = vmatpush1.bf16.msra.mxu1 %v6972_v36  ;;  %v7024_v36 = vld [vmem:[%s9692_s0 + $0x234] ss:$28 sps:$4 sm:$0xff]  }
  0x59   :  { %2903 = vmatprep.subr.bf16.mxu1 %v6984_v39  ;;  %2307 = vmatpush1.bf16.msra.mxu0 %v6997_v45  ;;  %v7107_v39 = vld [vmem:[%s9691_s1 + $0x36c] ss:$16 sps:$4 sm:$0xff]  }
  0x5a   :  { %2166 = vmatmul.mubr.bf16.gmra.mrb[12].mxu0 %v7865_v40  ;;  %2308 = vmatprep.subr.bf16.mxu0 %v7005_v46  ;;  %v7119_v45 = vld [vmem:[%s9691_s1 + $0x3ac] ss:$16 sps:$4 sm:$0xff]   ;;  %v7117_v46 = vld [vmem:[%s9691_s1 + $0x3a8] ss:$16 sps:$4 sm:$0xff]  }
  0x5b   :  { %2865 = vmatmul.mubr.bf16.gmra.mrb[28].mxu1 %v6981_v41  ;;  %2175 = vmatprep.mubr.bf16.mxu0 %v7876_v43  ;;  %v7026_v41 = vld [vmem:[%s9692_s0 + $0x230] ss:$28 sps:$4 sm:$0xff]  }
  0x5c   :  { %2904 = vmatpush1.bf16.msra.mxu1 %v6982_v42  ;;  %2907 = vmatprep.mubr.bf16.mxu1 %v7698_v56  ;;  %v7047_v56 = vld [vmem:[%s9691_s1 + $0x22c] ss:$16 sps:$4 sm:$0xff]  }
  0x5d   :  { %2905 = vmatprep.subr.bf16.mxu1 %v6987_v44  ;;  %2309 = vmatpush1.bf16.msra.mxu0 %v7003_v48  ;;  %v7030_v42 = vld [vmem:[%s9692_s0 + $0x26c] ss:$28 sps:$4 sm:$0xff]   ;;  %v7036_v48 = vld [vmem:[%s9692_s0 + $0x2a4] ss:$28 sps:$4 sm:$0xff]  }
  0x5e   :  { %2310 = vmatprep.subr.bf16.mxu0 %v7011_v51  ;;  %v7114_v44 = vld [vmem:[%s9691_s1 + $0x388] ss:$16 sps:$4 sm:$0xff]   ;;  %v7131_v51 = vld [vmem:[%s9691_s1 + $0x3ec] ss:$16 sps:$4 sm:$0xff]  }
  0x60   :  { %2906 = vmatpush1.bf16.msra.mxu1 %v6985_v47  ;;  %v7032_v47 = vld [vmem:[%s9692_s0 + $0x268] ss:$28 sps:$4 sm:$0xff]  }
  0x61   :  { %3068 = vmatprep.subr.bf16.mxu1 %v7044_v52  ;;  %2311 = vmatpush1.bf16.msra.mxu0 %v7009_v53  ;;  %v7038_v52 = vld [vmem:[%s9692_s0 + $0x2a0] ss:$28 sps:$4 sm:$0xff]  }
  0x62   :  { %2176 = vmatmul.mubr.bf16.gmra.mrb[16].mxu0 %v7899_v49  ;;  %2312 = vmatprep.subr.bf16.mxu0 %v7017_v55  ;;  %v7048_v53 = vld [vmem:[%s9692_s0 + $0x2dc] ss:$28 sps:$4 sm:$0xff]  }
  0x63   :  { %2908 = vmatmul.mubr.bf16.vlgmr.msra.gmra.mrb[32].mxu1 %v7744_v7  ;;  %2185 = vmatprep.mubr.bf16.mxu0 %v7904_v50  ;;  %v7980_v7 = vld [vmem:[%s9692_s0 + $0x18c] ss:$28 sps:$4 sm:$0xff]  }
  0x64   :  { %2917 = vmatprep.mubr.bf16.mxu1 %v7768_v14  ;;  %3069 = vmatpush1.bf16.msra.mxu1 %v7042_v54  ;;  %v7039_v14 = vld [vmem:[%s9691_s1 + $0x380] ss:$16 sps:$4 sm:$0xff]   ;;  %v7129_v54 = vld [vmem:[%s9691_s1 + $0x3e8] ss:$16 sps:$4 sm:$0xff]   ;;  %v7188_v55 = vld [vmem:[%s9691_s1 + $0x40c] ss:$16 sps:$4 sm:$0xff]  }
  0x65   :  { %3070 = vmatprep.subr.bf16.mxu1 %v7047_v56  ;;  %2313 = vmatpush1.bf16.msra.mxu0 %v7015_v57  ;;  %v7050_v56 = vld [vmem:[%s9692_s0 + $0x2d8] ss:$28 sps:$4 sm:$0xff]  }
  0x66   :  { %2314 = vmatprep.subr.bf16.mxu0 %v7023_v61  ;;  %v7060_v57 = vld [vmem:[%s9692_s0 + $0x314] ss:$28 sps:$4 sm:$0xff]   ;;  %v7086_v61 = vld [vmem:[%s9692_s0 + $0xc] ss:$28 sps:$4 sm:$0xff]  }
  0x68   :  { %3071 = vmatpush1.bf16.msra.mxu1 %v7045_v58  ;;  %v7062_v58 = vld [vmem:[%s9692_s0 + $0x310] ss:$28 sps:$4 sm:$0xff]  }
  0x69   :  { %3072 = vmatprep.subr.bf16.mxu1 %v7056_v62  ;;  %2315 = vmatpush1.bf16.msra.mxu0 %v7021_v63  ;;  %v7084_v62 = vld [vmem:[%s9692_s0 + $0x8] ss:$28 sps:$4 sm:$0xff]   ;;  %v7087_v63 = vld [vmem:[%s9691_s1 + $0x400] ss:$16 sps:$4 sm:$0xff]  }
  0x6a   :  { %2186 = vmatmul.mubr.bf16.gmra.mrb[20].mxu0 %v7937_v59  ;;  %2316 = vmatprep.subr.bf16.mxu0 %v7029_v2  ;;  %v7101_v2 = vld [vmem:[%s9691_s1 + $0x424] ss:$16 sps:$4 sm:$0xff]  }
  0x6b   :  { %2918 = vmatmul.mubr.bf16.gmra.mrb[36].mxu1 %v7791_v20  ;;  %2195 = vmatprep.mubr.bf16.mxu0 %v7942_v60  ;;  %v7051_v20 = vld [vmem:[%s9691_s1 + $0x3a0] ss:$16 sps:$4 sm:$0xff]  }
  0x6c   :  { %2927 = vmatprep.mubr.bf16.mxu1 %v7802_v23  ;;  %3073 = vmatpush1.bf16.msra.mxu1 %v7054_v0  ;;  %v7083_v23 = vld [vmem:[%s9691_s1 + $0x2ec] ss:$16 sps:$4 sm:$0xff]   ;;  %v7096_v0 = vld [vmem:[%s9692_s0 + $0x44] ss:$28 sps:$4 sm:$0xff]  }
  0x6d   :  { %3074 = vmatprep.subr.bf16.mxu1 %v7059_v3  ;;  %2317 = vmatpush1.bf16.msra.mxu0 %v7027_v4  ;;  %v7099_v3 = vld [vmem:[%s9691_s1 + $0x420] ss:$16 sps:$4 sm:$0xff]  }
  0x6e   :  { %2318 = vmatprep.subr.bf16.mxu0 %v7035_v8  ;;  %v8190_v4 = vld [vmem:[%s9692_s0 + $0x40] ss:$28 sps:$4 sm:$0xff]   ;;  %v7125_v8 = vld [vmem:[%s9691_s1 + $0x464] ss:$16 sps:$4 sm:$0xff]  }
  0x70   :  { %3075 = vmatpush1.bf16.msra.mxu1 %v7057_v5  ;;  %v7113_v5 = vld [vmem:[%s9691_s1 + $0x444] ss:$16 sps:$4 sm:$0xff]  }
  0x71   :  { %3076 = vmatprep.subr.bf16.mxu1 %v7068_v9  ;;  %2319 = vmatpush1.bf16.msra.mxu0 %v7033_v10  ;;  %v7123_v9 = vld [vmem:[%s9691_s1 + $0x460] ss:$16 sps:$4 sm:$0xff]   ;;  %v7137_v10 = vld [vmem:[%s9691_s1 + $0x484] ss:$16 sps:$4 sm:$0xff]  }
  0x72   :  { %2196 = vmatmul.mubr.bf16.gmra.mrb[24].mxu0 %v7975_v6  ;;  %2320 = vmatprep.subr.bf16.mxu0 %v7041_v12  ;;  %v8222_v12 = vld [vmem:[%s9692_s0 + $0xb4] ss:$28 sps:$4 sm:$0xff]  }
  0x73   :  { %2928 = vmatmul.mubr.bf16.gmra.mrb[40].mxu1 %v7825_v29  ;;  %2205 = vmatprep.mubr.bf16.mxu0 %v7980_v7  ;;  %v7092_v29 = vld [vmem:[%s9691_s1 + $0x30c] ss:$16 sps:$4 sm:$0xff]  }
  0x74   :  { %2937 = vmatprep.mubr.bf16.mxu1 %v7839_v33  ;;  %3077 = vmatpush1.bf16.msra.mxu1 %v7066_v11  ;;  %v7095_v33 = vld [vmem:[%s9691_s1 + $0x32c] ss:$16 sps:$4 sm:$0xff]   ;;  %v8217_v11 = vld [vmem:[%s9692_s0 + $0x78] ss:$28 sps:$4 sm:$0xff]  }
  0x75   :  { %3078 = vmatprep.subr.bf16.mxu1 %v7071_v13  ;;  %2321 = vmatpush1.bf16.msra.mxu0 %v7039_v14  ;;  %v7135_v13 = vld [vmem:[%s9691_s1 + $0x480] ss:$16 sps:$4 sm:$0xff]   ;;  %v7143_v14 = vld [vmem:[%s9691_s1 + $0x4a4] ss:$16 sps:$4 sm:$0xff]  }
  0x76   :  { %2322 = vmatprep.subr.bf16.mxu0 %v7053_v18  ;;  %v8246_v18 = vld [vmem:[%s9692_s0 + $0xec] ss:$28 sps:$4 sm:$0xff]  }
  0x78   :  { %3079 = vmatpush1.bf16.msra.mxu1 %v7069_v15  ;;  %v7141_v15 = vld [vmem:[%s9691_s1 + $0x4a0] ss:$16 sps:$4 sm:$0xff]  }
  0x79   :  { %3080 = vmatprep.subr.bf16.mxu1 %v7080_v19  ;;  %2323 = vmatpush1.bf16.msra.mxu0 %v7051_v20  ;;  %v7147_v19 = vld [vmem:[%s9691_s1 + $0x4c0] ss:$16 sps:$4 sm:$0xff]   ;;  %v7155_v20 = vld [vmem:[%s9691_s1 + $0x4e4] ss:$16 sps:$4 sm:$0xff]  }
  0x7a   :  { %2206 = vmatmul.mubr.bf16.gmra.mrb[28].mxu0 %v8013_v16  ;;  %2324 = vmatprep.subr.bf16.mxu0 %v7065_v22  ;;  %v7161_v22 = vld [vmem:[%s9691_s1 + $0x504] ss:$16 sps:$4 sm:$0xff]  }
  0x7b   :  { %2938 = vmatmul.mubr.bf16.gmra.mrb[44].mxu1 %v7865_v40  ;;  %2215 = vmatprep.mubr.bf16.mxu0 %v8018_v17  ;;  %v7105_v40 = vld [vmem:[%s9691_s1 + $0x368] ss:$16 sps:$4 sm:$0xff]  }
  0x7c   :  { %2947 = vmatprep.mubr.bf16.mxu1 %v7876_v43  ;;  %3081 = vmatpush1.bf16.msra.mxu1 %v7078_v21  ;;  %v7116_v43 = vld [vmem:[%s9691_s1 + $0x38c] ss:$16 sps:$4 sm:$0xff]   ;;  %v7153_v21 = vld [vmem:[%s9691_s1 + $0x4e0] ss:$16 sps:$4 sm:$0xff]  }
  0x7d   :  { %3082 = vmatprep.subr.bf16.mxu1 %v7083_v23  ;;  %2325 = vmatpush1.bf16.msra.mxu0 %v7063_v24  ;;  %v8265_v23 = vld [vmem:[%s9692_s0 + $0xe8] ss:$28 sps:$4 sm:$0xff]  }
  0x7e   :  { %2326 = vmatprep.subr.bf16.mxu0 %v7077_v28  ;;  %v8270_v24 = vld [vmem:[%s9692_s0 + $0x124] ss:$28 sps:$4 sm:$0xff]   ;;  %v7191_v28 = vld [vmem:[%s9691_s1 + $0x42c] ss:$16 sps:$4 sm:$0xff]  }
  0x80   :  { %3083 = vmatpush1.bf16.msra.mxu1 %v7081_v25  ;;  %v7159_v25 = vld [vmem:[%s9691_s1 + $0x500] ss:$16 sps:$4 sm:$0xff]  }
  0x81   :  { %3084 = vmatprep.subr.bf16.mxu1 %v7092_v29  ;;  %2327 = vmatpush1.bf16.msra.mxu0 %v7075_v30  ;;  %v7165_v29 = vld [vmem:[%s9691_s1 + $0x520] ss:$16 sps:$4 sm:$0xff]   ;;  %v7189_v30 = vld [vmem:[%s9691_s1 + $0x428] ss:$16 sps:$4 sm:$0xff]  }
  0x82   :  { %2216 = vmatmul.mubr.bf16.gmra.mrb[32].mxu0 %v8051_v26  ;;  %2489 = vmatprep.subr.bf16.mxu0 %v7089_v32  ;;  %v7200_v32 = vld [vmem:[%s9691_s1 + $0x44c] ss:$16 sps:$4 sm:$0xff]  }
  0x83   :  { %2948 = vmatmul.mubr.bf16.gmra.mrb[48].mxu1 %v7899_v49  ;;  %2225 = vmatprep.mubr.bf16.mxu0 %v8056_v27  ;;  %v7128_v49 = vld [vmem:[%s9691_s1 + $0x3cc] ss:$16 sps:$4 sm:$0xff]  }
  0x84   :  { %2957 = vmatprep.mubr.bf16.mxu1 %v7904_v50  ;;  %3085 = vmatpush1.bf16.msra.mxu1 %v7090_v31  ;;  %v7126_v50 = vld [vmem:[%s9691_s1 + $0x3c8] ss:$16 sps:$4 sm:$0xff]   ;;  %v7173_v31 = vld [vmem:[%s9691_s1 + $0x544] ss:$16 sps:$4 sm:$0xff]  }
  0x85   :  { %3086 = vmatprep.subr.bf16.mxu1 %v7095_v33  ;;  %v8301_v33 = vld [vmem:[%s9692_s0 + $0x120] ss:$28 sps:$4 sm:$0xff]  }
  0x88   :  { %3087 = vmatpush1.bf16.msra.mxu1 %v7093_v34  ;;  %v8306_v34 = vld [vmem:[%s9692_s0 + $0x15c] ss:$28 sps:$4 sm:$0xff]  }
  0x89   :  { %3088 = vmatprep.subr.bf16.mxu1 %v7104_v37  ;;  %v7179_v37 = vld [vmem:[%s9691_s1 + $0x564] ss:$16 sps:$4 sm:$0xff]  }
  0x8a   :  { %2226 = vmatmul.mubr.bf16.gmra.mrb[36].mxu0 %v7020_v35 }
  0x8b   :  { %2958 = vmatmul.mubr.bf16.gmra.mrb[52].mxu1 %v7937_v59  ;;  %2235 = vmatprep.mubr.bf16.mxu0 %v7024_v36  ;;  %v7072_v59 = vld [vmem:[%s9692_s0 + $0x34c] ss:$28 sps:$4 sm:$0xff]  }
  0x8c   :  { %2967 = vmatprep.mubr.bf16.mxu1 %v7942_v60  ;;  %3089 = vmatpush1.bf16.msra.mxu1 %v7102_v38  ;;  %v7074_v60 = vld [vmem:[%s9692_s0 + $0x348] ss:$28 sps:$4 sm:$0xff]   ;;  %v7203_v38 = vld [vmem:[%s9691_s1 + $0x46c] ss:$16 sps:$4 sm:$0xff]  }
  0x8d   :  { %3090 = vmatprep.subr.bf16.mxu1 %v7107_v39  ;;  %v7177_v39 = vld [vmem:[%s9691_s1 + $0x560] ss:$16 sps:$4 sm:$0xff]  }
  0x90   :  { %3091 = vmatpush1.bf16.msra.mxu1 %v7105_v40  ;;  %v7201_v40 = vld [vmem:[%s9691_s1 + $0x468] ss:$16 sps:$4 sm:$0xff]  }
  0x91   :  { %3092 = vmatprep.subr.bf16.mxu1 %v7116_v43  ;;  %v8339_v43 = vld [vmem:[%s9692_s0 + $0x158] ss:$28 sps:$4 sm:$0xff]  }
  0x92   :  { %2236 = vmatmul.mubr.bf16.gmra.mrb[40].mxu0 %v7026_v41 }
  0x93   :  { %2968 = vmatmul.mubr.bf16.gmra.mrb[56].mxu1 %v7975_v6  ;;  %2245 = vmatprep.mubr.bf16.mxu0 %v7030_v42  ;;  %v8198_v6 = vld [vmem:[%s9692_s0 + $0x7c] ss:$28 sps:$4 sm:$0xff]  }
  0x94   :  { %2977 = vmatprep.mubr.bf16.mxu1 %v7980_v7  ;;  %3093 = vmatpush1.bf16.msra.mxu1 %v7114_v44  ;;  %v7111_v7 = vld [vmem:[%s9691_s1 + $0x440] ss:$16 sps:$4 sm:$0xff]  }
  0x95   :  { %3094 = vmatprep.subr.bf16.mxu1 %v7119_v45  ;;  %v8344_v44 = vld [vmem:[%s9692_s0 + $0x194] ss:$28 sps:$4 sm:$0xff]  }
  0x96   :  { %v7183_v45 = vld [vmem:[%s9691_s1 + $0x580] ss:$16 sps:$4 sm:$0xff]  }
  0x98   :  { %3095 = vmatpush1.bf16.msra.mxu1 %v7117_v46  ;;  %v7210_v46 = vld [vmem:[%s9691_s1 + $0x488] ss:$16 sps:$4 sm:$0xff]  }
  0x99   :  { %3096 = vmatprep.subr.bf16.mxu1 %v7128_v49  ;;  %v7195_v49 = vld [vmem:[%s9691_s1 + $0x5a0] ss:$16 sps:$4 sm:$0xff]  }
  0x9a   :  { %2246 = vmatmul.mubr.bf16.gmra.mrb[44].mxu0 %v7032_v47 }
  0x9b   :  { %2978 = vmatmul.mubr.bf16.gmra.mrb[60].mxu1 %v8013_v16  ;;  %2255 = vmatprep.mubr.bf16.mxu0 %v7036_v48  ;;  %v7149_v16 = vld [vmem:[%s9691_s1 + $0x4c4] ss:$16 sps:$4 sm:$0xff]  }
  0x9c   :  { %2987 = vmatprep.mubr.bf16.mxu1 %v8018_v17  ;;  %3097 = vmatpush1.bf16.msra.mxu1 %v7126_v50  ;;  %v8241_v17 = vld [vmem:[%s9692_s0 + $0xb0] ss:$28 sps:$4 sm:$0xff]   ;;  %v7213_v50 = vld [vmem:[%s9691_s1 + $0x4a8] ss:$16 sps:$4 sm:$0xff]  }
  0x9d   :  { %3098 = vmatprep.subr.bf16.mxu1 %v7131_v51  ;;  %v7209_v51 = vld [vmem:[%s9691_s1 + $0x5c4] ss:$16 sps:$4 sm:$0xff]  }
  0xa0   :  { %3099 = vmatpush1.bf16.msra.mxu1 %v7129_v54  ;;  %v8379_v54 = vld [vmem:[%s9692_s0 + $0x190] ss:$28 sps:$4 sm:$0xff]  }
  0xa1   :  { %3261 = vmatprep.subr.bf16.mxu1 %v7188_v55 }
  0xa2   :  { %2256 = vmatmul.mubr.bf16.gmra.mrb[48].mxu0 %v7038_v52 }
  0xa3   :  { %2988 = vmatmul.mubr.bf16.gmra.mrb[64].mxu1 %v8051_v26  ;;  %2265 = vmatprep.mubr.bf16.mxu0 %v7048_v53  ;;  %v7186_v26 = vld [vmem:[%s9691_s1 + $0x408] ss:$16 sps:$4 sm:$0xff]  }
  0xa4   :  { %2997 = vmatprep.mubr.bf16.mxu1 %v8056_v27  ;;  %v7167_v27 = vld [vmem:[%s9691_s1 + $0x524] ss:$16 sps:$4 sm:$0xff]  }
  0xaa   :  { %2266 = vmatmul.mubr.bf16.gmra.mrb[52].mxu0 %v7050_v56 }
  0xab   :  { %2998 = vmatmul.mubr.bf16.gmra.mrb[68].mxu1 %v7020_v35  ;;  %2275 = vmatprep.mubr.bf16.mxu0 %v7060_v57  ;;  %v7171_v35 = vld [vmem:[%s9691_s1 + $0x540] ss:$16 sps:$4 sm:$0xff]  }
  0xac   :  { %3007 = vmatprep.mubr.bf16.mxu1 %v7024_v36  ;;  %v7198_v36 = vld [vmem:[%s9691_s1 + $0x448] ss:$16 sps:$4 sm:$0xff]  }
  0xb2   :  { %2276 = vmatmul.mubr.bf16.gmra.mrb[56].mxu0 %v7062_v58 }
  0xb3   :  { %3008 = vmatmul.mubr.bf16.gmra.mrb[72].mxu1 %v7026_v41  ;;  %2285 = vmatprep.mubr.bf16.mxu0 %v7072_v59  ;;  %v7185_v41 = vld [vmem:[%s9691_s1 + $0x584] ss:$16 sps:$4 sm:$0xff]  }
  0xb4   :  { %3017 = vmatprep.mubr.bf16.mxu1 %v7030_v42  ;;  %v7212_v42 = vld [vmem:[%s9691_s1 + $0x48c] ss:$16 sps:$4 sm:$0xff]  }
  0xba   :  { %2286 = vmatmul.mubr.bf16.gmra.mrb[60].mxu0 %v7074_v60 }
  0xbb   :  { %3018 = vmatmul.mubr.bf16.gmra.mrb[76].mxu1 %v7032_v47  ;;  %2328 = vmatprep.mubr.bf16.mxu0 %v7086_v61  ;;  %v7197_v47 = vld [vmem:[%s9691_s1 + $0x5a4] ss:$16 sps:$4 sm:$0xff]  }
  0xbc   :  { %3027 = vmatprep.mubr.bf16.mxu1 %v7036_v48  ;;  %v7215_v48 = vld [vmem:[%s9691_s1 + $0x4ac] ss:$16 sps:$4 sm:$0xff]  }
  0xc2   :  { %2329 = vmatmul.mubr.bf16.vlgmr.msra.gmra.mrb[0].mxu0 %v7084_v62 }
  0xc3   :  { %3028 = vmatmul.mubr.bf16.gmra.mrb[80].mxu1 %v7038_v52  ;;  %2490 = vmatpush1.bf16.msra.mxu0 %v7087_v63  ;;  %v7224_v52 = vld [vmem:[%s9691_s1 + $0x4cc] ss:$16 sps:$4 sm:$0xff]   ;;  %v7219_v63 = vld [vmem:[%s9691_s1 + $0x5e0] ss:$16 sps:$4 sm:$0xff]  }
  0xc4   :  { %2338 = vmatprep.mubr.bf16.mxu0 %v7096_v0  ;;  %3037 = vmatprep.mubr.bf16.mxu1 %v7048_v53 }
  0xc5   :  { %2491 = vmatprep.subr.bf16.mxu0 %v7101_v2  ;;  %v7233_v2 = vld [vmem:[%s9691_s1 + $0x50c] ss:$16 sps:$4 sm:$0xff]  }
  0xc7   :  { %2492 = vmatpush1.bf16.msra.mxu0 %v7099_v3 }
  0xc8   :  { %2493 = vmatprep.subr.bf16.mxu0 %v7113_v5 }
  0xca   :  { %2339 = vmatmul.mubr.bf16.gmra.mrb[4].mxu0 %v8190_v4 }
  0xcb   :  { %3038 = vmatmul.mubr.bf16.gmra.mrb[84].mxu1 %v7050_v56  ;;  %2348 = vmatprep.mubr.bf16.mxu0 %v8198_v6  ;;  %v8386_v56 = vld [vmem:[%s9692_s0 + $0x1cc] ss:$28 sps:$4 sm:$0xff]  }
  0xcc   :  { %3047 = vmatprep.mubr.bf16.mxu1 %v7060_v57  ;;  %2494 = vmatpush1.bf16.msra.mxu0 %v7111_v7 }
  0xcd   :  { %2495 = vmatprep.subr.bf16.mxu0 %v7125_v8  ;;  %v7231_v8 = vld [vmem:[%s9691_s1 + $0x508] ss:$16 sps:$4 sm:$0xff]  }
  0xd0   :  { %2496 = vmatpush1.bf16.msra.mxu0 %v7123_v9 }
  0xd1   :  { %2497 = vmatprep.subr.bf16.mxu0 %v7137_v10  ;;  %v7452_v10 = vld [vmem:[%s9691_s1 + $0x604] ss:$16 sps:$4 sm:$0xff]  }
  0xd2   :  { %2349 = vmatmul.mubr.bf16.gmra.mrb[8].mxu0 %v8217_v11 }
  0xd3   :  { %3048 = vmatmul.mubr.bf16.gmra.mrb[88].mxu1 %v7062_v58  ;;  %2358 = vmatprep.mubr.bf16.mxu0 %v8222_v12  ;;  %v7207_v58 = vld [vmem:[%s9691_s1 + $0x5c0] ss:$16 sps:$4 sm:$0xff]  }
  0xd4   :  { %3057 = vmatprep.mubr.bf16.mxu1 %v7072_v59  ;;  %2498 = vmatpush1.bf16.msra.mxu0 %v7135_v13  ;;  %v7222_v59 = vld [vmem:[%s9691_s1 + $0x4c8] ss:$16 sps:$4 sm:$0xff]   ;;  %v7242_v13 = vld [vmem:[%s9691_s1 + $0x54c] ss:$16 sps:$4 sm:$0xff]  }
  0xd5   :  { %2499 = vmatprep.subr.bf16.mxu0 %v7143_v14 }
  0xd8   :  { %2500 = vmatpush1.bf16.msra.mxu0 %v7141_v15  ;;  %v8459_v15 = vld [vmem:[%s9692_s0 + $0x200] ss:$28 sps:$4 sm:$0xff]  }
  0xd9   :  { %2501 = vmatprep.subr.bf16.mxu0 %v7149_v16 }
  0xda   :  { %2359 = vmatmul.mubr.bf16.gmra.mrb[12].mxu0 %v8241_v17 }
  0xdb   :  { %3058 = vmatmul.mubr.bf16.gmra.mrb[92].mxu1 %v7074_v60  ;;  %2368 = vmatprep.mubr.bf16.mxu0 %v8246_v18 }
  0xdc   :  { %3100 = vmatprep.mubr.bf16.mxu1 %v7086_v61  ;;  %2502 = vmatpush1.bf16.msra.mxu0 %v7147_v19  ;;  %v7221_v61 = vld [vmem:[%s9691_s1 + $0x5e4] ss:$16 sps:$4 sm:$0xff]   ;;  %v7240_v19 = vld [vmem:[%s9691_s1 + $0x548] ss:$16 sps:$4 sm:$0xff]  }
  0xdd   :  { %2503 = vmatprep.subr.bf16.mxu0 %v7155_v20 }
  0xe0   :  { %2504 = vmatpush1.bf16.msra.mxu0 %v7153_v21  ;;  %v7245_v21 = vld [vmem:[%s9691_s1 + $0x56c] ss:$16 sps:$4 sm:$0xff]  }
  0xe1   :  { %2505 = vmatprep.subr.bf16.mxu0 %v7161_v22  ;;  %v7243_v22 = vld [vmem:[%s9691_s1 + $0x568] ss:$16 sps:$4 sm:$0xff]  }
  0xe2   :  { %2369 = vmatmul.mubr.bf16.gmra.mrb[16].mxu0 %v8265_v23 }
  0xe3   :  { %3101 = vmatmul.mubr.bf16.vlgmr.msra.gmra.mrb[32].mxu1 %v7084_v62  ;;  %2378 = vmatprep.mubr.bf16.mxu0 %v8270_v24  ;;  %v7227_v62 = vld [vmem:[%s9691_s1 + $0x4ec] ss:$16 sps:$4 sm:$0xff]  }
  0xe4   :  { %3110 = vmatprep.mubr.bf16.mxu1 %v7096_v0  ;;  %2506 = vmatpush1.bf16.msra.mxu0 %v7159_v25  ;;  %v7225_v0 = vld [vmem:[%s9691_s1 + $0x4e8] ss:$16 sps:$4 sm:$0xff]  }
  0xe5   :  { %3262 = vmatpush1.bf16.msra.mxu1 %v7186_v26  ;;  %2507 = vmatprep.subr.bf16.mxu0 %v7167_v27  ;;  %v7170_v25 = vld [vmem:[%s9692_s0 + $0x238] ss:$28 sps:$4 sm:$0xff]  }
  0xe6   :  { %3263 = vmatprep.subr.bf16.mxu1 %v7191_v28  ;;  %v7174_v27 = vld [vmem:[%s9692_s0 + $0x274] ss:$28 sps:$4 sm:$0xff]  }
  0xe8   :  { %2508 = vmatpush1.bf16.msra.mxu0 %v7165_v29  ;;  %v7249_v29 = vld [vmem:[%s9691_s1 + $0x588] ss:$16 sps:$4 sm:$0xff]  }
  0xe9   :  { %3264 = vmatpush1.bf16.msra.mxu1 %v7189_v30  ;;  %2509 = vmatprep.subr.bf16.mxu0 %v7173_v31  ;;  %v7254_v31 = vld [vmem:[%s9691_s1 + $0x5ac] ss:$16 sps:$4 sm:$0xff]  }
  0xea   :  { %3265 = vmatprep.subr.bf16.mxu1 %v7200_v32  ;;  %2379 = vmatmul.mubr.bf16.gmra.mrb[20].mxu0 %v8301_v33  ;;  %v7252_v32 = vld [vmem:[%s9691_s1 + $0x5a8] ss:$16 sps:$4 sm:$0xff]  }
  0xeb   :  { %3111 = vmatmul.mubr.bf16.gmra.mrb[36].mxu1 %v8190_v4  ;;  %2388 = vmatprep.mubr.bf16.mxu0 %v8306_v34  ;;  %v8422_v4 = vld [vmem:[%s9692_s0 + $0x1c8] ss:$28 sps:$4 sm:$0xff]  }
  0xec   :  { %3120 = vmatprep.mubr.bf16.mxu1 %v8198_v6  ;;  %2510 = vmatpush1.bf16.msra.mxu0 %v7171_v35  ;;  %v8429_v6 = vld [vmem:[%s9692_s0 + $0x204] ss:$28 sps:$4 sm:$0xff]   ;;  %v7176_v35 = vld [vmem:[%s9692_s0 + $0x270] ss:$28 sps:$4 sm:$0xff]  }
  0xed   :  { %3266 = vmatpush1.bf16.msra.mxu1 %v7198_v36  ;;  %2511 = vmatprep.subr.bf16.mxu0 %v7179_v37  ;;  %v7180_v37 = vld [vmem:[%s9692_s0 + $0x2ac] ss:$28 sps:$4 sm:$0xff]  }
  0xee   :  { %3267 = vmatprep.subr.bf16.mxu1 %v7203_v38 }
  0xf0   :  { %2512 = vmatpush1.bf16.msra.mxu0 %v7177_v39  ;;  %v7258_v39 = vld [vmem:[%s9691_s1 + $0x5c8] ss:$16 sps:$4 sm:$0xff]  }
  0xf1   :  { %3268 = vmatpush1.bf16.msra.mxu1 %v7201_v40  ;;  %2513 = vmatprep.subr.bf16.mxu0 %v7185_v41  ;;  %v7263_v41 = vld [vmem:[%s9691_s1 + $0x5ec] ss:$16 sps:$4 sm:$0xff]  }
  0xf2   :  { %3269 = vmatprep.subr.bf16.mxu1 %v7212_v42  ;;  %2389 = vmatmul.mubr.bf16.gmra.mrb[24].mxu0 %v8339_v43  ;;  %v7261_v42 = vld [vmem:[%s9691_s1 + $0x5e8] ss:$16 sps:$4 sm:$0xff]  }
  0xf3   :  { %3121 = vmatmul.mubr.bf16.gmra.mrb[40].mxu1 %v8217_v11  ;;  %2398 = vmatprep.mubr.bf16.mxu0 %v8344_v44  ;;  %v7236_v11 = vld [vmem:[%s9691_s1 + $0x52c] ss:$16 sps:$4 sm:$0xff]  }
  0xf4   :  { %3130 = vmatprep.mubr.bf16.mxu1 %v8222_v12  ;;  %2514 = vmatpush1.bf16.msra.mxu0 %v7183_v45  ;;  %v7234_v12 = vld [vmem:[%s9691_s1 + $0x528] ss:$16 sps:$4 sm:$0xff]  }
  0xf5   :  { %3270 = vmatpush1.bf16.msra.mxu1 %v7210_v46  ;;  %2515 = vmatprep.subr.bf16.mxu0 %v7197_v47  ;;  %v7192_v46 = vld [vmem:[%s9692_s0 + $0x2e4] ss:$28 sps:$4 sm:$0xff]  }
  0xf6   :  { %3271 = vmatprep.subr.bf16.mxu1 %v7215_v48  ;;  %v8374_v53 = vpop.f32.mrb[0].mxu1 }
  0xf7   :  { %v8381_v55 = vpop.f32.mrb[1].mxu1 }
  0xf8   :  { %v8388_v57 = vpop.f32.mrb[2].mxu1  ;;  %2516 = vmatpush1.bf16.msra.mxu0 %v7195_v49 }
  0xf9   :  { %3272 = vmatpush1.bf16.msra.mxu1 %v7213_v50  ;;  %v8396_v60 = vpop.f32.mrb[3].mxu1  ;;  %2517 = vmatprep.subr.bf16.mxu0 %v7209_v51  ;;  %v7194_v50 = vld [vmem:[%s9692_s0 + $0x2e0] ss:$28 sps:$4 sm:$0xff]  }
  0xfa   :  { %3273 = vmatprep.subr.bf16.mxu1 %v7224_v52  ;;  %2399 = vmatmul.mubr.bf16.gmra.mrb[28].mxu0 %v8379_v54  ;;  %v7204_v52 = vld [vmem:[%s9692_s0 + $0x31c] ss:$28 sps:$4 sm:$0xff]  }
  0xfb   :  { %3131 = vmatmul.mubr.bf16.gmra.mrb[44].mxu1 %v8241_v17  ;;  %2408 = vmatprep.mubr.bf16.mxu0 %v8386_v56  ;;  %v8466_v17 = vld [vmem:[%s9692_s0 + $0x23c] ss:$28 sps:$4 sm:$0xff]  }
  0xfc   :  { %3140 = vmatprep.mubr.bf16.mxu1 %v8246_v18  ;;  %2518 = vmatpush1.bf16.msra.mxu0 %v7207_v58 }
  0xfd   :  { %3274 = vmatpush1.bf16.msra.mxu1 %v7222_v59  ;;  %2519 = vmatprep.subr.bf16.mxu0 %v7221_v61  ;;  %v7206_v59 = vld [vmem:[%s9692_s0 + $0x318] ss:$28 sps:$4 sm:$0xff]  }
  0xfe   :  { %3275 = vmatprep.subr.bf16.mxu1 %v7227_v62  ;;  %v8417_v3 = vpop.f32.mrb[4].mxu1  ;;  %v7216_v62 = vld [vmem:[%s9692_s0 + $0x354] ss:$28 sps:$4 sm:$0xff]  }
  0xff   :  { %v8424_v5 = vpop.f32.mrb[5].mxu1 }
 0x100   :  { %v8431_v7 = vpop.f32.mrb[6].mxu1  ;;  %2520 = vmatpush1.bf16.msra.mxu0 %v7219_v63 }
 0x101   :  { %3276 = vmatpush1.bf16.msra.mxu1 %v7225_v0  ;;  %v8436_v9 = vpop.f32.mrb[7].mxu1  ;;  %2682 = vmatprep.subr.bf16.mxu0 %v7452_v10  ;;  %v7303_v10 = vld [vmem:[%s9691_s1 + $0x60c] ss:$16 sps:$4 sm:$0xff]  }
 0x102   :  { %3277 = vmatprep.subr.bf16.mxu1 %v7233_v2  ;;  %2409 = vmatmul.mubr.bf16.gmra.mrb[32].mxu0 %v8422_v4  ;;  %v7218_v2 = vld [vmem:[%s9692_s0 + $0x350] ss:$28 sps:$4 sm:$0xff]  }
 0x103   :  { %3141 = vmatmul.mubr.bf16.gmra.mrb[48].mxu1 %v8265_v23  ;;  %2418 = vmatprep.mubr.bf16.mxu0 %v8429_v6  ;;  %v7251_v23 = vld [vmem:[%s9691_s1 + $0x58c] ss:$16 sps:$4 sm:$0xff]  }
 0x104   :  { %3150 = vmatprep.mubr.bf16.mxu1 %v8270_v24 }
 0x105   :  { %3278 = vmatpush1.bf16.msra.mxu1 %v7231_v8  ;;  %v7237_v8 = vld [vmem:[%s9692_s0 + $0x4c] ss:$28 sps:$4 sm:$0xff]  }
 0x106   :  { %3279 = vmatprep.subr.bf16.mxu1 %v7236_v11  ;;  %v8454_v14 = vpop.f32.mrb[8].mxu1  ;;  %v7453_v11 = vld [vmem:[%s9691_s1 + $0x600] ss:$16 sps:$4 sm:$0xff]  }
 0x107   :  { %v8461_v16 = vpop.f32.mrb[9].mxu1 }
 0x108   :  { %v8468_v18 = vpop.f32.mrb[10].mxu1 }
 0x109   :  { %3280 = vmatpush1.bf16.msra.mxu1 %v7234_v12  ;;  %v8473_v20 = vpop.f32.mrb[11].mxu1  ;;  %v7454_v12 = vld [vmem:[%s9691_s1 + $0x624] ss:$16 sps:$4 sm:$0xff]  }
 0x10a   :  { %3281 = vmatprep.subr.bf16.mxu1 %v7242_v13  ;;  %2419 = vmatmul.mubr.bf16.gmra.mrb[36].mxu0 %v8459_v15  ;;  %v7239_v13 = vld [vmem:[%s9692_s0 + $0x48] ss:$28 sps:$4 sm:$0xff]  }
 0x10b   :  { %3151 = vmatmul.mubr.bf16.gmra.mrb[52].mxu1 %v8301_v33  ;;  %2428 = vmatprep.mubr.bf16.mxu0 %v8466_v17  ;;  %v7260_v33 = vld [vmem:[%s9691_s1 + $0x5cc] ss:$16 sps:$4 sm:$0xff]  }
 0x10c   :  { %3160 = vmatprep.mubr.bf16.mxu1 %v8306_v34 }
 0x10d   :  { %3282 = vmatpush1.bf16.msra.mxu1 %v7240_v19  ;;  %v7456_v19 = vld [vmem:[%s9691_s1 + $0x644] ss:$16 sps:$4 sm:$0xff]  }
 0x10e   :  { %3283 = vmatprep.subr.bf16.mxu1 %v7245_v21  ;;  %v8488_v24 = vpop.f32.mrb[12].mxu1  ;;  %v7457_v21 = vld [vmem:[%s9691_s1 + $0x640] ss:$16 sps:$4 sm:$0xff]  }
 0x10f   :  { %v8493_v26 = vpop.f32.mrb[13].mxu1 }
 0x110   :  { %v8498_v28 = vpop.f32.mrb[14].mxu1 }
 0x111   :  { %3284 = vmatpush1.bf16.msra.mxu1 %v7243_v22  ;;  %v8503_v30 = vpop.f32.mrb[15].mxu1  ;;  %v7458_v22 = vld [vmem:[%s9691_s1 + $0x664] ss:$16 sps:$4 sm:$0xff]  }
 0x112   :  { %3285 = vmatprep.subr.bf16.mxu1 %v7251_v23  ;;  %2429 = vmatmul.mubr.bf16.gmra.mrb[40].mxu0 %v7170_v25  ;;  %v7248_v23 = vld [vmem:[%s9692_s0 + $0x80] ss:$28 sps:$4 sm:$0xff]  }
 0x113   :  { %3161 = vmatmul.mubr.bf16.gmra.mrb[56].mxu1 %v8339_v43  ;;  %2438 = vmatprep.mubr.bf16.mxu0 %v7174_v27 }
 0x114   :  { %3170 = vmatprep.mubr.bf16.mxu1 %v8344_v44  ;;  %v7182_v44 = vld [vmem:[%s9692_s0 + $0x2a8] ss:$28 sps:$4 sm:$0xff]  }
 0x115   :  { %3286 = vmatpush1.bf16.msra.mxu1 %v7249_v29  ;;  %v7460_v29 = vld [vmem:[%s9691_s1 + $0x684] ss:$16 sps:$4 sm:$0xff]  }
 0x116   :  { %3287 = vmatprep.subr.bf16.mxu1 %v7254_v31  ;;  %v8516_v34 = vpop.f32.mrb[16].mxu1  ;;  %v7461_v31 = vld [vmem:[%s9691_s1 + $0x680] ss:$16 sps:$4 sm:$0xff]  }
 0x117   :  { %v8521_v36 = vpop.f32.mrb[17].mxu1 }
 0x118   :  { %v8526_v38 = vpop.f32.mrb[18].mxu1 }
 0x119   :  { %3288 = vmatpush1.bf16.msra.mxu1 %v7252_v32  ;;  %v8531_v40 = vpop.f32.mrb[19].mxu1  ;;  %v7462_v32 = vld [vmem:[%s9691_s1 + $0x6a4] ss:$16 sps:$4 sm:$0xff]  }
 0x11a   :  { %3289 = vmatprep.subr.bf16.mxu1 %v7260_v33  ;;  %2439 = vmatmul.mubr.bf16.gmra.mrb[44].mxu0 %v7176_v35  ;;  %v7257_v33 = vld [vmem:[%s9692_s0 + $0xb8] ss:$28 sps:$4 sm:$0xff]  }
 0x11b   :  { %3171 = vmatmul.mubr.bf16.gmra.mrb[60].mxu1 %v8379_v54  ;;  %2448 = vmatprep.mubr.bf16.mxu0 %v7180_v37 }
 0x11c   :  { %3180 = vmatprep.mubr.bf16.mxu1 %v8386_v56 }
 0x11d   :  { %3290 = vmatpush1.bf16.msra.mxu1 %v7258_v39  ;;  %v7464_v39 = vld [vmem:[%s9691_s1 + $0x6c4] ss:$16 sps:$4 sm:$0xff]  }
 0x11e   :  { %3291 = vmatprep.subr.bf16.mxu1 %v7263_v41  ;;  %v8541_v43 = vpop.f32.mrb[20].mxu1  ;;  %v7465_v41 = vld [vmem:[%s9691_s1 + $0x6c0] ss:$16 sps:$4 sm:$0xff]  }
 0x11f   :  { %v8546_v45 = vpop.f32.mrb[21].mxu1 }
 0x120   :  { %v8551_v47 = vpop.f32.mrb[22].mxu1 }
 0x121   :  { %3292 = vmatpush1.bf16.msra.mxu1 %v7261_v42  ;;  %v8553_v48 = vpop.f32.mrb[23].mxu1  ;;  %v7466_v42 = vld [vmem:[%s9691_s1 + $0x6e4] ss:$16 sps:$4 sm:$0xff]  }
 0x122   :  { %2449 = vmatmul.mubr.bf16.gmra.mrb[48].mxu0 %v7182_v44  ;;  %3454 = vmatprep.subr.bf16.mxu1 %v7303_v10  ;;  %v7313_v10 = vld [vmem:[%s9691_s1 + $0x66c] ss:$16 sps:$4 sm:$0xff]  }
 0x123   :  { %3181 = vmatmul.mubr.bf16.gmra.mrb[64].mxu1 %v8422_v4  ;;  %2458 = vmatprep.mubr.bf16.mxu0 %v7192_v46  ;;  %v7230_v4 = vld [vmem:[%s9692_s0 + $0x14] ss:$28 sps:$4 sm:$0xff]  }
 0x124   :  { %3190 = vmatprep.mubr.bf16.mxu1 %v8429_v6  ;;  %v7228_v6 = vld [vmem:[%s9692_s0 + $0x10] ss:$28 sps:$4 sm:$0xff]  }
 0x126   :  { %v8557_v49 = vpop.f32.mrb[24].mxu1 }
 0x127   :  { %v8562_v51 = vpop.f32.mrb[25].mxu1 }
 0x128   :  { %v8567_v54 = vpop.f32.mrb[26].mxu1 }
 0x129   :  { %v8569_v56 = vpop.f32.mrb[27].mxu1 }
 0x12a   :  { %2459 = vmatmul.mubr.bf16.gmra.mrb[52].mxu0 %v7194_v50 }
 0x12b   :  { %3191 = vmatmul.mubr.bf16.gmra.mrb[68].mxu1 %v8459_v15  ;;  %2468 = vmatprep.mubr.bf16.mxu0 %v7204_v52  ;;  %v8614_v15 = vld [vmem:[%s9692_s0 + $0x84] ss:$28 sps:$4 sm:$0xff]  }
 0x12c   :  { %3200 = vmatprep.mubr.bf16.mxu1 %v8466_v17  ;;  %v7455_v17 = vld [vmem:[%s9691_s1 + $0x620] ss:$16 sps:$4 sm:$0xff]  }
 0x12e   :  { %v8573_v58 = vpop.f32.mrb[28].mxu1 }
 0x12f   :  { %v8578_v61 = vpop.f32.mrb[29].mxu1 }
 0x130   :  { %v8583_v63 = vpop.f32.mrb[30].mxu1 }
 0x131   :  { %v8585_v0 = vpop.f32.mrb[31].mxu1 }
 0x132   :  { %2469 = vmatmul.mubr.bf16.gmra.mrb[56].mxu0 %v7206_v59 }
 0x133   :  { %3201 = vmatmul.mubr.bf16.gmra.mrb[72].mxu1 %v7170_v25  ;;  %2478 = vmatprep.mubr.bf16.mxu0 %v7216_v62  ;;  %v8635_v25 = vld [vmem:[%s9692_s0 + $0xbc] ss:$28 sps:$4 sm:$0xff]  }
 0x134   :  { %3210 = vmatprep.mubr.bf16.mxu1 %v7174_v27  ;;  %v7459_v27 = vld [vmem:[%s9691_s1 + $0x660] ss:$16 sps:$4 sm:$0xff]  }
 0x13a   :  { %2479 = vmatmul.mubr.bf16.gmra.mrb[60].mxu0 %v7218_v2 }
 0x13b   :  { %3211 = vmatmul.mubr.bf16.gmra.mrb[76].mxu1 %v7176_v35  ;;  %2521 = vmatprep.mubr.bf16.mxu0 %v7230_v4  ;;  %v8656_v35 = vld [vmem:[%s9692_s0 + $0xf4] ss:$28 sps:$4 sm:$0xff]  }
 0x13c   :  { %3220 = vmatprep.mubr.bf16.mxu1 %v7180_v37  ;;  %v7463_v37 = vld [vmem:[%s9691_s1 + $0x6a0] ss:$16 sps:$4 sm:$0xff]  }
 0x142   :  { %2522 = vmatmul.mubr.bf16.vlgmr.msra.gmra.mrb[0].mxu0 %v7228_v6 }
 0x143   :  { %3221 = vmatmul.mubr.bf16.gmra.mrb[80].mxu1 %v7182_v44  ;;  %2683 = vmatpush1.bf16.msra.mxu0 %v7453_v11  ;;  %v7266_v44 = vld [vmem:[%s9692_s0 + $0xf0] ss:$28 sps:$4 sm:$0xff]   ;;  %v7311_v11 = vld [vmem:[%s9691_s1 + $0x668] ss:$16 sps:$4 sm:$0xff]  }
 0x144   :  { %2531 = vmatprep.mubr.bf16.mxu0 %v7237_v8  ;;  %3230 = vmatprep.mubr.bf16.mxu1 %v7192_v46  ;;  %v7267_v46 = vld [vmem:[%s9692_s0 + $0x12c] ss:$28 sps:$4 sm:$0xff]  }
 0x145   :  { %2684 = vmatprep.subr.bf16.mxu0 %v7454_v12  ;;  %v7317_v12 = vld [vmem:[%s9691_s1 + $0x68c] ss:$16 sps:$4 sm:$0xff]  }
 0x147   :  { %2685 = vmatpush1.bf16.msra.mxu0 %v7455_v17  ;;  %v7272_v17 = vld [vmem:[%s9692_s0 + $0x160] ss:$28 sps:$4 sm:$0xff]  }
 0x148   :  { %2686 = vmatprep.subr.bf16.mxu0 %v7456_v19  ;;  %v7320_v19 = vld [vmem:[%s9691_s1 + $0x6ac] ss:$16 sps:$4 sm:$0xff]  }
 0x14a   :  { %2532 = vmatmul.mubr.bf16.gmra.mrb[4].mxu0 %v7239_v13 }
 0x14b   :  { %3231 = vmatmul.mubr.bf16.gmra.mrb[84].mxu1 %v7194_v50  ;;  %2541 = vmatprep.mubr.bf16.mxu0 %v8614_v15  ;;  %v7467_v50 = vld [vmem:[%s9691_s1 + $0x6e0] ss:$16 sps:$4 sm:$0xff]  }
 0x14c   :  { %3240 = vmatprep.mubr.bf16.mxu1 %v7204_v52  ;;  %2687 = vmatpush1.bf16.msra.mxu0 %v7457_v21  ;;  %v7301_v52 = vld [vmem:[%s9691_s1 + $0x608] ss:$16 sps:$4 sm:$0xff]  }
 0x14d   :  { %2688 = vmatprep.subr.bf16.mxu0 %v7458_v22  ;;  %v7318_v21 = vld [vmem:[%s9691_s1 + $0x6a8] ss:$16 sps:$4 sm:$0xff]   ;;  %v7324_v22 = vld [vmem:[%s9691_s1 + $0x6cc] ss:$16 sps:$4 sm:$0xff]  }
 0x150   :  { %2689 = vmatpush1.bf16.msra.mxu0 %v7459_v27  ;;  %v7275_v27 = vld [vmem:[%s9692_s0 + $0x198] ss:$28 sps:$4 sm:$0xff]  }
 0x151   :  { %2690 = vmatprep.subr.bf16.mxu0 %v7460_v29  ;;  %v7327_v29 = vld [vmem:[%s9691_s1 + $0x6ec] ss:$16 sps:$4 sm:$0xff]  }
 0x152   :  { %2542 = vmatmul.mubr.bf16.gmra.mrb[8].mxu0 %v7248_v23 }
 0x153   :  { %3241 = vmatmul.mubr.bf16.gmra.mrb[88].mxu1 %v7206_v59  ;;  %2551 = vmatprep.mubr.bf16.mxu0 %v8635_v25  ;;  %v7306_v59 = vld [vmem:[%s9691_s1 + $0x62c] ss:$16 sps:$4 sm:$0xff]  }
 0x154   :  { %3250 = vmatprep.mubr.bf16.mxu1 %v7216_v62  ;;  %2691 = vmatpush1.bf16.msra.mxu0 %v7461_v31  ;;  %v7304_v62 = vld [vmem:[%s9691_s1 + $0x628] ss:$16 sps:$4 sm:$0xff]  }
 0x155   :  { %2692 = vmatprep.subr.bf16.mxu0 %v7462_v32  ;;  %v7325_v31 = vld [vmem:[%s9691_s1 + $0x6e8] ss:$16 sps:$4 sm:$0xff]   ;;  %v7278_v32 = vld [vmem:[%s9692_s0 + $0x1d0] ss:$28 sps:$4 sm:$0xff]  }
 0x158   :  { %2693 = vmatpush1.bf16.msra.mxu0 %v7463_v37  ;;  %v7279_v37 = vld [vmem:[%s9692_s0 + $0x20c] ss:$28 sps:$4 sm:$0xff]  }
 0x159   :  { %2694 = vmatprep.subr.bf16.mxu0 %v7464_v39  ;;  %v7284_v39 = vld [vmem:[%s9692_s0 + $0x240] ss:$28 sps:$4 sm:$0xff]  }
 0x15a   :  { %2552 = vmatmul.mubr.bf16.gmra.mrb[12].mxu0 %v7257_v33 }
 0x15b   :  { %3251 = vmatmul.mubr.bf16.gmra.mrb[92].mxu1 %v7218_v2  ;;  %2561 = vmatprep.mubr.bf16.mxu0 %v8656_v35  ;;  %v7310_v2 = vld [vmem:[%s9691_s1 + $0x64c] ss:$16 sps:$4 sm:$0xff]  }
 0x15c   :  { %3293 = vmatprep.mubr.bf16.mxu1 %v7230_v4  ;;  %2695 = vmatpush1.bf16.msra.mxu0 %v7465_v41  ;;  %v7269_v4 = vld [vmem:[%s9692_s0 + $0x128] ss:$28 sps:$4 sm:$0xff]   ;;  %v7285_v41 = vld [vmem:[%s9692_s0 + $0x27c] ss:$28 sps:$4 sm:$0xff]  }
 0x15d   :  { %2696 = vmatprep.subr.bf16.mxu0 %v7466_v42  ;;  %v7287_v42 = vld [vmem:[%s9692_s0 + $0x278] ss:$28 sps:$4 sm:$0xff]  }
 0x160   :  { %2697 = vmatpush1.bf16.msra.mxu0 %v7467_v50  ;;  %v7291_v50 = vld [vmem:[%s9692_s0 + $0x2ec] ss:$28 sps:$4 sm:$0xff]  }
 0x162   :  { %2562 = vmatmul.mubr.bf16.gmra.mrb[16].mxu0 %v7266_v44 }
 0x163   :  { %3294 = vmatmul.mubr.bf16.vlgmr.msra.gmra.mrb[32].mxu1 %v7228_v6  ;;  %2571 = vmatprep.mubr.bf16.mxu0 %v7267_v46  ;;  %v7270_v6 = vld [vmem:[%s9692_s0 + $0x164] ss:$28 sps:$4 sm:$0xff]  }
 0x164   :  { %3303 = vmatprep.mubr.bf16.mxu1 %v7237_v8  ;;  %3455 = vmatpush1.bf16.msra.mxu1 %v7301_v52  ;;  %v7308_v8 = vld [vmem:[%s9691_s1 + $0x648] ss:$16 sps:$4 sm:$0xff]  }
 0x165   :  { %3456 = vmatprep.subr.bf16.mxu1 %v7306_v59  ;;  %v7293_v52 = vld [vmem:[%s9692_s0 + $0x2e8] ss:$28 sps:$4 sm:$0xff]  }
 0x166   :  { %v7294_v59 = vld [vmem:[%s9692_s0 + $0x324] ss:$28 sps:$4 sm:$0xff]  }
 0x168   :  { %3457 = vmatpush1.bf16.msra.mxu1 %v7304_v62  ;;  %v7296_v62 = vld [vmem:[%s9692_s0 + $0x320] ss:$28 sps:$4 sm:$0xff]  }
 0x169   :  { %3458 = vmatprep.subr.bf16.mxu1 %v7310_v2  ;;  %v7297_v2 = vld [vmem:[%s9692_s0 + $0x35c] ss:$28 sps:$4 sm:$0xff]  }
 0x16a   :  { %2572 = vmatmul.mubr.bf16.gmra.mrb[20].mxu0 %v7269_v4 }
 0x16b   :  { %3304 = vmatmul.mubr.bf16.gmra.mrb[36].mxu1 %v7239_v13  ;;  %2581 = vmatprep.mubr.bf16.mxu0 %v7270_v6  ;;  %v7273_v13 = vld [vmem:[%s9692_s0 + $0x19c] ss:$28 sps:$4 sm:$0xff]  }
 0x16c   :  { %3313 = vmatprep.mubr.bf16.mxu1 %v8614_v15  ;;  %3459 = vmatpush1.bf16.msra.mxu1 %v7308_v8  ;;  %v7315_v15 = vld [vmem:[%s9691_s1 + $0x688] ss:$16 sps:$4 sm:$0xff]   ;;  %v7307_v8 = vld [vmem:[%s9692_s0 + $0x50] ss:$28 sps:$4 sm:$0xff]  }
 0x16d   :  { %3460 = vmatprep.subr.bf16.mxu1 %v7313_v10  ;;  %v7314_v10 = vld [vmem:[%s9692_s0 + $0x88] ss:$28 sps:$4 sm:$0xff]  }
 0x170   :  { %3461 = vmatpush1.bf16.msra.mxu1 %v7311_v11  ;;  %v7321_v11 = vld [vmem:[%s9692_s0 + $0xc0] ss:$28 sps:$4 sm:$0xff]  }
 0x171   :  { %3462 = vmatprep.subr.bf16.mxu1 %v7317_v12  ;;  %v7328_v12 = vld [vmem:[%s9692_s0 + $0xf8] ss:$28 sps:$4 sm:$0xff]  }
 0x172   :  { %2582 = vmatmul.mubr.bf16.gmra.mrb[24].mxu0 %v7272_v17 }
 0x173   :  { %3314 = vmatmul.mubr.bf16.gmra.mrb[40].mxu1 %v7248_v23  ;;  %2591 = vmatprep.mubr.bf16.mxu0 %v7273_v13  ;;  %v7276_v23 = vld [vmem:[%s9692_s0 + $0x1d4] ss:$28 sps:$4 sm:$0xff]  }
 0x174   :  { %3323 = vmatprep.mubr.bf16.mxu1 %v8635_v25  ;;  %3463 = vmatpush1.bf16.msra.mxu1 %v7315_v15  ;;  %v7322_v25 = vld [vmem:[%s9691_s1 + $0x6c8] ss:$16 sps:$4 sm:$0xff]   ;;  %v7329_v15 = vld [vmem:[%s9692_s0 + $0x130] ss:$28 sps:$4 sm:$0xff]  }
 0x175   :  { %3464 = vmatprep.subr.bf16.mxu1 %v7320_v19  ;;  %v7337_v19 = vld [vmem:[%s9693_s3 + $0x14] ss:$8 sps:$4 sm:$0xff]  }
 0x178   :  { %3465 = vmatpush1.bf16.msra.mxu1 %v7318_v21  ;;  %v7335_v21 = vld [vmem:[%s9693_s3 + $0x10] ss:$8 sps:$4 sm:$0xff]  }
 0x179   :  { %3466 = vmatprep.subr.bf16.mxu1 %v7324_v22  ;;  %v7340_v22 = vld [vmem:[%s9693_s3 + $0x24] ss:$8 sps:$4 sm:$0xff]  }
 0x17a   :  { %2592 = vmatmul.mubr.bf16.gmra.mrb[28].mxu0 %v7275_v27 }
 0x17b   :  { %3324 = vmatmul.mubr.bf16.gmra.mrb[44].mxu1 %v7257_v33  ;;  %2601 = vmatprep.mubr.bf16.mxu0 %v7276_v23  ;;  %v7281_v33 = vld [vmem:[%s9692_s0 + $0x208] ss:$28 sps:$4 sm:$0xff]  }
 0x17c   :  { %3333 = vmatprep.mubr.bf16.mxu1 %v8656_v35  ;;  %3467 = vmatpush1.bf16.msra.mxu1 %v7322_v25  ;;  %v7282_v35 = vld [vmem:[%s9692_s0 + $0x244] ss:$28 sps:$4 sm:$0xff]   ;;  %v7343_v25 = vld [vmem:[%s9693_s3 + $0x34] ss:$8 sps:$4 sm:$0xff]  }
 0x17d   :  { %3468 = vmatprep.subr.bf16.mxu1 %v7327_v29  ;;  %v7341_v29 = vld [vmem:[%s9693_s3 + $0x30] ss:$8 sps:$4 sm:$0xff]  }
 0x180   :  { %3469 = vmatpush1.bf16.msra.mxu1 %v7325_v31  ;;  %v7346_v31 = vld [vmem:[%s9693_s3 + $0x44] ss:$8 sps:$4 sm:$0xff]  }
 0x182   :  { %2602 = vmatmul.mubr.bf16.gmra.mrb[32].mxu0 %v7278_v32 }
 0x183   :  { %3334 = vmatmul.mubr.bf16.gmra.mrb[48].mxu1 %v7266_v44  ;;  %2611 = vmatprep.mubr.bf16.mxu0 %v7279_v37  ;;  %v7288_v44 = vld [vmem:[%s9692_s0 + $0x2b4] ss:$28 sps:$4 sm:$0xff]  }
 0x184   :  { %3343 = vmatprep.mubr.bf16.mxu1 %v7267_v46  ;;  %v7290_v46 = vld [vmem:[%s9692_s0 + $0x2b0] ss:$28 sps:$4 sm:$0xff]  }
 0x18a   :  { %2612 = vmatmul.mubr.bf16.gmra.mrb[36].mxu0 %v7281_v33 }
 0x18b   :  { %3344 = vmatmul.mubr.bf16.gmra.mrb[52].mxu1 %v7269_v4  ;;  %2621 = vmatprep.mubr.bf16.mxu0 %v7282_v35  ;;  %v7299_v4 = vld [vmem:[%s9692_s0 + $0x358] ss:$28 sps:$4 sm:$0xff]  }
 0x18c   :  { %3353 = vmatprep.mubr.bf16.mxu1 %v7270_v6  ;;  %v7300_v6 = vld [vmem:[%s9692_s0 + $0x18] ss:$28 sps:$4 sm:$0xff]  }
 0x192   :  { %2622 = vmatmul.mubr.bf16.gmra.mrb[40].mxu0 %v7284_v39 }
 0x193   :  { %3354 = vmatmul.mubr.bf16.gmra.mrb[56].mxu1 %v7272_v17  ;;  %2631 = vmatprep.mubr.bf16.mxu0 %v7285_v41  ;;  %v7334_v17 = vld [vmem:[%s9693_s3 + $0x4] ss:$8 sps:$4 sm:$0xff]  }
 0x194   :  { %3363 = vmatprep.mubr.bf16.mxu1 %v7273_v13  ;;  %v7332_v13 = vld [vmem:[%s9693_s3] ss:$8 sps:$4 sm:$0xff]   ;;  %4363 = vmatprep.subr.bf16.mxu0 %v7334_v17  ;;  %v7376_v17 = vld [vmem:[%s9693_s3 + $0xe4] ss:$8 sps:$4 sm:$0xff]  }
 0x19a   :  { %2632 = vmatmul.mubr.bf16.gmra.mrb[44].mxu0 %v7287_v42 }
 0x19b   :  { %3364 = vmatmul.mubr.bf16.gmra.mrb[60].mxu1 %v7275_v27  ;;  %2641 = vmatprep.mubr.bf16.mxu0 %v7288_v44  ;;  %v7338_v27 = vld [vmem:[%s9693_s3 + $0x20] ss:$8 sps:$4 sm:$0xff]  }
 0x19c   :  { %3373 = vmatprep.mubr.bf16.mxu1 %v7276_v23  ;;  %v7330_v23 = vld [vmem:[%s9692_s0 + $0x168] ss:$28 sps:$4 sm:$0xff]  }
 0x1a2   :  { %2642 = vmatmul.mubr.bf16.gmra.mrb[48].mxu0 %v7290_v46 }
 0x1a3   :  { %3374 = vmatmul.mubr.bf16.gmra.mrb[64].mxu1 %v7278_v32  ;;  %2651 = vmatprep.mubr.bf16.mxu0 %v7291_v50  ;;  %v7344_v32 = vld [vmem:[%s9693_s3 + $0x40] ss:$8 sps:$4 sm:$0xff]  }
 0x1a4   :  { %3383 = vmatprep.mubr.bf16.mxu1 %v7279_v37  ;;  %v7331_v37 = vld [vmem:[%s9692_s0 + $0x1a0] ss:$28 sps:$4 sm:$0xff]  }
 0x1aa   :  { %2652 = vmatmul.mubr.bf16.gmra.mrb[52].mxu0 %v7293_v52 }
 0x1ab   :  { %3384 = vmatmul.mubr.bf16.gmra.mrb[68].mxu1 %v7281_v33  ;;  %2661 = vmatprep.mubr.bf16.mxu0 %v7294_v59  ;;  %v7349_v33 = vld [vmem:[%s9693_s3 + $0x54] ss:$8 sps:$4 sm:$0xff]  }
 0x1ac   :  { %3393 = vmatprep.mubr.bf16.mxu1 %v7282_v35  ;;  %v7347_v35 = vld [vmem:[%s9693_s3 + $0x50] ss:$8 sps:$4 sm:$0xff]  }
 0x1b2   :  { %2662 = vmatmul.mubr.bf16.gmra.mrb[56].mxu0 %v7296_v62 }
 0x1b3   :  { %3394 = vmatmul.mubr.bf16.gmra.mrb[72].mxu1 %v7284_v39  ;;  %2671 = vmatprep.mubr.bf16.mxu0 %v7297_v2  ;;  %v7352_v39 = vld [vmem:[%s9693_s3 + $0x64] ss:$8 sps:$4 sm:$0xff]  }
 0x1b4   :  { %3403 = vmatprep.mubr.bf16.mxu1 %v7285_v41  ;;  %v7350_v41 = vld [vmem:[%s9693_s3 + $0x60] ss:$8 sps:$4 sm:$0xff]  }
 0x1ba   :  { %2672 = vmatmul.mubr.bf16.gmra.mrb[60].mxu0 %v7299_v4 }
 0x1bb   :  { %3404 = vmatmul.mubr.bf16.gmra.mrb[76].mxu1 %v7287_v42  ;;  %2714 = vmatprep.mubr.bf16.mxu0 %v7476_v1  ;;  %v7355_v42 = vld [vmem:[%s9693_s3 + $0x74] ss:$8 sps:$4 sm:$0xff]  }
 0x1bc   :  { %3413 = vmatprep.mubr.bf16.mxu1 %v7288_v44  ;;  %v7353_v44 = vld [vmem:[%s9693_s3 + $0x70] ss:$8 sps:$4 sm:$0xff]  }
 0x1c2   :  { %2715 = vmatmul.mubr.bf16.vlgmr.msra.gmra.mrb[0].mxu0 %v7300_v6 }
 0x1c3   :  { %3414 = vmatmul.mubr.bf16.gmra.mrb[80].mxu1 %v7290_v46  ;;  %2724 = vmatprep.mubr.bf16.mxu0 %v7476_v1  ;;  %v7358_v46 = vld [vmem:[%s9693_s3 + $0x84] ss:$8 sps:$4 sm:$0xff]  }
 0x1c4   :  { %3423 = vmatprep.mubr.bf16.mxu1 %v7291_v50  ;;  %4364 = vmatpush1.bf16.msra.mxu0 %v7332_v13  ;;  %v7356_v50 = vld [vmem:[%s9693_s3 + $0x80] ss:$8 sps:$4 sm:$0xff]  }
 0x1c5   :  { %4365 = vmatprep.subr.bf16.mxu0 %v7337_v19  ;;  %v7374_v13 = vld [vmem:[%s9693_s3 + $0xe0] ss:$8 sps:$4 sm:$0xff]   ;;  %v7377_v19 = vld [vmem:[%s9693_s3 + $0xf0] ss:$8 sps:$4 sm:$0xff]  }
 0x1c8   :  { %4366 = vmatpush1.bf16.msra.mxu0 %v7335_v21  ;;  %v7468_v21 = vld [vmem:[%s9692_s0 + $0x1d8] ss:$28 sps:$4 sm:$0xff]  }
 0x1c9   :  { %4367 = vmatprep.subr.bf16.mxu0 %v7340_v22  ;;  %v7382_v22 = vld [vmem:[%s9693_s3 + $0x104] ss:$8 sps:$4 sm:$0xff]  }
 0x1ca   :  { %2725 = vmatmul.mubr.bf16.gmra.mrb[4].mxu0 %v7307_v8 }
 0x1cb   :  { %3424 = vmatmul.mubr.bf16.gmra.mrb[84].mxu1 %v7293_v52  ;;  %2734 = vmatprep.mubr.bf16.mxu0 %v7476_v1  ;;  %v7361_v52 = vld [vmem:[%s9693_s3 + $0x94] ss:$8 sps:$4 sm:$0xff]  }
 0x1cc   :  { %3433 = vmatprep.mubr.bf16.mxu1 %v7294_v59  ;;  %4368 = vmatpush1.bf16.msra.mxu0 %v7338_v27  ;;  %v7359_v59 = vld [vmem:[%s9693_s3 + $0x90] ss:$8 sps:$4 sm:$0xff]  }
 0x1cd   :  { %4369 = vmatprep.subr.bf16.mxu0 %v7343_v25  ;;  %v7469_v27 = vld [vmem:[%s9692_s0 + $0x210] ss:$28 sps:$4 sm:$0xff]   ;;  %v7471_v25 = vld [vmem:[%s9692_s0 + $0x280] ss:$28 sps:$4 sm:$0xff]  }
 0x1d0   :  { %4370 = vmatpush1.bf16.msra.mxu0 %v7341_v29  ;;  %v7472_v29 = vld [vmem:[%s9692_s0 + $0x2b8] ss:$28 sps:$4 sm:$0xff]  }
 0x1d1   :  { %4371 = vmatprep.subr.bf16.mxu0 %v7346_v31  ;;  %v387_v31 = vlaneseq }
 0x1d2   :  { %2735 = vmatmul.mubr.bf16.gmra.mrb[8].mxu0 %v7314_v10 }
 0x1d3   :  { %3434 = vmatmul.mubr.bf16.gmra.mrb[88].mxu1 %v7296_v62  ;;  %2744 = vmatprep.mubr.bf16.mxu0 %v7476_v1  ;;  %v7364_v62 = vld [vmem:[%s9693_s3 + $0xa4] ss:$8 sps:$4 sm:$0xff]  }
 0x1d4   :  { %3443 = vmatprep.mubr.bf16.mxu1 %v7297_v2  ;;  %4372 = vmatpush1.bf16.msra.mxu0 %v7344_v32  ;;  %v7362_v2 = vld [vmem:[%s9693_s3 + $0xa0] ss:$8 sps:$4 sm:$0xff]   ;;  %v7473_v32 = vld [vmem:[%s9692_s0 + $0x2f0] ss:$28 sps:$4 sm:$0xff]  }
 0x1d5   :  { %4373 = vmatprep.subr.bf16.mxu0 %v7349_v33 }
 0x1d8   :  { %4374 = vmatpush1.bf16.msra.mxu0 %v7347_v35  ;;  %v8961_v35 = vld [vmem:[%s9694_s2] sm:$0xf] }
 0x1d9   :  { %4375 = vmatprep.subr.bf16.mxu0 %v7352_v39 }
 0x1da   :  { %2745 = vmatmul.mubr.bf16.gmra.mrb[12].mxu0 %v7321_v11 }
 0x1db   :  { %3444 = vmatmul.mubr.bf16.gmra.mrb[92].mxu1 %v7299_v4  ;;  %2754 = vmatprep.mubr.bf16.mxu0 %v7476_v1  ;;  %v7367_v4 = vld [vmem:[%s9693_s3 + $0xb4] ss:$8 sps:$4 sm:$0xff]  }
 0x1dc   :  { %3486 = vmatprep.mubr.bf16.mxu1 %v7476_v1  ;;  %4376 = vmatpush1.bf16.msra.mxu0 %v7350_v41  ;;  %v7474_v41 = vld [vmem:[%s9692_s0 + $0x328] ss:$28 sps:$4 sm:$0xff]  }
 0x1dd   :  { %4377 = vmatprep.subr.bf16.mxu0 %v7355_v42 }
 0x1e0   :  { %4378 = vmatpush1.bf16.msra.mxu0 %v7353_v44 }
 0x1e1   :  { %4379 = vmatprep.subr.bf16.mxu0 %v7358_v46 }
 0x1e2   :  { %2755 = vmatmul.mubr.bf16.gmra.mrb[16].mxu0 %v7328_v12 }
 0x1e3   :  { %3487 = vmatmul.mubr.bf16.vlgmr.msra.gmra.mrb[32].mxu1 %v7300_v6  ;;  %2764 = vmatprep.mubr.bf16.mxu0 %v7476_v1  ;;  %v7365_v6 = vld [vmem:[%s9693_s3 + $0xb0] ss:$8 sps:$4 sm:$0xff]  }
 0x1e4   :  { %3496 = vmatprep.mubr.bf16.mxu1 %v7476_v1  ;;  %4380 = vmatpush1.bf16.msra.mxu0 %v7356_v50 }
 0x1e5   :  { %4381 = vmatprep.subr.bf16.mxu0 %v7361_v52 }
 0x1e8   :  { %4382 = vmatpush1.bf16.msra.mxu0 %v7359_v59 }
 0x1e9   :  { %4383 = vmatprep.subr.bf16.mxu0 %v7364_v62 }
 0x1ea   :  { %2765 = vmatmul.mubr.bf16.gmra.mrb[20].mxu0 %v7329_v15 }
 0x1eb   :  { %3497 = vmatmul.mubr.bf16.gmra.mrb[36].mxu1 %v7307_v8  ;;  %2774 = vmatprep.mubr.bf16.mxu0 %v7476_v1  ;;  %v7370_v8 = vld [vmem:[%s9693_s3 + $0xc4] ss:$8 sps:$4 sm:$0xff]  }
 0x1ec   :  { %3506 = vmatprep.mubr.bf16.mxu1 %v7476_v1  ;;  %4384 = vmatpush1.bf16.msra.mxu0 %v7362_v2 }
 0x1ed   :  { %4385 = vmatprep.subr.bf16.mxu0 %v7367_v4 }
 0x1f0   :  { %4386 = vmatpush1.bf16.msra.mxu0 %v7365_v6 }
 0x1f1   :  { %4387 = vmatprep.subr.bf16.mxu0 %v7370_v8 }
 0x1f2   :  { %2775 = vmatmul.mubr.bf16.gmra.mrb[24].mxu0 %v7330_v23 }
 0x1f3   :  { %3507 = vmatmul.mubr.bf16.gmra.mrb[40].mxu1 %v7314_v10  ;;  %2784 = vmatprep.mubr.bf16.mxu0 %v7476_v1  ;;  %v7368_v10 = vld [vmem:[%s9693_s3 + $0xc0] ss:$8 sps:$4 sm:$0xff]  }
 0x1f4   :  { %3516 = vmatprep.mubr.bf16.mxu1 %v7476_v1  ;;  %4388 = vmatpush1.bf16.msra.mxu0 %v7368_v10 }
 0x1fa   :  { %2785 = vmatmul.mubr.bf16.gmra.mrb[28].mxu0 %v7331_v37 }
 0x1fb   :  { %3517 = vmatmul.mubr.bf16.gmra.mrb[44].mxu1 %v7321_v11  ;;  %v7373_v11 = vld [vmem:[%s9693_s3 + $0xd4] ss:$8 sps:$4 sm:$0xff]  }
 0x1fc   :  { %3526 = vmatprep.mubr.bf16.mxu1 %v7476_v1  ;;  %4389 = vmatprep.subr.bf16.mxu0 %v7373_v11 }
 0x203   :  { %3527 = vmatmul.mubr.bf16.gmra.mrb[48].mxu1 %v7328_v12  ;;  %v7371_v12 = vld [vmem:[%s9693_s3 + $0xd0] ss:$8 sps:$4 sm:$0xff]  }
 0x204   :  { %3536 = vmatprep.mubr.bf16.mxu1 %v7476_v1  ;;  %4390 = vmatpush1.bf16.msra.mxu0 %v7371_v12 }
 0x205   :  { %4391 = vmatprep.subr.bf16.mxu0 %v7376_v17 }
 0x208   :  { %4392 = vmatpush1.bf16.msra.mxu0 %v7374_v13 }
 0x20b   :  { %3537 = vmatmul.mubr.bf16.gmra.mrb[52].mxu1 %v7329_v15  ;;  %v7379_v15 = vld [vmem:[%s9693_s3 + $0xf4] ss:$8 sps:$4 sm:$0xff]  }
 0x20c   :  { %3546 = vmatprep.mubr.bf16.mxu1 %v7476_v1  ;;  %4393 = vmatprep.subr.bf16.mxu0 %v7379_v15 }
 0x20d   :  { %4394 = vmatpush1.bf16.msra.mxu0 %v7377_v19 }
 0x20e   :  { %4556 = vmatprep.subr.bf16.mxu0 %v7382_v22 }
 0x213   :  { %3547 = vmatmul.mubr.bf16.gmra.mrb[56].mxu1 %v7330_v23  ;;  %v7470_v23 = vld [vmem:[%s9692_s0 + $0x248] ss:$28 sps:$4 sm:$0xff]  }
 0x214   :  { %3556 = vmatprep.mubr.bf16.mxu1 %v7476_v1 }
 0x21b   :  { %3557 = vmatmul.mubr.bf16.gmra.mrb[60].mxu1 %v7331_v37  ;;  %v8954_v37 = vshrl.u32 %v387_v31, 7 }
 0x21c   :  { %3566 = vmatprep.mubr.bf16.mxu1 %v7476_v1 }
 0x21d   :  { %v389_v33 = vsub.s32 0, %v8954_v37  ;;  %v393_v39 = vsub.s32 1, %v8954_v37 }
 0x21f   :  { %v8970_v42 = vrot.slane %v8961_v35, %v389_v33  ;;  %v8975_v44 = vrot.slane %v8961_v35, %v393_v39 }
 0x223   :  { %3567 = vmatmul.mubr.bf16.gmra.mrb[64].mxu1 %v7468_v21 }
 0x224   :  { %3576 = vmatprep.mubr.bf16.mxu1 %v7476_v1 }
 0x22b   :  { %3577 = vmatmul.mubr.bf16.gmra.mrb[68].mxu1 %v7469_v27 }
 0x22c   :  { %3586 = vmatprep.mubr.bf16.mxu1 %v7476_v1 }
 0x233   :  { %3587 = vmatmul.mubr.bf16.gmra.mrb[72].mxu1 %v7470_v23 }
 0x234   :  { %3596 = vmatprep.mubr.bf16.mxu1 %v7476_v1 }
 0x23b   :  { %3597 = vmatmul.mubr.bf16.gmra.mrb[76].mxu1 %v7471_v25 }
 0x23c   :  { %3606 = vmatprep.mubr.bf16.mxu1 %v7476_v1 }
 0x243   :  { %3607 = vmatmul.mubr.bf16.gmra.mrb[80].mxu1 %v7472_v29 }
 0x244   :  { %3616 = vmatprep.mubr.bf16.mxu1 %v7476_v1 }
 0x24b   :  { %3617 = vmatmul.mubr.bf16.gmra.mrb[84].mxu1 %v7473_v32 }
 0x24c   :  { %3626 = vmatprep.mubr.bf16.mxu1 %v7476_v1 }
 0x253   :  { %3627 = vmatmul.mubr.bf16.gmra.mrb[88].mxu1 %v7474_v41 }
 0x254   :  { %3636 = vmatprep.mubr.bf16.mxu1 %v7476_v1  ;;  %v7475_v1 = vld [vmem:[%s9692_s0 + $0x360] ss:$28 sps:$4 sm:$0xff]  }
 0x255   :  { %v2603_v46 = vpop.f32.mrb[32].mxu0 }
 0x256   :  { %v6227_v50 = vadd.f32 %v2603_v46, %v8970_v42  ;;  %v2605_v52 = vpop.f32.mrb[33].mxu0 }
 0x257   :  { %v6229_v59 = vadd.f32 %v2605_v52, %v8975_v44  ;;  %v2607_v62 = vpop.f32.mrb[34].mxu0 }
 0x258   :  { %v6228_v2 = vadd.f32 %v6227_v50, %v8374_v53  ;;  %v6231_v4 = vadd.f32 %v2607_v62, %v8970_v42  ;;  %v2609_v6 = vpop.f32.mrb[35].mxu0 }
 0x259   :  { %v6230_v8 = vadd.f32 %v6229_v59, %v8381_v55  ;;  %v6233_v10 = vadd.f32 %v2609_v6, %v8975_v44 }
 0x25a   :  { %v3711_v11 = vmul.f32 0.2, %v6228_v2  ;;  %v6232_v12 = vadd.f32 %v6231_v4, %v8388_v57 }
 0x25b   :  { %3637 = vmatmul.mubr.bf16.gmra.mrb[92].mxu1 %v7475_v1  ;;  %v3712_v17 = vmul.f32 0.2, %v6230_v8  ;;  %v6234_v13 = vadd.f32 %v6233_v10, %v8396_v60 }
 0x25c   :  { %v3715_v15 = vmul.f32 0.2, %v6232_v12  ;;  %v3839_v21 = vmax.f32 %v6228_v2, %v3711_v11 }
 0x25d   :  { %v3716_v53 = vmul.f32 0.2, %v6234_v13  ;;  %v2613_v19 = vpop.f32.mrb[36].mxu0  ;;  %v3840_v23 = vmax.f32 %v6230_v8, %v3712_v17 }
 0x25e   :  { %v3843_v22 = vmax.f32 %v6232_v12, %v3715_v15  ;;  %v6235_v55 = vadd.f32 %v2613_v19, %v8970_v42  ;;  %v2615_v27 = vpop.f32.mrb[37].mxu0 }
 0x25f   :  { %v3844_v25 = vmax.f32 %v6234_v13, %v3716_v53  ;;  %v6237_v57 = vadd.f32 %v2615_v27, %v8975_v44  ;;  %v2617_v29 = vpop.f32.mrb[38].mxu0 }
 0x260   :  { %v6236_v31 = vadd.f32 %v6235_v55, %v8417_v3  ;;  %v6239_v32 = vadd.f32 %v2617_v29, %v8970_v42  ;;  %v2619_v41 = vpop.f32.mrb[39].mxu0  ;;  %v8993_v46 = vpack.c.bf16 %v3843_v22, %v3839_v21 }
 0x261   :  { %v6238_v60 = vadd.f32 %v6237_v57, %v8424_v5  ;;  %v6241_v50 = vadd.f32 %v2619_v41, %v8975_v44  ;;  %v8997_v52 = vpack.c.bf16 %v3844_v25, %v3840_v23 }
 0x262   :  { %v3719_v59 = vmul.f32 0.2, %v6236_v31  ;;  %v6240_v62 = vadd.f32 %v6239_v32, %v8431_v7 }
 0x263   :  { %v3720_v2 = vmul.f32 0.2, %v6238_v60  ;;  %v6242_v4 = vadd.f32 %v6241_v50, %v8436_v9 }
 0x264   :  { %v3723_v6 = vmul.f32 0.2, %v6240_v62  ;;  %v3847_v10 = vmax.f32 %v6236_v31, %v3719_v59 }
 0x265   :  { %v3724_v8 = vmul.f32 0.2, %v6242_v4  ;;  %v2623_v3 = vpop.f32.mrb[40].mxu0  ;;  %v3848_v17 = vmax.f32 %v6238_v60, %v3720_v2 }
 0x266   :  { %v3851_v11 = vmax.f32 %v6240_v62, %v3723_v6  ;;  %v6243_v12 = vadd.f32 %v2623_v3, %v8970_v42  ;;  %v2625_v1 = vpop.f32.mrb[41].mxu0 }
 0x267   :  { %v3852_v5 = vmax.f32 %v6242_v4, %v3724_v8  ;;  %v6245_v13 = vadd.f32 %v2625_v1, %v8975_v44  ;;  %v2627_v15 = vpop.f32.mrb[42].mxu0 }
 0x268   :  { %v6244_v53 = vadd.f32 %v6243_v12, %v8454_v14  ;;  %v6247_v7 = vadd.f32 %v2627_v15, %v8970_v42  ;;  %v2629_v19 = vpop.f32.mrb[43].mxu0  ;;  %v9005_v21 = vpack.c.bf16 %v3851_v11, %v3847_v10 }
 0x269   :  { %v6246_v9 = vadd.f32 %v6245_v13, %v8461_v16  ;;  %v6249_v22 = vadd.f32 %v2629_v19, %v8975_v44  ;;  %v9009_v55 = vpack.c.bf16 %v3852_v5, %v3848_v17 }
 0x26a   :  { %v3727_v27 = vmul.f32 0.2, %v6244_v53  ;;  %v6248_v23 = vadd.f32 %v6247_v7, %v8468_v18 }
 0x26b   :  { %v3728_v25 = vmul.f32 0.2, %v6246_v9  ;;  %v6250_v57 = vadd.f32 %v6249_v22, %v8473_v20 }
 0x26c   :  { %v3731_v29 = vmul.f32 0.2, %v6248_v23  ;;  %v3855_v32 = vmax.f32 %v6244_v53, %v3727_v27 }
 0x26d   :  { %v3732_v31 = vmul.f32 0.2, %v6250_v57  ;;  %v2633_v14 = vpop.f32.mrb[44].mxu0  ;;  %v3856_v59 = vmax.f32 %v6246_v9, %v3728_v25 }
 0x26e   :  { %v3859_v41 = vmax.f32 %v6248_v23, %v3731_v29  ;;  %v6251_v60 = vadd.f32 %v2633_v14, %v8970_v42  ;;  %v2635_v50 = vpop.f32.mrb[45].mxu0 }
 0x26f   :  { %v3860_v16 = vmax.f32 %v6250_v57, %v3732_v31  ;;  %v6253_v62 = vadd.f32 %v2635_v50, %v8975_v44  ;;  %v2637_v2 = vpop.f32.mrb[46].mxu0 }
 0x270   :  { %v6252_v4 = vadd.f32 %v6251_v60, %v8488_v24  ;;  %v6255_v18 = vadd.f32 %v2637_v2, %v8970_v42  ;;  %v2639_v6 = vpop.f32.mrb[47].mxu0  ;;  %v9017_v8 = vpack.c.bf16 %v3859_v41, %v3855_v32 }
 0x271   :  { %v6254_v20 = vadd.f32 %v6253_v62, %v8493_v26  ;;  %v6257_v3 = vadd.f32 %v2639_v6, %v8975_v44  ;;  %v9021_v10 = vpack.c.bf16 %v3860_v16, %v3856_v59 }
 0x272   :  { %v3735_v11 = vmul.f32 0.2, %v6252_v4  ;;  %v6256_v12 = vadd.f32 %v6255_v18, %v8498_v28 }
 0x273   :  { %v3736_v1 = vmul.f32 0.2, %v6254_v20  ;;  %v6258_v17 = vadd.f32 %v6257_v3, %v8503_v30 }
 0x274   :  { %v3739_v5 = vmul.f32 0.2, %v6256_v12  ;;  %v3863_v15 = vmax.f32 %v6252_v4, %v3735_v11 }
 0x275   :  { %v3740_v13 = vmul.f32 0.2, %v6258_v17  ;;  %v2643_v24 = vpop.f32.mrb[48].mxu0  ;;  %v3864_v9 = vmax.f32 %v6254_v20, %v3736_v1 }
 0x276   :  { %v3867_v53 = vmax.f32 %v6256_v12, %v3739_v5  ;;  %v6259_v7 = vadd.f32 %v2643_v24, %v8970_v42  ;;  %v2645_v19 = vpop.f32.mrb[49].mxu0 }
 0x277   :  { %v3868_v26 = vmax.f32 %v6258_v17, %v3740_v13  ;;  %v6261_v22 = vadd.f32 %v2645_v19, %v8975_v44  ;;  %v2647_v27 = vpop.f32.mrb[50].mxu0 }
 0x278   :  { %v6260_v23 = vadd.f32 %v6259_v7, %v8516_v34  ;;  %v6263_v28 = vadd.f32 %v2647_v27, %v8970_v42  ;;  %v2649_v25 = vpop.f32.mrb[51].mxu0  ;;  %v9029_v57 = vpack.c.bf16 %v3867_v53, %v3863_v15 }
 0x279   :  { %v6262_v30 = vadd.f32 %v6261_v22, %v8521_v36  ;;  %v6265_v29 = vadd.f32 %v2649_v25, %v8975_v44  ;;  %v9033_v31 = vpack.c.bf16 %v3868_v26, %v3864_v9 }
 0x27a   :  { %v3743_v14 = vmul.f32 0.2, %v6260_v23  ;;  %v6264_v32 = vadd.f32 %v6263_v28, %v8526_v38 }
 0x27b   :  { %v3744_v41 = vmul.f32 0.2, %v6262_v30  ;;  %v6266_v60 = vadd.f32 %v6265_v29, %v8531_v40 }
 0x27c   :  { %v3747_v50 = vmul.f32 0.2, %v6264_v32  ;;  %v3871_v16 = vmax.f32 %v6260_v23, %v3743_v14 }
 0x27d   :  { %v3748_v59 = vmul.f32 0.2, %v6266_v60  ;;  %v2653_v34 = vpop.f32.mrb[52].mxu0  ;;  %v3872_v18 = vmax.f32 %v6262_v30, %v3744_v41 }
 0x27e   :  { %v3875_v62 = vmax.f32 %v6264_v32, %v3747_v50  ;;  %v6267_v2 = vadd.f32 %v2653_v34, %v8970_v42  ;;  %v2655_v4 = vpop.f32.mrb[53].mxu0 }
 0x27f   :  { %v3876_v36 = vmax.f32 %v6266_v60, %v3748_v59  ;;  %v6269_v6 = vadd.f32 %v2655_v4, %v8975_v44  ;;  %v2657_v20 = vpop.f32.mrb[54].mxu0 }
 0x280   :  { %v6268_v3 = vadd.f32 %v6267_v2, %v8541_v43  ;;  %v6271_v38 = vadd.f32 %v2657_v20, %v8970_v42  ;;  %v2659_v11 = vpop.f32.mrb[55].mxu0  ;;  %v9041_v12 = vpack.c.bf16 %v3875_v62, %v3871_v16 }
 0x281   :  { %v6270_v40 = vadd.f32 %v6269_v6, %v8546_v45  ;;  %v6273_v1 = vadd.f32 %v2659_v11, %v8975_v44  ;;  %v9045_v17 = vpack.c.bf16 %v3876_v36, %v3872_v18 }
 0x282   :  { %v3751_v5 = vmul.f32 0.2, %v6268_v3  ;;  %v6272_v13 = vadd.f32 %v6271_v38, %v8551_v47 }
 0x283   :  { %v3752_v24 = vmul.f32 0.2, %v6270_v40  ;;  %v6274_v15 = vadd.f32 %v6273_v1, %v8553_v48 }
 0x284   :  { %v3755_v53 = vmul.f32 0.2, %v6272_v13  ;;  %v3879_v19 = vmax.f32 %v6268_v3, %v3751_v5 }
 0x285   :  { %v3756_v7 = vmul.f32 0.2, %v6274_v15  ;;  %v2663_v43 = vpop.f32.mrb[56].mxu0  ;;  %v3880_v27 = vmax.f32 %v6270_v40, %v3752_v24 }
 0x286   :  { %v3883_v9 = vmax.f32 %v6272_v13, %v3755_v53  ;;  %v6275_v26 = vadd.f32 %v2663_v43, %v8970_v42  ;;  %v2665_v22 = vpop.f32.mrb[57].mxu0 }
 0x287   :  { %v3884_v45 = vmax.f32 %v6274_v15, %v3756_v7  ;;  %v6277_v23 = vadd.f32 %v2665_v22, %v8975_v44  ;;  %v2667_v28 = vpop.f32.mrb[58].mxu0 }
 0x288   :  { %v6276_v25 = vadd.f32 %v6275_v26, %v8557_v49  ;;  %v6279_v47 = vadd.f32 %v2667_v28, %v8970_v42  ;;  %v2669_v30 = vpop.f32.mrb[59].mxu0  ;;  %v9053_v29 = vpack.c.bf16 %v3883_v9, %v3879_v19 }
 0x289   :  { %v6278_v48 = vadd.f32 %v6277_v23, %v8562_v51  ;;  %v6281_v14 = vadd.f32 %v2669_v30, %v8975_v44  ;;  %v9057_v32 = vpack.c.bf16 %v3884_v45, %v3880_v27 }
 0x28a   :  { %v3759_v41 = vmul.f32 0.2, %v6276_v25  ;;  %v6280_v60 = vadd.f32 %v6279_v47, %v8567_v54 }
 0x28b   :  { %v3760_v50 = vmul.f32 0.2, %v6278_v48  ;;  %v6282_v59 = vadd.f32 %v6281_v14, %v8569_v56 }
 0x28c   :  { %v3763_v34 = vmul.f32 0.2, %v6280_v60  ;;  %v3887_v62 = vmax.f32 %v6276_v25, %v3759_v41 }
 0x28d   :  { %v3764_v16 = vmul.f32 0.2, %v6282_v59  ;;  %v2673_v49 = vpop.f32.mrb[60].mxu0  ;;  %v3888_v36 = vmax.f32 %v6278_v48, %v3760_v50 }
 0x28e   :  { %v3891_v2 = vmax.f32 %v6280_v60, %v3763_v34  ;;  %v6283_v4 = vadd.f32 %v2673_v49, %v8970_v42  ;;  %v2675_v18 = vpop.f32.mrb[61].mxu0 }
 0x28f   :  { %v3892_v51 = vmax.f32 %v6282_v59, %v3764_v16  ;;  %v6285_v6 = vadd.f32 %v2675_v18, %v8975_v44  ;;  %v2677_v20 = vpop.f32.mrb[62].mxu0 }
 0x290   :  { %v6284_v3 = vadd.f32 %v6283_v4, %v8573_v58  ;;  %v6287_v54 = vadd.f32 %v2677_v20, %v8970_v42  ;;  %v2679_v38 = vpop.f32.mrb[63].mxu0  ;;  %v9065_v11 = vpack.c.bf16 %v3891_v2, %v3887_v62 }
 0x291   :  { %v6286_v56 = vadd.f32 %v6285_v6, %v8578_v61  ;;  %v6289_v40 = vadd.f32 %v2679_v38, %v8975_v44  ;;  %v9069_v1 = vpack.c.bf16 %v3892_v51, %v3888_v36  ;;  %v7380_v36 = vld [vmem:[%s9693_s3 + $0x100] ss:$8 sps:$4 sm:$0xff]  }
 0x292   :  { %v3767_v5 = vmul.f32 0.2, %v6284_v3  ;;  %v6288_v13 = vadd.f32 %v6287_v54, %v8583_v63 }
 0x293   :  { %v3768_v24 = vmul.f32 0.2, %v6286_v56  ;;  %v6290_v15 = vadd.f32 %v6289_v40, %v8585_v0 }
 0x294   :  { %v3771_v53 = vmul.f32 0.2, %v6288_v13  ;;  %v3895_v43 = vmax.f32 %v6284_v3, %v3767_v5  ;;  %v7385_v3 = vld [vmem:[%s9693_s3 + $0x114] ss:$8 sps:$4 sm:$0xff]   ;;  %v7383_v5 = vld [vmem:[%s9693_s3 + $0x110] ss:$8 sps:$4 sm:$0xff]  }
 0x295   :  { %v3772_v7 = vmul.f32 0.2, %v6290_v15  ;;  %v2716_v58 = vpop.f32.mrb[0].mxu0  ;;  %v3896_v22 = vmax.f32 %v6286_v56, %v3768_v24 }
 0x296   :  { %v3899_v19 = vmax.f32 %v6288_v13, %v3771_v53  ;;  %v6195_v9 = vadd.f32 %v2716_v58, %v8970_v42  ;;  %v2718_v26 = vpop.f32.mrb[1].mxu0 }
 0x297   :  { %v3900_v61 = vmax.f32 %v6290_v15, %v3772_v7  ;;  %v6196_v27 = vadd.f32 %v2718_v26, %v8975_v44  ;;  %v2720_v45 = vpop.f32.mrb[2].mxu0  ;;  %v7388_v15 = vld [vmem:[%s9693_s3 + $0x124] ss:$8 sps:$4 sm:$0xff]  }
 0x298   :  { %v3647_v23 = vmul.f32 0.2, %v6195_v9  ;;  %v6197_v28 = vadd.f32 %v2720_v45, %v8970_v42  ;;  %v2722_v63 = vpop.f32.mrb[3].mxu0  ;;  %v9076_v25 = vpack.c.bf16 %v3899_v19, %v3895_v43 }
 0x299   :  { %v3648_v0 = vmul.f32 0.2, %v6196_v27  ;;  %v6198_v47 = vadd.f32 %v2722_v63, %v8975_v44  ;;  %v9079_v30 = vpack.c.bf16 %v3900_v61, %v3896_v22  ;;  %v7391_v63 = vld [vmem:[%s9693_s3 + $0x134] ss:$8 sps:$4 sm:$0xff]  }
 0x29a   :  { %v3651_v48 = vmul.f32 0.2, %v6197_v28  ;;  %v3775_v41 = vmax.f32 %v6195_v9, %v3647_v23 }
 0x29b   :  { %v3652_v14 = vmul.f32 0.2, %v6198_v47  ;;  %v3776_v50 = vmax.f32 %v6196_v27, %v3648_v0  ;;  %v7386_v27 = vld [vmem:[%s9693_s3 + $0x120] ss:$8 sps:$4 sm:$0xff]  }
 0x29c   :  { %v3779_v60 = vmax.f32 %v6197_v28, %v3651_v48 }
 0x29d   :  { %v3780_v59 = vmax.f32 %v6198_v47, %v3652_v14  ;;  %v2726_v34 = vpop.f32.mrb[4].mxu0 }
 0x29e   :  { %v3903_v16 = vpack.c.bf16 %v3779_v60, %v3775_v41  ;;  %v6199_v49 = vadd.f32 %v2726_v34, %v8970_v42  ;;  %v2728_v62 = vpop.f32.mrb[5].mxu0  ;;  %v7389_v41 = vld [vmem:[%s9693_s3 + $0x130] ss:$8 sps:$4 sm:$0xff]  }
 0x29f   :  { %v6200_v2 = vadd.f32 %v2728_v62, %v8975_v44  ;;  %v2730_v4 = vpop.f32.mrb[6].mxu0  ;;  %v3904_v18 = vpack.c.bf16 %v3780_v59, %v3776_v50  ;;  %v7394_v59 = vld [vmem:[%s9693_s3 + $0x144] ss:$8 sps:$4 sm:$0xff]  }
 0x2a0   :  { %v3655_v51 = vmul.f32 0.2, %v6199_v49  ;;  %v6201_v6 = vadd.f32 %v2730_v4, %v8970_v42  ;;  %v2732_v20 = vpop.f32.mrb[7].mxu0 }
 0x2a1   :  { %v3656_v54 = vmul.f32 0.2, %v6200_v2  ;;  %v6202_v38 = vadd.f32 %v2732_v20, %v8975_v44  ;;  %4395 = vmatprep.mubr.bf16.mxu0 %v3904_v18  ;;  %v397_v18 = vsub.s32 2, %v8954_v37  ;;  %v401_v20 = vsub.s32 3, %v8954_v37 }
 0x2a2   :  { %v3659_v56 = vmul.f32 0.2, %v6201_v6  ;;  %4396 = vmatmul.mubr.bf16.vlgmr.msra.gmra.mrb[64].mxu0 %v3903_v16  ;;  %v3783_v13 = vmax.f32 %v6199_v49, %v3655_v51 }
 0x2a3   :  { %v3660_v40 = vmul.f32 0.2, %v6202_v38  ;;  %4557 = vmatpush1.bf16.msra.mxu0 %v7380_v36  ;;  %v3784_v53 = vmax.f32 %v6200_v2, %v3656_v54 }
 0x2a4   :  { %v3787_v24 = vmax.f32 %v6201_v6, %v3659_v56  ;;  %4558 = vmatprep.subr.bf16.mxu0 %v7385_v3  ;;  %v7392_v3 = vld [vmem:[%s9693_s3 + $0x140] ss:$8 sps:$4 sm:$0xff]  }
 0x2a5   :  { %v3788_v7 = vmax.f32 %v6202_v38, %v3660_v40  ;;  %v2736_v58 = vpop.f32.mrb[8].mxu0  ;;  %v7397_v40 = vld [vmem:[%s9693_s3 + $0x154] ss:$8 sps:$4 sm:$0xff]  }
 0x2a6   :  { %v6203_v43 = vadd.f32 %v2736_v58, %v8970_v42  ;;  %v2738_v19 = vpop.f32.mrb[9].mxu0  ;;  %v3907_v9 = vpack.c.bf16 %v3787_v24, %v3783_v13  ;;  %v7395_v58 = vld [vmem:[%s9693_s3 + $0x150] ss:$8 sps:$4 sm:$0xff]  }
 0x2a7   :  { %v6204_v26 = vadd.f32 %v2738_v19, %v8975_v44  ;;  %v2740_v22 = vpop.f32.mrb[10].mxu0  ;;  %v3908_v61 = vpack.c.bf16 %v3788_v7, %v3784_v53  ;;  %4559 = vmatpush1.bf16.msra.mxu0 %v7383_v5  ;;  %v9129_v7 = vrot.slane %v8961_v35, %v401_v20 }
 0x2a8   :  { %v3663_v45 = vmul.f32 0.2, %v6203_v43  ;;  %v6205_v23 = vadd.f32 %v2740_v22, %v8970_v42  ;;  %v2742_v28 = vpop.f32.mrb[11].mxu0  ;;  %4560 = vmatprep.subr.bf16.mxu0 %v7388_v15  ;;  %v9126_v15 = vrot.slane %v8961_v35, %v397_v18 }
 0x2a9   :  { %v3664_v0 = vmul.f32 0.2, %v6204_v26  ;;  %v6206_v47 = vadd.f32 %v2742_v28, %v8975_v44  ;;  %4405 = vmatprep.mubr.bf16.mxu0 %v3908_v61 }
 0x2aa   :  { %v3667_v48 = vmul.f32 0.2, %v6205_v23  ;;  %4406 = vmatmul.mubr.bf16.gmra.mrb[68].mxu0 %v3907_v9  ;;  %v3791_v60 = vmax.f32 %v6203_v43, %v3663_v45  ;;  %v7400_v9 = vld [vmem:[%s9693_s3 + $0x164] ss:$8 sps:$4 sm:$0xff]  }
 0x2ab   :  { %v3668_v14 = vmul.f32 0.2, %v6206_v47  ;;  %4561 = vmatpush1.bf16.msra.mxu0 %v7386_v27  ;;  %v3792_v34 = vmax.f32 %v6204_v26, %v3664_v0 }
 0x2ac   :  { %v3795_v50 = vmax.f32 %v6205_v23, %v3667_v48  ;;  %4562 = vmatprep.subr.bf16.mxu0 %v7391_v63 }
 0x2ad   :  { %v3796_v16 = vmax.f32 %v6206_v47, %v3668_v14  ;;  %v2746_v49 = vpop.f32.mrb[12].mxu0 }
 0x2ae   :  { %v6207_v62 = vadd.f32 %v2746_v49, %v8970_v42  ;;  %v2748_v2 = vpop.f32.mrb[13].mxu0  ;;  %v3911_v4 = vpack.c.bf16 %v3795_v50, %v3791_v60  ;;  %v7398_v60 = vld [vmem:[%s9693_s3 + $0x160] ss:$8 sps:$4 sm:$0xff]   ;;  %v7403_v50 = vld [vmem:[%s9693_s3 + $0x174] ss:$8 sps:$4 sm:$0xff]  }
 0x2af   :  { %v6208_v36 = vadd.f32 %v2748_v2, %v8975_v44  ;;  %v2750_v51 = vpop.f32.mrb[14].mxu0  ;;  %v3912_v6 = vpack.c.bf16 %v3796_v16, %v3792_v34  ;;  %4563 = vmatpush1.bf16.msra.mxu0 %v7389_v41 }
 0x2b0   :  { %v3671_v54 = vmul.f32 0.2, %v6207_v62  ;;  %v6209_v38 = vadd.f32 %v2750_v51, %v8970_v42  ;;  %v2752_v56 = vpop.f32.mrb[15].mxu0  ;;  %4564 = vmatprep.subr.bf16.mxu0 %v7394_v59 }
 0x2b1   :  { %v3672_v5 = vmul.f32 0.2, %v6208_v36  ;;  %v6210_v13 = vadd.f32 %v2752_v56, %v8975_v44  ;;  %4415 = vmatprep.mubr.bf16.mxu0 %v3912_v6 }
 0x2b2   :  { %v3675_v24 = vmul.f32 0.2, %v6209_v38  ;;  %4416 = vmatmul.mubr.bf16.gmra.mrb[72].mxu0 %v3911_v4  ;;  %v3799_v43 = vmax.f32 %v6207_v62, %v3671_v54 }
 0x2b3   :  { %v3676_v53 = vmul.f32 0.2, %v6210_v13  ;;  %4565 = vmatpush1.bf16.msra.mxu0 %v7392_v3  ;;  %v3800_v26 = vmax.f32 %v6208_v36, %v3672_v5 }
 0x2b4   :  { %v3803_v19 = vmax.f32 %v6209_v38, %v3675_v24  ;;  %4566 = vmatprep.subr.bf16.mxu0 %v7397_v40  ;;  %v7401_v38 = vld [vmem:[%s9693_s3 + $0x170] ss:$8 sps:$4 sm:$0xff]   ;;  %v7406_v24 = vld [vmem:[%s9693_s3 + $0x184] ss:$8 sps:$4 sm:$0xff]  }
 0x2b5   :  { %v3804_v22 = vmax.f32 %v6210_v13, %v3676_v53  ;;  %v2756_v61 = vpop.f32.mrb[16].mxu0 }
 0x2b6   :  { %v3488_v27 = vpop.f32.mrb[32].mxu1  ;;  %v6211_v45 = vadd.f32 %v2756_v61, %v8970_v42  ;;  %v2758_v23 = vpop.f32.mrb[17].mxu0  ;;  %v3915_v63 = vpack.c.bf16 %v3803_v19, %v3799_v43 }
 0x2b7   :  { %v6291_v35 = vadd.f32 %v3488_v27, %v9126_v15  ;;  %v3490_v28 = vpop.f32.mrb[33].mxu1  ;;  %v6212_v0 = vadd.f32 %v2758_v23, %v8975_v44  ;;  %v2760_v48 = vpop.f32.mrb[18].mxu0  ;;  %v3916_v41 = vpack.c.bf16 %v3804_v22, %v3800_v26  ;;  %4567 = vmatpush1.bf16.msra.mxu0 %v7395_v58 }
 0x2b8   :  { %v6292_v47 = vadd.f32 %v3490_v28, %v9129_v7  ;;  %v3492_v14 = vpop.f32.mrb[34].mxu1  ;;  %v3679_v59 = vmul.f32 0.2, %v6211_v45  ;;  %v6213_v16 = vadd.f32 %v2760_v48, %v8970_v42  ;;  %v2762_v62 = vpop.f32.mrb[19].mxu0  ;;  %4568 = vmatprep.subr.bf16.mxu0 %v7400_v9 }
 0x2b9   :  { %v3649_v34 = vmul.f32 0.2, %v6291_v35  ;;  %v6293_v49 = vadd.f32 %v3492_v14, %v9126_v15  ;;  %v3494_v2 = vpop.f32.mrb[35].mxu1  ;;  %v3680_v4 = vmul.f32 0.2, %v6212_v0  ;;  %v6214_v36 = vadd.f32 %v2762_v62, %v8975_v44  ;;  %4425 = vmatprep.mubr.bf16.mxu0 %v3916_v41 }
 0x2ba   :  { %v3650_v18 = vmul.f32 0.2, %v6292_v47  ;;  %v6294_v51 = vadd.f32 %v3494_v2, %v9129_v7  ;;  %v3683_v6 = vmul.f32 0.2, %v6213_v16  ;;  %4426 = vmatmul.mubr.bf16.gmra.mrb[76].mxu0 %v3915_v63  ;;  %v3807_v56 = vmax.f32 %v6211_v45, %v3679_v59  ;;  %v7404_v14 = vld [vmem:[%s9693_s3 + $0x180] ss:$8 sps:$4 sm:$0xff]  }
 0x2bb   :  { %v3653_v20 = vmul.f32 0.2, %v6293_v49  ;;  %v3684_v3 = vmul.f32 0.2, %v6214_v36  ;;  %4569 = vmatpush1.bf16.msra.mxu0 %v7398_v60  ;;  %v3777_v40 = vmax.f32 %v6291_v35, %v3649_v34  ;;  %v3808_v53 = vmax.f32 %v6212_v0, %v3680_v4  ;;  %v7409_v41 = vld [vmem:[%s9693_s3 + $0x194] ss:$8 sps:$4 sm:$0xff]  }
 0x2bc   :  { %v3654_v54 = vmul.f32 0.2, %v6294_v51  ;;  %v3811_v5 = vmax.f32 %v6213_v16, %v3683_v6  ;;  %4570 = vmatprep.subr.bf16.mxu0 %v7403_v50  ;;  %v3778_v58 = vmax.f32 %v6292_v47, %v3650_v18 }
 0x2bd   :  { %v3781_v13 = vmax.f32 %v6293_v49, %v3653_v20  ;;  %v3812_v43 = vmax.f32 %v6214_v36, %v3684_v3  ;;  %v2766_v9 = vpop.f32.mrb[20].mxu0 }
 0x2be   :  { %v3782_v19 = vmax.f32 %v6294_v51, %v3654_v54  ;;  %v3498_v26 = vpop.f32.mrb[36].mxu1  ;;  %v6215_v61 = vadd.f32 %v2766_v9, %v8970_v42  ;;  %v2768_v45 = vpop.f32.mrb[21].mxu0  ;;  %v3919_v23 = vpack.c.bf16 %v3811_v5, %v3807_v56  ;;  %v7407_v54 = vld [vmem:[%s9693_s3 + $0x190] ss:$8 sps:$4 sm:$0xff]  }
 0x2bf   :  { %v9157_v22 = vpack.c.bf16 %v3781_v13, %v3777_v40  ;;  %v6295_v27 = vadd.f32 %v3498_v26, %v9126_v15  ;;  %v3500_v35 = vpop.f32.mrb[37].mxu1  ;;  %v6216_v28 = vadd.f32 %v2768_v45, %v8975_v44  ;;  %v2770_v48 = vpop.f32.mrb[22].mxu0  ;;  %v3920_v47 = vpack.c.bf16 %v3812_v43, %v3808_v53  ;;  %4571 = vmatpush1.bf16.msra.mxu0 %v7401_v38  ;;  %v7412_v13 = vld [vmem:[%s9693_s3 + $0x1a4] ss:$8 sps:$4 sm:$0xff]  }
 0x2c0   :  { %v6296_v63 = vadd.f32 %v3500_v35, %v9129_v7  ;;  %v3502_v0 = vpop.f32.mrb[38].mxu1  ;;  %v9169_v60 = vpack.c.bf16 %v3782_v19, %v3778_v58  ;;  %v3687_v50 = vmul.f32 0.2, %v6215_v61  ;;  %v6217_v34 = vadd.f32 %v2770_v48, %v8970_v42  ;;  %v2772_v49 = vpop.f32.mrb[23].mxu0  ;;  %4572 = vmatprep.subr.bf16.mxu0 %v7406_v24 }
 0x2c1   :  { %v3657_v59 = vmul.f32 0.2, %v6295_v27  ;;  %v6297_v16 = vadd.f32 %v3502_v0, %v9126_v15  ;;  %v3504_v62 = vpop.f32.mrb[39].mxu1  ;;  %v3688_v2 = vmul.f32 0.2, %v6216_v28  ;;  %v6218_v18 = vadd.f32 %v2772_v49, %v8975_v44  ;;  %4435 = vmatprep.mubr.bf16.mxu0 %v3920_v47 }
 0x2c2   :  { %v3658_v4 = vmul.f32 0.2, %v6296_v63  ;;  %v6298_v36 = vadd.f32 %v3504_v62, %v9129_v7  ;;  %v3691_v51 = vmul.f32 0.2, %v6217_v34  ;;  %4436 = vmatmul.mubr.bf16.gmra.mrb[80].mxu0 %v3919_v23  ;;  %v3815_v38 = vmax.f32 %v6215_v61, %v3687_v50 }
 0x2c3   :  { %v3661_v6 = vmul.f32 0.2, %v6297_v16  ;;  %v3692_v20 = vmul.f32 0.2, %v6218_v18  ;;  %4573 = vmatpush1.bf16.msra.mxu0 %v7404_v14  ;;  %v3785_v56 = vmax.f32 %v6295_v27, %v3657_v59  ;;  %v3816_v24 = vmax.f32 %v6216_v28, %v3688_v2  ;;  %v7410_v14 = vld [vmem:[%s9693_s3 + $0x1a0] ss:$8 sps:$4 sm:$0xff]  }
 0x2c4   :  { %v3662_v3 = vmul.f32 0.2, %v6298_v36  ;;  %v3819_v40 = vmax.f32 %v6217_v34, %v3691_v51  ;;  %4574 = vmatprep.subr.bf16.mxu0 %v7409_v41  ;;  %v3786_v53 = vmax.f32 %v6296_v63, %v3658_v4  ;;  %v7415_v41 = vld [vmem:[%s9693_s3 + $0x1b4] ss:$8 sps:$4 sm:$0xff]  }
 0x2c5   :  { %v3789_v5 = vmax.f32 %v6297_v16, %v3661_v6  ;;  %v3820_v58 = vmax.f32 %v6218_v18, %v3692_v20  ;;  %v2776_v19 = vpop.f32.mrb[24].mxu0 }
 0x2c6   :  { %v3790_v43 = vmax.f32 %v6298_v36, %v3662_v3  ;;  %v3508_v9 = vpop.f32.mrb[40].mxu1  ;;  %v6219_v26 = vadd.f32 %v2776_v19, %v8970_v42  ;;  %v2778_v35 = vpop.f32.mrb[25].mxu0  ;;  %v3923_v27 = vpack.c.bf16 %v3819_v40, %v3815_v38  ;;  %v7413_v38 = vld [vmem:[%s9693_s3 + $0x1b0] ss:$8 sps:$4 sm:$0xff]  }
 0x2c7   :  { %v6299_v45 = vadd.f32 %v3508_v9, %v9126_v15  ;;  %v3510_v61 = vpop.f32.mrb[41].mxu1  ;;  %v9183_v23 = vpack.c.bf16 %v3789_v5, %v3785_v56  ;;  %v6220_v48 = vadd.f32 %v2778_v35, %v8975_v44  ;;  %v2780_v47 = vpop.f32.mrb[26].mxu0  ;;  %v3924_v63 = vpack.c.bf16 %v3820_v58, %v3816_v24  ;;  %4575 = vmatpush1.bf16.msra.mxu0 %v7407_v54  ;;  %v7418_v24 = vld [vmem:[%s9693_s3 + $0x1c4] ss:$8 sps:$4 sm:$0xff]  }
 0x2c8   :  { %v6300_v0 = vadd.f32 %v3510_v61, %v9129_v7  ;;  %v3512_v28 = vpop.f32.mrb[42].mxu1  ;;  %v9193_v50 = vpack.c.bf16 %v3790_v43, %v3786_v53  ;;  %v3695_v59 = vmul.f32 0.2, %v6219_v26  ;;  %v6221_v16 = vadd.f32 %v2780_v47, %v8970_v42  ;;  %v2782_v62 = vpop.f32.mrb[27].mxu0  ;;  %4576 = vmatprep.subr.bf16.mxu0 %v7412_v13 }
 0x2c9   :  { %v3665_v34 = vmul.f32 0.2, %v6299_v45  ;;  %v6301_v49 = vadd.f32 %v3512_v28, %v9126_v15  ;;  %v3514_v2 = vpop.f32.mrb[43].mxu1  ;;  %v3696_v4 = vmul.f32 0.2, %v6220_v48  ;;  %v6222_v36 = vadd.f32 %v2782_v62, %v8975_v44  ;;  %4445 = vmatprep.mubr.bf16.mxu0 %v3924_v63 }
 0x2ca   :  { %v3666_v18 = vmul.f32 0.2, %v6300_v0  ;;  %v6302_v51 = vadd.f32 %v3514_v2, %v9129_v7  ;;  %v3699_v6 = vmul.f32 0.2, %v6221_v16  ;;  %4446 = vmatmul.mubr.bf16.gmra.mrb[84].mxu0 %v3923_v27  ;;  %v3823_v56 = vmax.f32 %v6219_v26, %v3695_v59  ;;  %v7416_v59 = vld [vmem:[%s9693_s3 + $0x1c0] ss:$8 sps:$4 sm:$0xff]  }
 0x2cb   :  { %v3669_v20 = vmul.f32 0.2, %v6301_v49  ;;  %v3700_v3 = vmul.f32 0.2, %v6222_v36  ;;  %4577 = vmatpush1.bf16.msra.mxu0 %v7410_v14  ;;  %v3793_v40 = vmax.f32 %v6299_v45, %v3665_v34  ;;  %v3824_v53 = vmax.f32 %v6220_v48, %v3696_v4  ;;  %v7421_v34 = vld [vmem:[%s9693_s3 + $0x1d4] ss:$8 sps:$4 sm:$0xff]  }
 0x2cc   :  { %v3670_v54 = vmul.f32 0.2, %v6302_v51  ;;  %v3827_v5 = vmax.f32 %v6221_v16, %v3699_v6  ;;  %4578 = vmatprep.subr.bf16.mxu0 %v7415_v41  ;;  %v3794_v58 = vmax.f32 %v6300_v0, %v3666_v18 }
 0x2cd   :  { %v3797_v13 = vmax.f32 %v6301_v49, %v3669_v20  ;;  %v3828_v43 = vmax.f32 %v6222_v36, %v3700_v3  ;;  %v2786_v9 = vpop.f32.mrb[28].mxu0 }
 0x2ce   :  { %v3798_v19 = vmax.f32 %v6302_v51, %v3670_v54  ;;  %v3518_v35 = vpop.f32.mrb[44].mxu1  ;;  %v6223_v61 = vadd.f32 %v2786_v9, %v8970_v42  ;;  %v2788_v47 = vpop.f32.mrb[29].mxu0  ;;  %v3927_v45 = vpack.c.bf16 %v3827_v5, %v3823_v56 }
 0x2cf   :  { %v6303_v27 = vadd.f32 %v3518_v35, %v9126_v15  ;;  %v3520_v26 = vpop.f32.mrb[45].mxu1  ;;  %v9207_v28 = vpack.c.bf16 %v3797_v13, %v3793_v40  ;;  %v6224_v63 = vadd.f32 %v2788_v47, %v8975_v44  ;;  %v2790_v41 = vpop.f32.mrb[30].mxu0  ;;  %v3928_v0 = vpack.c.bf16 %v3828_v43, %v3824_v53  ;;  %4579 = vmatpush1.bf16.msra.mxu0 %v7413_v38 }
 0x2d0   :  { %v6304_v14 = vadd.f32 %v3520_v26, %v9129_v7  ;;  %v3522_v48 = vpop.f32.mrb[46].mxu1  ;;  %v9217_v16 = vpack.c.bf16 %v3798_v19, %v3794_v58  ;;  %v3703_v49 = vmul.f32 0.2, %v6223_v61  ;;  %v6225_v2 = vadd.f32 %v2790_v41, %v8970_v42  ;;  %v2792_v18 = vpop.f32.mrb[31].mxu0  ;;  %4580 = vmatprep.subr.bf16.mxu0 %v7418_v24  ;;  %v7419_v42 = vld [vmem:[%s9693_s3 + $0x1d0] ss:$8 sps:$4 sm:$0xff]  }
 0x2d1   :  { %v3673_v62 = vmul.f32 0.2, %v6303_v27  ;;  %v6305_v4 = vadd.f32 %v3522_v48, %v9126_v15  ;;  %v3524_v36 = vpop.f32.mrb[47].mxu1  ;;  %v3704_v51 = vmul.f32 0.2, %v6224_v63  ;;  %v6226_v20 = vadd.f32 %v2792_v18, %v8975_v44  ;;  %4455 = vmatprep.mubr.bf16.mxu0 %v3928_v0 }
 0x2d2   :  { %v3674_v6 = vmul.f32 0.2, %v6304_v14  ;;  %v6306_v3 = vadd.f32 %v3524_v36, %v9129_v7  ;;  %v3707_v54 = vmul.f32 0.2, %v6225_v2  ;;  %4456 = vmatmul.mubr.bf16.gmra.mrb[88].mxu0 %v3927_v45  ;;  %v3831_v5 = vmax.f32 %v6223_v61, %v3703_v49  ;;  %v7424_v44 = vld [vmem:[%s9693_s3 + $0x1e4] ss:$8 sps:$4 sm:$0xff]  }
 0x2d3   :  { %v3677_v38 = vmul.f32 0.2, %v6305_v4  ;;  %v3708_v56 = vmul.f32 0.2, %v6226_v20  ;;  %4581 = vmatpush1.bf16.msra.mxu0 %v7416_v59  ;;  %v3801_v13 = vmax.f32 %v6303_v27, %v3673_v62  ;;  %v3832_v58 = vmax.f32 %v6224_v63, %v3704_v51  ;;  %v7422_v0 = vld [vmem:[%s9693_s3 + $0x1e0] ss:$8 sps:$4 sm:$0xff]  }
 0x2d4   :  { %v3678_v40 = vmul.f32 0.2, %v6306_v3  ;;  %v3835_v24 = vmax.f32 %v6225_v2, %v3707_v54  ;;  %4582 = vmatprep.subr.bf16.mxu0 %v7421_v34  ;;  %v3802_v43 = vmax.f32 %v6304_v14, %v3674_v6  ;;  %v7427_v49 = vld [vmem:[%s9693_s3 + $0x1f4] ss:$8 sps:$4 sm:$0xff]   ;;  %v7425_v36 = vld [vmem:[%s9693_s3 + $0x1f0] ss:$8 sps:$4 sm:$0xff]  }
 0x2d5   :  { %v3805_v53 = vmax.f32 %v6305_v4, %v3677_v38  ;;  %v3836_v19 = vmax.f32 %v6226_v20, %v3708_v56 }
 0x2d6   :  { %v3806_v9 = vmax.f32 %v6306_v3, %v3678_v40  ;;  %v3528_v35 = vpop.f32.mrb[48].mxu1  ;;  %v3931_v45 = vpack.c.bf16 %v3835_v24, %v3831_v5 }
 0x2d7   :  { %v6307_v47 = vadd.f32 %v3528_v35, %v9126_v15  ;;  %v3530_v26 = vpop.f32.mrb[49].mxu1  ;;  %v9230_v41 = vpack.c.bf16 %v3805_v53, %v3801_v13  ;;  %v3932_v48 = vpack.c.bf16 %v3836_v19, %v3832_v58  ;;  %4583 = vmatpush1.bf16.msra.mxu0 %v7419_v42 }
 0x2d8   :  { %v6308_v61 = vadd.f32 %v3530_v26, %v9129_v7  ;;  %v3532_v27 = vpop.f32.mrb[50].mxu1  ;;  %v9236_v63 = vpack.c.bf16 %v3806_v9, %v3802_v43  ;;  %4584 = vmatprep.subr.bf16.mxu0 %v7424_v44 }
 0x2d9   :  { %v3681_v14 = vmul.f32 0.2, %v6307_v47  ;;  %v6309_v59 = vadd.f32 %v3532_v27, %v9126_v15  ;;  %v3534_v34 = vpop.f32.mrb[51].mxu1  ;;  %4465 = vmatprep.mubr.bf16.mxu0 %v3932_v48 }
 0x2da   :  { %v3682_v62 = vmul.f32 0.2, %v6308_v61  ;;  %v6310_v2 = vadd.f32 %v3534_v34, %v9129_v7  ;;  %4466 = vmatmul.mubr.bf16.gmra.mrb[92].mxu0 %v3931_v45 }
 0x2db   :  { %v3685_v4 = vmul.f32 0.2, %v6309_v59  ;;  %4475 = vmatprep.mubr.bf16.mxu0 %v8997_v52  ;;  %4585 = vmatpush1.bf16.msra.mxu0 %v7422_v0  ;;  %v3809_v51 = vmax.f32 %v6307_v47, %v3681_v14 }
 0x2dc   :  { %v3686_v18 = vmul.f32 0.2, %v6310_v2  ;;  %4586 = vmatprep.subr.bf16.mxu0 %v7427_v49  ;;  %v3810_v20 = vmax.f32 %v6308_v61, %v3682_v62 }
 0x2dd   :  { %v3813_v6 = vmax.f32 %v6309_v59, %v3685_v4 }
 0x2de   :  { %v3814_v3 = vmax.f32 %v6310_v2, %v3686_v18  ;;  %v3538_v54 = vpop.f32.mrb[52].mxu1 }
 0x2df   :  { %v6311_v38 = vadd.f32 %v3538_v54, %v9126_v15  ;;  %v3540_v56 = vpop.f32.mrb[53].mxu1  ;;  %v9248_v40 = vpack.c.bf16 %v3813_v6, %v3809_v51  ;;  %4587 = vmatpush1.bf16.msra.mxu0 %v7425_v36 }
 0x2e0   :  { %v6312_v42 = vadd.f32 %v3540_v56, %v9129_v7  ;;  %v3542_v5 = vpop.f32.mrb[54].mxu1  ;;  %v9251_v52 = vpack.c.bf16 %v3814_v3, %v3810_v20 }
 0x2e1   :  { %v3689_v13 = vmul.f32 0.2, %v6311_v38  ;;  %v6313_v24 = vadd.f32 %v3542_v5, %v9126_v15  ;;  %v3544_v53 = vpop.f32.mrb[55].mxu1 }
 0x2e2   :  { %v3690_v44 = vmul.f32 0.2, %v6312_v42  ;;  %v6314_v58 = vadd.f32 %v3544_v53, %v9129_v7  ;;  %4476 = vmatmul.mubr.bf16.gmra.mrb[96].mxu0 %v8993_v46 }
 0x2e3   :  { %v3693_v43 = vmul.f32 0.2, %v6313_v24  ;;  %4485 = vmatprep.mubr.bf16.mxu0 %v9009_v55  ;;  %v3817_v9 = vmax.f32 %v6311_v38, %v3689_v13 }
 0x2e4   :  { %v3694_v19 = vmul.f32 0.2, %v6314_v58  ;;  %v3818_v47 = vmax.f32 %v6312_v42, %v3690_v44 }
 0x2e5   :  { %v3821_v35 = vmax.f32 %v6313_v24, %v3693_v43 }
 0x2e6   :  { %v3822_v26 = vmax.f32 %v6314_v58, %v3694_v19  ;;  %v3548_v45 = vpop.f32.mrb[56].mxu1 }
 0x2e7   :  { %v6315_v61 = vadd.f32 %v3548_v45, %v9126_v15  ;;  %v3550_v27 = vpop.f32.mrb[57].mxu1  ;;  %v9258_v48 = vpack.c.bf16 %v3821_v35, %v3817_v9 }
 0x2e8   :  { %v6316_v0 = vadd.f32 %v3550_v27, %v9129_v7  ;;  %v3552_v14 = vpop.f32.mrb[58].mxu1  ;;  %v9261_v59 = vpack.c.bf16 %v3822_v26, %v3818_v47 }
 0x2e9   :  { %v3697_v34 = vmul.f32 0.2, %v6315_v61  ;;  %v6317_v46 = vadd.f32 %v3552_v14, %v9126_v15  ;;  %v3554_v49 = vpop.f32.mrb[59].mxu1 }
 0x2ea   :  { %v3698_v55 = vmul.f32 0.2, %v6316_v0  ;;  %v6318_v62 = vadd.f32 %v3554_v49, %v9129_v7  ;;  %4486 = vmatmul.mubr.bf16.gmra.mrb[100].mxu0 %v9005_v21 }
 0x2eb   :  { %v3701_v2 = vmul.f32 0.2, %v6317_v46  ;;  %4495 = vmatprep.mubr.bf16.mxu0 %v9021_v10  ;;  %v3825_v18 = vmax.f32 %v6315_v61, %v3697_v34 }
 0x2ec   :  { %v3702_v4 = vmul.f32 0.2, %v6318_v62  ;;  %v3826_v51 = vmax.f32 %v6316_v0, %v3698_v55 }
 0x2ed   :  { %v3829_v36 = vmax.f32 %v6317_v46, %v3701_v2 }
 0x2ee   :  { %v3830_v6 = vmax.f32 %v6318_v62, %v3702_v4  ;;  %v3558_v20 = vpop.f32.mrb[60].mxu1 }
 0x2ef   :  { %v6319_v3 = vadd.f32 %v3558_v20, %v9126_v15  ;;  %v3560_v54 = vpop.f32.mrb[61].mxu1  ;;  %v9268_v38 = vpack.c.bf16 %v3829_v36, %v3825_v18 }
 0x2f0   :  { %v6320_v56 = vadd.f32 %v3560_v54, %v9129_v7  ;;  %v3562_v42 = vpop.f32.mrb[62].mxu1  ;;  %v9271_v5 = vpack.c.bf16 %v3830_v6, %v3826_v51 }
 0x2f1   :  { %v3705_v13 = vmul.f32 0.2, %v6319_v3  ;;  %v6321_v21 = vadd.f32 %v3562_v42, %v9126_v15  ;;  %v3564_v24 = vpop.f32.mrb[63].mxu1 }
 0x2f2   :  { %v3706_v10 = vmul.f32 0.2, %v6320_v56  ;;  %v6322_v53 = vadd.f32 %v3564_v24, %v9129_v7  ;;  %4496 = vmatmul.mubr.bf16.gmra.mrb[104].mxu0 %v9017_v8 }
 0x2f3   :  { %v3709_v44 = vmul.f32 0.2, %v6321_v21  ;;  %4505 = vmatprep.mubr.bf16.mxu0 %v9033_v31  ;;  %v3833_v43 = vmax.f32 %v6319_v3, %v3705_v13 }
 0x2f4   :  { %v3710_v58 = vmul.f32 0.2, %v6322_v53  ;;  %v3834_v9 = vmax.f32 %v6320_v56, %v3706_v10 }
 0x2f5   :  { %v3837_v19 = vmax.f32 %v6321_v21, %v3709_v44 }
 0x2f6   :  { %v3838_v35 = vmax.f32 %v6322_v53, %v3710_v58  ;;  %v3568_v47 = vpop.f32.mrb[64].mxu1 }
 0x2f7   :  { %v6323_v26 = vadd.f32 %v3568_v47, %v9126_v15  ;;  %v3570_v45 = vpop.f32.mrb[65].mxu1  ;;  %v9278_v61 = vpack.c.bf16 %v3837_v19, %v3833_v43 }
 0x2f8   :  { %v6324_v27 = vadd.f32 %v3570_v45, %v9129_v7  ;;  %v3572_v0 = vpop.f32.mrb[66].mxu1  ;;  %v9281_v14 = vpack.c.bf16 %v3838_v35, %v3834_v9 }
 0x2f9   :  { %v3713_v34 = vmul.f32 0.2, %v6323_v26  ;;  %v6325_v8 = vadd.f32 %v3572_v0, %v9126_v15  ;;  %v3574_v46 = vpop.f32.mrb[67].mxu1 }
 0x2fa   :  { %v3714_v31 = vmul.f32 0.2, %v6324_v27  ;;  %v6326_v49 = vadd.f32 %v3574_v46, %v9129_v7  ;;  %4506 = vmatmul.mubr.bf16.gmra.mrb[108].mxu0 %v9029_v57 }
 0x2fb   :  { %v3717_v55 = vmul.f32 0.2, %v6325_v8  ;;  %4515 = vmatprep.mubr.bf16.mxu0 %v9045_v17  ;;  %v3841_v2 = vmax.f32 %v6323_v26, %v3713_v34 }
 0x2fc   :  { %v3718_v62 = vmul.f32 0.2, %v6326_v49  ;;  %v3842_v18 = vmax.f32 %v6324_v27, %v3714_v31 }
 0x2fd   :  { %v3845_v4 = vmax.f32 %v6325_v8, %v3717_v55 }
 0x2fe   :  { %v3846_v36 = vmax.f32 %v6326_v49, %v3718_v62  ;;  %v3578_v51 = vpop.f32.mrb[68].mxu1 }
 0x2ff   :  { %v6327_v6 = vadd.f32 %v3578_v51, %v9126_v15  ;;  %v3580_v20 = vpop.f32.mrb[69].mxu1  ;;  %v9288_v3 = vpack.c.bf16 %v3845_v4, %v3841_v2 }
 0x300   :  { %v6328_v54 = vadd.f32 %v3580_v20, %v9129_v7  ;;  %v3582_v56 = vpop.f32.mrb[70].mxu1  ;;  %v9291_v42 = vpack.c.bf16 %v3846_v36, %v3842_v18 }
 0x301   :  { %v3721_v13 = vmul.f32 0.2, %v6327_v6  ;;  %v6329_v57 = vadd.f32 %v3582_v56, %v9126_v15  ;;  %v3584_v21 = vpop.f32.mrb[71].mxu1 }
 0x302   :  { %v3722_v17 = vmul.f32 0.2, %v6328_v54  ;;  %v6330_v24 = vadd.f32 %v3584_v21, %v9129_v7  ;;  %4516 = vmatmul.mubr.bf16.gmra.mrb[112].mxu0 %v9041_v12 }
 0x303   :  { %v3725_v10 = vmul.f32 0.2, %v6329_v57  ;;  %4525 = vmatprep.mubr.bf16.mxu0 %v9057_v32  ;;  %v3849_v44 = vmax.f32 %v6327_v6, %v3721_v13 }
 0x304   :  { %v3726_v53 = vmul.f32 0.2, %v6330_v24  ;;  %v3850_v43 = vmax.f32 %v6328_v54, %v3722_v17 }
 0x305   :  { %v3853_v58 = vmax.f32 %v6329_v57, %v3725_v10 }
 0x306   :  { %v3854_v19 = vmax.f32 %v6330_v24, %v3726_v53  ;;  %v3588_v9 = vpop.f32.mrb[72].mxu1 }
 0x307   :  { %v6331_v35 = vadd.f32 %v3588_v9, %v9126_v15  ;;  %v3590_v47 = vpop.f32.mrb[73].mxu1  ;;  %v9298_v26 = vpack.c.bf16 %v3853_v58, %v3849_v44  ;;  %v7428_v44 = vld [vmem:[%s9695_s5 + $0x40] sm:$0xff]  }
 0x308   :  { %v6332_v45 = vadd.f32 %v3590_v47, %v9129_v7  ;;  %v3592_v27 = vpop.f32.mrb[74].mxu1  ;;  %v9301_v0 = vpack.c.bf16 %v3854_v19, %v3850_v43  ;;  %v7429_v9 = vld [vmem:[%s9695_s5] sm:$0xff]   ;;  %6179 = vmatprep.subr.bf16.mxu1 %v7428_v44  ;;  %5979 = vmatprep.subr.bf16.mxu0 %v7428_v44 }
 0x309   :  { %v3729_v34 = vmul.f32 0.2, %v6331_v35  ;;  %v6333_v12 = vadd.f32 %v3592_v27, %v9126_v15  ;;  %v3594_v8 = vpop.f32.mrb[75].mxu1  ;;  %6187 = vmatpush3.bf16.msra.mxu1 %v7429_v9 }
 0x30a   :  { %v3730_v32 = vmul.f32 0.2, %v6332_v45  ;;  %v6334_v46 = vadd.f32 %v3594_v8, %v9129_v7  ;;  %4526 = vmatmul.mubr.bf16.gmra.mrb[116].mxu0 %v9053_v29 }
 0x30b   :  { %v3733_v31 = vmul.f32 0.2, %v6333_v12  ;;  %4535 = vmatprep.mubr.bf16.mxu0 %v9069_v1  ;;  %v3857_v55 = vmax.f32 %v6331_v35, %v3729_v34 }
 0x30c   :  { %v3734_v49 = vmul.f32 0.2, %v6334_v46  ;;  %v3858_v2 = vmax.f32 %v6332_v45, %v3730_v32 }
 0x30d   :  { %v3861_v62 = vmax.f32 %v6333_v12, %v3733_v31 }
 0x30e   :  { %v3862_v4 = vmax.f32 %v6334_v46, %v3734_v49  ;;  %v3598_v18 = vpop.f32.mrb[76].mxu1  ;;  %v7430_v49 = vld [vmem:[%s9695_s5 + $0x48] sm:$0xff]  }
 0x30f   :  { %v6335_v36 = vadd.f32 %v3598_v18, %v9126_v15  ;;  %v3600_v51 = vpop.f32.mrb[77].mxu1  ;;  %v9308_v6 = vpack.c.bf16 %v3861_v62, %v3857_v55  ;;  %v7431_v62 = vld [vmem:[%s9695_s5 + $0x8] sm:$0xff]   ;;  %6180 = vmatprep.subr.bf16.mxu1 %v7430_v49  ;;  %v7432_v18 = vld [vmem:[%s9695_s5 + $0x50] sm:$0xff]  }
 0x310   :  { %v6336_v20 = vadd.f32 %v3600_v51, %v9129_v7  ;;  %v3602_v54 = vpop.f32.mrb[78].mxu1  ;;  %v9311_v56 = vpack.c.bf16 %v3862_v4, %v3858_v2  ;;  %6188 = vmatpush3.bf16.msra.mxu1 %v7431_v62 }
 0x311   :  { %v3737_v13 = vmul.f32 0.2, %v6335_v36  ;;  %v6337_v29 = vadd.f32 %v3602_v54, %v9126_v15  ;;  %v3604_v57 = vpop.f32.mrb[79].mxu1  ;;  %6181 = vmatprep.subr.bf16.mxu1 %v7432_v18 }
 0x312   :  { %v3738_v1 = vmul.f32 0.2, %v6336_v20  ;;  %v6338_v21 = vadd.f32 %v3604_v57, %v9129_v7  ;;  %4536 = vmatmul.mubr.bf16.gmra.mrb[120].mxu0 %v9065_v11 }
 0x313   :  { %v3741_v17 = vmul.f32 0.2, %v6337_v29  ;;  %4545 = vmatprep.mubr.bf16.mxu0 %v9079_v30  ;;  %v3865_v10 = vmax.f32 %v6335_v36, %v3737_v13 }
 0x314   :  { %v3742_v24 = vmul.f32 0.2, %v6338_v21  ;;  %v3866_v58 = vmax.f32 %v6336_v20, %v3738_v1  ;;  %v7433_v1 = vld [vmem:[%s9695_s5 + $0x10] sm:$0xff]  }
 0x315   :  { %v3869_v53 = vmax.f32 %v6337_v29, %v3741_v17  ;;  %6189 = vmatpush3.bf16.msra.mxu1 %v7433_v1 }
 0x316   :  { %v3870_v43 = vmax.f32 %v6338_v21, %v3742_v24  ;;  %v3608_v19 = vpop.f32.mrb[80].mxu1 }
 0x317   :  { %v6339_v35 = vadd.f32 %v3608_v19, %v9126_v15  ;;  %v3610_v47 = vpop.f32.mrb[81].mxu1  ;;  %v9324_v11 = vpack.c.bf16 %v3869_v53, %v3865_v10  ;;  %v7434_v10 = vld [vmem:[%s9695_s5 + $0x58] sm:$0xff]  }
 0x318   :  { %v6340_v30 = vadd.f32 %v3610_v47, %v9129_v7  ;;  %v3612_v45 = vpop.f32.mrb[82].mxu1  ;;  %v9327_v27 = vpack.c.bf16 %v3870_v43, %v3866_v58  ;;  %6182 = vmatprep.subr.bf16.mxu1 %v7434_v10  ;;  %v7435_v43 = vld [vmem:[%s9695_s5 + $0x18] sm:$0xff]  }
 0x319   :  { %v3745_v34 = vmul.f32 0.2, %v6339_v35  ;;  %v6341_v12 = vadd.f32 %v3612_v45, %v9126_v15  ;;  %v3614_v8 = vpop.f32.mrb[83].mxu1  ;;  %6190 = vmatpush3.bf16.msra.mxu1 %v7435_v43 }
 0x31a   :  { %v3746_v32 = vmul.f32 0.2, %v6340_v30  ;;  %v6342_v46 = vadd.f32 %v3614_v8, %v9129_v7  ;;  %4546 = vmatmul.mubr.bf16.gmra.mrb[124].mxu0 %v9076_v25 }
 0x31b   :  { %v3749_v31 = vmul.f32 0.2, %v6341_v12  ;;  %4588 = vmatprep.mubr.bf16.mxu0 %v9169_v60  ;;  %v3873_v2 = vmax.f32 %v6339_v35, %v3745_v34 }
 0x31c   :  { %v3750_v55 = vmul.f32 0.2, %v6342_v46  ;;  %v3874_v36 = vmax.f32 %v6340_v30, %v3746_v32  ;;  %v7436_v30 = vld [vmem:[%s9695_s5 + $0x60] sm:$0xff]  }
 0x31d   :  { %v3877_v4 = vmax.f32 %v6341_v12, %v3749_v31  ;;  %6183 = vmatprep.subr.bf16.mxu1 %v7436_v30  ;;  %v7437_v31 = vld [vmem:[%s9695_s5 + $0x20] sm:$0xff]  }
 0x31e   :  { %v3878_v25 = vmax.f32 %v6342_v46, %v3750_v55  ;;  %v3618_v51 = vpop.f32.mrb[84].mxu1  ;;  %6191 = vmatpush3.bf16.msra.mxu1 %v7437_v31 }
 0x31f   :  { %v6343_v20 = vadd.f32 %v3618_v51, %v9126_v15  ;;  %v3620_v54 = vpop.f32.mrb[85].mxu1  ;;  %v9343_v13 = vpack.c.bf16 %v3877_v4, %v3873_v2  ;;  %v7438_v4 = vld [vmem:[%s9695_s5 + $0x68] sm:$0xff]  }
 0x320   :  { %v6344_v60 = vadd.f32 %v3620_v54, %v9129_v7  ;;  %v3622_v29 = vpop.f32.mrb[86].mxu1  ;;  %v9346_v57 = vpack.c.bf16 %v3878_v25, %v3874_v36  ;;  %6184 = vmatprep.subr.bf16.mxu1 %v7438_v4 }
 0x321   :  { %v3753_v21 = vmul.f32 0.2, %v6343_v20  ;;  %v6345_v17 = vadd.f32 %v3622_v29, %v9126_v15  ;;  %v3624_v24 = vpop.f32.mrb[87].mxu1 }
 0x322   :  { %v3754_v53 = vmul.f32 0.2, %v6344_v60  ;;  %v6346_v44 = vadd.f32 %v3624_v24, %v9129_v7  ;;  %4589 = vmatmul.mubr.bf16.vlgmr.msra.gmra.mrb[64].mxu0 %v9157_v22 }
 0x323   :  { %v3757_v58 = vmul.f32 0.2, %v6345_v17  ;;  %4598 = vmatprep.mubr.bf16.mxu0 %v9193_v50  ;;  %5980 = vmatpush3.bf16.msra.mxu0 %v7429_v9  ;;  %v3881_v35 = vmax.f32 %v6343_v20, %v3753_v21 }
 0x324   :  { %v3758_v19 = vmul.f32 0.2, %v6346_v44  ;;  %5981 = vmatprep.subr.bf16.mxu0 %v7430_v49  ;;  %v3882_v45 = vmax.f32 %v6344_v60, %v3754_v53  ;;  %v7440_v60 = vld [vmem:[%s9695_s5 + $0x70] sm:$0xff]  }
 0x325   :  { %v3885_v47 = vmax.f32 %v6345_v17, %v3757_v58 }
 0x326   :  { %v3886_v34 = vmax.f32 %v6346_v44, %v3758_v19  ;;  %v3628_v12 = vpop.f32.mrb[88].mxu1 }
 0x327   :  { %v6347_v22 = vadd.f32 %v3628_v12, %v9126_v15  ;;  %v3630_v8 = vpop.f32.mrb[89].mxu1  ;;  %v9365_v32 = vpack.c.bf16 %v3885_v47, %v3881_v35  ;;  %5982 = vmatpush3.bf16.msra.mxu0 %v7431_v62 }
 0x328   :  { %v6348_v50 = vadd.f32 %v3630_v8, %v9129_v7  ;;  %v3632_v9 = vpop.f32.mrb[90].mxu1  ;;  %v9368_v46 = vpack.c.bf16 %v3886_v34, %v3882_v45  ;;  %5983 = vmatprep.subr.bf16.mxu0 %v7432_v18  ;;  %v7439_v18 = vld [vmem:[%s9695_s5 + $0x28] sm:$0xff]  }
 0x329   :  { %v3761_v49 = vmul.f32 0.2, %v6347_v22  ;;  %v6349_v55 = vadd.f32 %v3632_v9, %v9126_v15  ;;  %v3634_v2 = vpop.f32.mrb[91].mxu1  ;;  %6192 = vmatpush3.bf16.msra.mxu1 %v7439_v18 }
 0x32a   :  { %v3762_v36 = vmul.f32 0.2, %v6348_v50  ;;  %v6350_v25 = vadd.f32 %v3634_v2, %v9129_v7  ;;  %4599 = vmatmul.mubr.bf16.gmra.mrb[68].mxu0 %v9183_v23  ;;  %6185 = vmatprep.subr.bf16.mxu1 %v7440_v60 }
 0x32b   :  { %v3765_v51 = vmul.f32 0.2, %v6349_v55  ;;  %4608 = vmatprep.mubr.bf16.mxu0 %v9217_v16  ;;  %5984 = vmatpush3.bf16.msra.mxu0 %v7433_v1  ;;  %v3889_v20 = vmax.f32 %v6347_v22, %v3761_v49 }
 0x32c   :  { %v3766_v62 = vmul.f32 0.2, %v6350_v25  ;;  %5985 = vmatprep.subr.bf16.mxu0 %v7434_v10  ;;  %v3890_v29 = vmax.f32 %v6348_v50, %v3762_v36  ;;  %v7441_v10 = vld [vmem:[%s9695_s5 + $0x30] sm:$0xff]  }
 0x32d   :  { %v3893_v54 = vmax.f32 %v6349_v55, %v3765_v51  ;;  %6193 = vmatpush3.bf16.msra.mxu1 %v7441_v10 }
 0x32e   :  { %v3894_v21 = vmax.f32 %v6350_v25, %v3766_v62  ;;  %v3638_v17 = vpop.f32.mrb[92].mxu1 }
 0x32f   :  { %v6351_v23 = vadd.f32 %v3638_v17, %v9126_v15  ;;  %v3640_v24 = vpop.f32.mrb[93].mxu1  ;;  %v3961_v16 = vpack.c.bf16 %v3893_v54, %v3889_v20  ;;  %5986 = vmatpush3.bf16.msra.mxu0 %v7435_v43 }
 0x330   :  { %v6352_v1 = vadd.f32 %v3640_v24, %v9129_v7  ;;  %v3642_v53 = vpop.f32.mrb[94].mxu1  ;;  %v3962_v44 = vpack.c.bf16 %v3894_v21, %v3890_v29  ;;  %5987 = vmatprep.subr.bf16.mxu0 %v7436_v30 }
 0x331   :  { %v3769_v58 = vmul.f32 0.2, %v6351_v23  ;;  %v6353_v19 = vadd.f32 %v3642_v53, %v9126_v15  ;;  %v3644_v35 = vpop.f32.mrb[95].mxu1 }
 0x332   :  { %v3770_v47 = vmul.f32 0.2, %v6352_v1  ;;  %v6354_v45 = vadd.f32 %v3644_v35, %v9129_v7  ;;  %4609 = vmatmul.mubr.bf16.gmra.mrb[72].mxu0 %v9207_v28  ;;  %v7442_v7 = vld [vmem:[%s9695_s5 + $0x78] sm:$0xff]  }
 0x333   :  { %v3773_v34 = vmul.f32 0.2, %v6353_v19  ;;  %4618 = vmatprep.mubr.bf16.mxu0 %v9236_v63  ;;  %5988 = vmatpush3.bf16.msra.mxu0 %v7437_v31  ;;  %v3897_v43 = vmax.f32 %v6351_v23, %v3769_v58  ;;  %v7443_v28 = vld [vmem:[%s9695_s5 + $0x38] sm:$0xff]  }
 0x334   :  { %v3774_v12 = vmul.f32 0.2, %v6354_v45  ;;  %5989 = vmatprep.subr.bf16.mxu0 %v7438_v4  ;;  %v3898_v8 = vmax.f32 %v6352_v1, %v3770_v47  ;;  %6186 = vmatprep.subr.bf16.mxu1 %v7442_v7 }
 0x335   :  { %v3901_v22 = vmax.f32 %v6353_v19, %v3773_v34  ;;  %6194 = vmatpush3.bf16.msra.mxu1 %v7443_v28 }
 0x336   :  { %v3902_v50 = vmax.f32 %v6354_v45, %v3774_v12 }
 0x337   :  { %v3965_v9 = vpack.c.bf16 %v3901_v22, %v3897_v43  ;;  %5990 = vmatpush3.bf16.msra.mxu0 %v7439_v18 }
 0x338   :  { %v3966_v15 = vpack.c.bf16 %v3902_v50, %v3898_v8  ;;  %5991 = vmatprep.subr.bf16.mxu0 %v7440_v60 }
 0x33a   :  { %4619 = vmatmul.mubr.bf16.gmra.mrb[76].mxu0 %v9230_v41  ;;  %v4031_v41 = vld [vmem:[%s9696_s4] sm:$0x3] }
 0x33b   :  { %4628 = vmatprep.mubr.bf16.mxu0 %v9251_v52  ;;  %5992 = vmatpush3.bf16.msra.mxu0 %v7441_v10  ;;  %v9427_v63 = vrot.slane %v4031_v41, %v389_v33 }
 0x33c   :  { %5993 = vmatprep.subr.bf16.mxu0 %v7442_v7 }
 0x33f   :  { %5994 = vmatpush3.bf16.msra.mxu0 %v7443_v28 }
 0x342   :  { %4629 = vmatmul.mubr.bf16.gmra.mrb[80].mxu0 %v9248_v40  ;;  %v9431_v40 = vrot.slane %v4031_v41, %v393_v39  ;;  %v7444_v39 = vld [vmem:[%s9697_s7] sm:$0xff]  }
 0x343   :  { %4638 = vmatprep.mubr.bf16.mxu0 %v9261_v59  ;;  %6115 = vmatprep.subr.bf16.mxu1 %v7444_v39 }
 0x34a   :  { %4639 = vmatmul.mubr.bf16.gmra.mrb[84].mxu0 %v9258_v48 }
 0x34b   :  { %4648 = vmatprep.mubr.bf16.mxu0 %v9271_v5 }
 0x352   :  { %4649 = vmatmul.mubr.bf16.gmra.mrb[88].mxu0 %v9268_v38 }
 0x353   :  { %4658 = vmatprep.mubr.bf16.mxu0 %v9281_v14 }
 0x35a   :  { %4659 = vmatmul.mubr.bf16.gmra.mrb[92].mxu0 %v9278_v61 }
 0x35b   :  { %4668 = vmatprep.mubr.bf16.mxu0 %v9291_v42 }
 0x362   :  { %4669 = vmatmul.mubr.bf16.gmra.mrb[96].mxu0 %v9288_v3 }
 0x363   :  { %4678 = vmatprep.mubr.bf16.mxu0 %v9301_v0 }
 0x36a   :  { %4679 = vmatmul.mubr.bf16.gmra.mrb[100].mxu0 %v9298_v26 }
 0x36b   :  { %4688 = vmatprep.mubr.bf16.mxu0 %v9311_v56 }
 0x372   :  { %4689 = vmatmul.mubr.bf16.gmra.mrb[104].mxu0 %v9308_v6 }
 0x373   :  { %4698 = vmatprep.mubr.bf16.mxu0 %v9327_v27 }
 0x37a   :  { %4699 = vmatmul.mubr.bf16.gmra.mrb[108].mxu0 %v9324_v11 }
 0x37b   :  { %4708 = vmatprep.mubr.bf16.mxu0 %v9346_v57 }
 0x382   :  { %4709 = vmatmul.mubr.bf16.gmra.mrb[112].mxu0 %v9343_v13 }
 0x383   :  { %4718 = vmatprep.mubr.bf16.mxu0 %v9368_v46 }
 0x38a   :  { %4719 = vmatmul.mubr.bf16.gmra.mrb[116].mxu0 %v9365_v32 }
 0x38b   :  { %4728 = vmatprep.mubr.bf16.mxu0 %v3962_v44 }
 0x392   :  { %4729 = vmatmul.mubr.bf16.gmra.mrb[120].mxu0 %v3961_v16 }
 0x393   :  { %4738 = vmatprep.mubr.bf16.mxu0 %v3966_v15 }
 0x39a   :  { %4739 = vmatmul.mubr.bf16.gmra.mrb[124].mxu0 %v3965_v9 }
 0x3f5   :  { %v4590_v52 = vpop.f32.mrb[64].mxu0 }
 0x3f6   :  { %v6355_v48 = vadd.f32 %v4590_v52, %v9427_v63  ;;  %v4592_v59 = vpop.f32.mrb[65].mxu0 }
 0x3f7   :  { %v6356_v38 = vadd.f32 %v4592_v59, %v9431_v40  ;;  %v4594_v5 = vpop.f32.mrb[66].mxu0 }
 0x3f8   :  { %v4749_v61 = vmul.f32 0.2, %v6355_v48  ;;  %v6357_v14 = vadd.f32 %v4594_v5, %v9427_v63  ;;  %v4596_v3 = vpop.f32.mrb[67].mxu0 }
 0x3f9   :  { %v4750_v42 = vmul.f32 0.2, %v6356_v38  ;;  %v6358_v26 = vadd.f32 %v4596_v3, %v9431_v40 }
 0x3fa   :  { %v4751_v33 = vmul.f32 0.2, %v6357_v14  ;;  %v4813_v6 = vmax.f32 %v6355_v48, %v4749_v61  ;;  %v7445_v48 = vld [vmem:[%s9697_s7 + $0x8] sm:$0xff]  }
 0x3fb   :  { %v4752_v0 = vmul.f32 0.2, %v6358_v26  ;;  %v4814_v56 = vmax.f32 %v6356_v38, %v4750_v42  ;;  %v7446_v42 = vld [vmem:[%s9697_s7 + $0x10] sm:$0xff]  }
 0x3fc   :  { %v4815_v37 = vmax.f32 %v6357_v14, %v4751_v33 }
 0x3fd   :  { %v4816_v11 = vmax.f32 %v6358_v26, %v4752_v0  ;;  %v4600_v27 = vpop.f32.mrb[68].mxu0 }
 0x3fe   :  { %v4877_v13 = vpack.c.bf16 %v4815_v37, %v4813_v6  ;;  %v6359_v57 = vadd.f32 %v4600_v27, %v9427_v63  ;;  %v4602_v30 = vpop.f32.mrb[69].mxu0 }
 0x3ff   :  { %v6360_v32 = vadd.f32 %v4602_v30, %v9431_v40  ;;  %v4604_v46 = vpop.f32.mrb[70].mxu0  ;;  %v4878_v31 = vpack.c.bf16 %v4816_v11, %v4814_v56 }
 0x400   :  { %v4753_v49 = vmul.f32 0.2, %v6359_v57  ;;  %v6361_v55 = vadd.f32 %v4604_v46, %v9427_v63  ;;  %v4606_v2 = vpop.f32.mrb[71].mxu0 }
 0x401   :  { %v4754_v4 = vmul.f32 0.2, %v6360_v32  ;;  %v6362_v36 = vadd.f32 %v4606_v2, %v9431_v40  ;;  %5076 = vmatprep.mubr.bf16.mxu0 %v4878_v31 }
 0x402   :  { %v4755_v25 = vmul.f32 0.2, %v6361_v55  ;;  %5077 = vmatmul.mubr.bf16.vlgmr.msra.gmra.mrb[128].mxu0 %v4877_v13  ;;  %v4817_v62 = vmax.f32 %v6359_v57, %v4753_v49 }
 0x403   :  { %v4756_v51 = vmul.f32 0.2, %v6362_v36  ;;  %v4818_v20 = vmax.f32 %v6360_v32, %v4754_v4 }
 0x404   :  { %v4819_v18 = vmax.f32 %v6361_v55, %v4755_v25 }
 0x405   :  { %v4820_v54 = vmax.f32 %v6362_v36, %v4756_v51  ;;  %v4610_v60 = vpop.f32.mrb[72].mxu0 }
 0x406   :  { %v6363_v29 = vadd.f32 %v4610_v60, %v9427_v63  ;;  %v4612_v21 = vpop.f32.mrb[73].mxu0  ;;  %v4879_v17 = vpack.c.bf16 %v4819_v18, %v4817_v62 }
 0x407   :  { %v6364_v23 = vadd.f32 %v4612_v21, %v9431_v40  ;;  %v4614_v24 = vpop.f32.mrb[74].mxu0  ;;  %v4880_v16 = vpack.c.bf16 %v4820_v54, %v4818_v20 }
 0x408   :  { %v4757_v1 = vmul.f32 0.2, %v6363_v29  ;;  %v6365_v53 = vadd.f32 %v4614_v24, %v9427_v63  ;;  %v4616_v44 = vpop.f32.mrb[75].mxu0 }
 0x409   :  { %v4758_v10 = vmul.f32 0.2, %v6364_v23  ;;  %v6366_v58 = vadd.f32 %v4616_v44, %v9431_v40  ;;  %5084 = vmatprep.mubr.bf16.mxu0 %v4880_v16 }
 0x40a   :  { %v4759_v19 = vmul.f32 0.2, %v6365_v53  ;;  %5085 = vmatmul.mubr.bf16.gmra.mrb[132].mxu0 %v4879_v17  ;;  %v4821_v47 = vmax.f32 %v6363_v29, %v4757_v1 }
 0x40b   :  { %v4760_v35 = vmul.f32 0.2, %v6366_v58  ;;  %v4822_v34 = vmax.f32 %v6364_v23, %v4758_v10 }
 0x40c   :  { %v4823_v45 = vmax.f32 %v6365_v53, %v4759_v19 }
 0x40d   :  { %v4824_v12 = vmax.f32 %v6366_v58, %v4760_v35  ;;  %v4620_v43 = vpop.f32.mrb[76].mxu0 }
 0x40e   :  { %v4881_v22 = vpack.c.bf16 %v4823_v45, %v4821_v47  ;;  %v6367_v8 = vadd.f32 %v4620_v43, %v9427_v63  ;;  %v4622_v50 = vpop.f32.mrb[77].mxu0 }
 0x40f   :  { %v6368_v9 = vadd.f32 %v4622_v50, %v9431_v40  ;;  %v4624_v15 = vpop.f32.mrb[78].mxu0  ;;  %v4882_v7 = vpack.c.bf16 %v4824_v12, %v4822_v34 }
 0x410   :  { %v4761_v28 = vmul.f32 0.2, %v6367_v8  ;;  %v6369_v41 = vadd.f32 %v4624_v15, %v9427_v63  ;;  %v4626_v52 = vpop.f32.mrb[79].mxu0 }
 0x411   :  { %v4762_v59 = vmul.f32 0.2, %v6368_v9  ;;  %v6370_v38 = vadd.f32 %v4626_v52, %v9431_v40  ;;  %5092 = vmatprep.mubr.bf16.mxu1 %v4882_v7 }
 0x412   :  { %v4763_v5 = vmul.f32 0.2, %v6369_v41  ;;  %5093 = vmatmul.mubr.bf16.vlgmr.msra.gmra.mrb[96].mxu1 %v4881_v22  ;;  %v4825_v14 = vmax.f32 %v6367_v8, %v4761_v28 }
 0x413   :  { %v4764_v61 = vmul.f32 0.2, %v6370_v38  ;;  %6116 = vmatpush3.bf16.msra.mxu1 %v7444_v39  ;;  %v4826_v26 = vmax.f32 %v6368_v9, %v4762_v59 }
 0x414   :  { %v4827_v3 = vmax.f32 %v6369_v41, %v4763_v5  ;;  %6117 = vmatprep.subr.bf16.mxu1 %v7445_v48 }
 0x415   :  { %v4828_v33 = vmax.f32 %v6370_v38, %v4764_v61  ;;  %v4630_v0 = vpop.f32.mrb[80].mxu0 }
 0x416   :  { %v6371_v6 = vadd.f32 %v4630_v0, %v9427_v63  ;;  %v4632_v37 = vpop.f32.mrb[81].mxu0  ;;  %v4883_v56 = vpack.c.bf16 %v4827_v3, %v4825_v14 }
 0x417   :  { %v6372_v11 = vadd.f32 %v4632_v37, %v9431_v40  ;;  %v4634_v27 = vpop.f32.mrb[82].mxu0  ;;  %v4884_v13 = vpack.c.bf16 %v4828_v33, %v4826_v26  ;;  %6118 = vmatpush3.bf16.msra.mxu1 %v7445_v48 }
 0x418   :  { %v4765_v39 = vmul.f32 0.2, %v6371_v6  ;;  %v6373_v57 = vadd.f32 %v4634_v27, %v9427_v63  ;;  %v4636_v30 = vpop.f32.mrb[83].mxu0  ;;  %6119 = vmatprep.subr.bf16.mxu1 %v7446_v42 }
 0x419   :  { %v4766_v32 = vmul.f32 0.2, %v6372_v11  ;;  %v6374_v46 = vadd.f32 %v4636_v30, %v9431_v40  ;;  %5100 = vmatprep.mubr.bf16.mxu1 %v4884_v13 }
 0x41a   :  { %v4767_v31 = vmul.f32 0.2, %v6373_v57  ;;  %5101 = vmatmul.mubr.bf16.gmra.mrb[100].mxu1 %v4883_v56  ;;  %v4829_v55 = vmax.f32 %v6371_v6, %v4765_v39 }
 0x41b   :  { %v4768_v49 = vmul.f32 0.2, %v6374_v46  ;;  %6120 = vmatpush3.bf16.msra.mxu1 %v7446_v42  ;;  %v4830_v4 = vmax.f32 %v6372_v11, %v4766_v32 }
 0x41c   :  { %v4831_v2 = vmax.f32 %v6373_v57, %v4767_v31 }
 0x41d   :  { %v4832_v36 = vmax.f32 %v6374_v46, %v4768_v49  ;;  %v4640_v25 = vpop.f32.mrb[84].mxu0 }
 0x41e   :  { %v6375_v51 = vadd.f32 %v4640_v25, %v9427_v63  ;;  %v4642_v62 = vpop.f32.mrb[85].mxu0  ;;  %v4885_v18 = vpack.c.bf16 %v4831_v2, %v4829_v55 }
 0x41f   :  { %v6376_v20 = vadd.f32 %v4642_v62, %v9431_v40  ;;  %v4644_v54 = vpop.f32.mrb[86].mxu0  ;;  %v4886_v60 = vpack.c.bf16 %v4832_v36, %v4830_v4 }
 0x420   :  { %v4769_v29 = vmul.f32 0.2, %v6375_v51  ;;  %v6377_v21 = vadd.f32 %v4644_v54, %v9427_v63  ;;  %v4646_v17 = vpop.f32.mrb[87].mxu0 }
 0x421   :  { %v4770_v23 = vmul.f32 0.2, %v6376_v20  ;;  %v6378_v24 = vadd.f32 %v4646_v17, %v9431_v40  ;;  %5108 = vmatprep.mubr.bf16.mxu1 %v4886_v60 }
 0x422   :  { %v4771_v16 = vmul.f32 0.2, %v6377_v21  ;;  %5109 = vmatmul.mubr.bf16.gmra.mrb[104].mxu1 %v4885_v18  ;;  %v4833_v53 = vmax.f32 %v6375_v51, %v4769_v29 }
 0x423   :  { %v4772_v1 = vmul.f32 0.2, %v6378_v24  ;;  %v4834_v10 = vmax.f32 %v6376_v20, %v4770_v23 }
 0x424   :  { %v4835_v44 = vmax.f32 %v6377_v21, %v4771_v16 }
 0x425   :  { %v4836_v58 = vmax.f32 %v6378_v24, %v4772_v1  ;;  %v4650_v19 = vpop.f32.mrb[88].mxu0 }
 0x426   :  { %v6379_v35 = vadd.f32 %v4650_v19, %v9427_v63  ;;  %v4652_v47 = vpop.f32.mrb[89].mxu0  ;;  %v4887_v45 = vpack.c.bf16 %v4835_v44, %v4833_v53 }
 0x427   :  { %v6380_v34 = vadd.f32 %v4652_v47, %v9431_v40  ;;  %v4654_v12 = vpop.f32.mrb[90].mxu0  ;;  %v4888_v43 = vpack.c.bf16 %v4836_v58, %v4834_v10 }
 0x428   :  { %v4773_v22 = vmul.f32 0.2, %v6379_v35  ;;  %v6381_v8 = vadd.f32 %v4654_v12, %v9427_v63  ;;  %v4656_v50 = vpop.f32.mrb[91].mxu0 }
 0x429   :  { %v4774_v9 = vmul.f32 0.2, %v6380_v34  ;;  %v6382_v15 = vadd.f32 %v4656_v50, %v9431_v40  ;;  %5116 = vmatprep.mubr.bf16.mxu1 %v4888_v43 }
 0x42a   :  { %v4775_v7 = vmul.f32 0.2, %v6381_v8  ;;  %5117 = vmatmul.mubr.bf16.gmra.mrb[108].mxu1 %v4887_v45  ;;  %v4837_v41 = vmax.f32 %v6379_v35, %v4773_v22 }
 0x42b   :  { %v4776_v28 = vmul.f32 0.2, %v6382_v15  ;;  %v4838_v48 = vmax.f32 %v6380_v34, %v4774_v9 }
 0x42c   :  { %v4839_v52 = vmax.f32 %v6381_v8, %v4775_v7 }
 0x42d   :  { %v4840_v59 = vmax.f32 %v6382_v15, %v4776_v28  ;;  %v4660_v38 = vpop.f32.mrb[92].mxu0 }
 0x42e   :  { %v6383_v5 = vadd.f32 %v4660_v38, %v9427_v63  ;;  %v4662_v61 = vpop.f32.mrb[93].mxu0  ;;  %v4889_v14 = vpack.c.bf16 %v4839_v52, %v4837_v41 }
 0x42f   :  { %v6384_v3 = vadd.f32 %v4662_v61, %v9431_v40  ;;  %v4664_v42 = vpop.f32.mrb[94].mxu0  ;;  %v4890_v26 = vpack.c.bf16 %v4840_v59, %v4838_v48 }
 0x430   :  { %v4777_v33 = vmul.f32 0.2, %v6383_v5  ;;  %v6385_v0 = vadd.f32 %v4664_v42, %v9427_v63  ;;  %v4666_v6 = vpop.f32.mrb[95].mxu0 }
 0x431   :  { %v4778_v37 = vmul.f32 0.2, %v6384_v3  ;;  %v6386_v56 = vadd.f32 %v4666_v6, %v9431_v40  ;;  %5124 = vmatprep.mubr.bf16.mxu1 %v4890_v26 }
 0x432   :  { %v4779_v11 = vmul.f32 0.2, %v6385_v0  ;;  %5125 = vmatmul.mubr.bf16.gmra.mrb[112].mxu1 %v4889_v14  ;;  %v4841_v13 = vmax.f32 %v6383_v5, %v4777_v33 }
 0x433   :  { %v4780_v27 = vmul.f32 0.2, %v6386_v56  ;;  %v4842_v57 = vmax.f32 %v6384_v3, %v4778_v37 }
 0x434   :  { %v4843_v39 = vmax.f32 %v6385_v0, %v4779_v11 }
 0x435   :  { %v4844_v30 = vmax.f32 %v6386_v56, %v4780_v27  ;;  %v4670_v32 = vpop.f32.mrb[96].mxu0 }
 0x436   :  { %v6387_v46 = vadd.f32 %v4670_v32, %v9427_v63  ;;  %v4672_v31 = vpop.f32.mrb[97].mxu0  ;;  %v4891_v49 = vpack.c.bf16 %v4843_v39, %v4841_v13 }
 0x437   :  { %v6388_v55 = vadd.f32 %v4672_v31, %v9431_v40  ;;  %v4674_v2 = vpop.f32.mrb[98].mxu0  ;;  %v4892_v4 = vpack.c.bf16 %v4844_v30, %v4842_v57 }
 0x438   :  { %v4781_v36 = vmul.f32 0.2, %v6387_v46  ;;  %v6389_v25 = vadd.f32 %v4674_v2, %v9427_v63  ;;  %v4676_v51 = vpop.f32.mrb[99].mxu0 }
 0x439   :  { %v4782_v62 = vmul.f32 0.2, %v6388_v55  ;;  %v6390_v18 = vadd.f32 %v4676_v51, %v9431_v40  ;;  %5132 = vmatprep.mubr.bf16.mxu1 %v4892_v4 }
 0x43a   :  { %v4783_v20 = vmul.f32 0.2, %v6389_v25  ;;  %5133 = vmatmul.mubr.bf16.gmra.mrb[116].mxu1 %v4891_v49  ;;  %v4845_v60 = vmax.f32 %v6387_v46, %v4781_v36 }
 0x43b   :  { %v4784_v54 = vmul.f32 0.2, %v6390_v18  ;;  %v4846_v21 = vmax.f32 %v6388_v55, %v4782_v62 }
 0x43c   :  { %v4847_v29 = vmax.f32 %v6389_v25, %v4783_v20 }
 0x43d   :  { %v4848_v17 = vmax.f32 %v6390_v18, %v4784_v54  ;;  %v4680_v23 = vpop.f32.mrb[100].mxu0  ;;  %v7447_v18 = vld [vmem:[%s9697_s7 + $0x18] sm:$0xff]  }
 0x43e   :  { %v6391_v24 = vadd.f32 %v4680_v23, %v9427_v63  ;;  %v4682_v16 = vpop.f32.mrb[101].mxu0  ;;  %v4893_v1 = vpack.c.bf16 %v4847_v29, %v4845_v60  ;;  %6121 = vmatprep.subr.bf16.mxu1 %v7447_v18 }
 0x43f   :  { %v6392_v53 = vadd.f32 %v4682_v16, %v9431_v40  ;;  %v4684_v44 = vpop.f32.mrb[102].mxu0  ;;  %v4894_v10 = vpack.c.bf16 %v4848_v17, %v4846_v21  ;;  %6122 = vmatpush3.bf16.msra.mxu1 %v7447_v18 }
 0x440   :  { %v4785_v58 = vmul.f32 0.2, %v6391_v24  ;;  %v6393_v19 = vadd.f32 %v4684_v44, %v9427_v63  ;;  %v4686_v35 = vpop.f32.mrb[103].mxu0  ;;  %v7448_v44 = vld [vmem:[%s9697_s7 + $0x20] sm:$0xff]  }
 0x441   :  { %v4786_v47 = vmul.f32 0.2, %v6392_v53  ;;  %v6394_v45 = vadd.f32 %v4686_v35, %v9431_v40  ;;  %5140 = vmatprep.mubr.bf16.mxu1 %v4894_v10  ;;  %6123 = vmatprep.subr.bf16.mxu1 %v7448_v44 }
 0x442   :  { %v4787_v34 = vmul.f32 0.2, %v6393_v19  ;;  %5141 = vmatmul.mubr.bf16.gmra.mrb[120].mxu1 %v4893_v1  ;;  %v4849_v43 = vmax.f32 %v6391_v24, %v4785_v58 }
 0x443   :  { %v4788_v12 = vmul.f32 0.2, %v6394_v45  ;;  %v4850_v8 = vmax.f32 %v6392_v53, %v4786_v47  ;;  %6124 = vmatpush3.bf16.msra.mxu1 %v7448_v44 }
 0x444   :  { %v4851_v22 = vmax.f32 %v6393_v19, %v4787_v34 }
 0x445   :  { %v4852_v50 = vmax.f32 %v6394_v45, %v4788_v12  ;;  %v4690_v9 = vpop.f32.mrb[104].mxu0  ;;  %v7449_v12 = vld [vmem:[%s9697_s7 + $0x28] sm:$0xff]  }
 0x446   :  { %v6395_v15 = vadd.f32 %v4690_v9, %v9427_v63  ;;  %v4692_v7 = vpop.f32.mrb[105].mxu0  ;;  %v4895_v28 = vpack.c.bf16 %v4851_v22, %v4849_v43  ;;  %6125 = vmatprep.subr.bf16.mxu1 %v7449_v12 }
 0x447   :  { %v6396_v41 = vadd.f32 %v4692_v7, %v9431_v40  ;;  %v4694_v52 = vpop.f32.mrb[106].mxu0  ;;  %v4896_v48 = vpack.c.bf16 %v4852_v50, %v4850_v8  ;;  %6126 = vmatpush3.bf16.msra.mxu1 %v7449_v12 }
 0x448   :  { %v4789_v59 = vmul.f32 0.2, %v6395_v15  ;;  %v6397_v38 = vadd.f32 %v4694_v52, %v9427_v63  ;;  %v4696_v5 = vpop.f32.mrb[107].mxu0 }
 0x449   :  { %v4790_v61 = vmul.f32 0.2, %v6396_v41  ;;  %v6398_v14 = vadd.f32 %v4696_v5, %v9431_v40  ;;  %5148 = vmatprep.mubr.bf16.mxu1 %v4896_v48 }
 0x44a   :  { %v4791_v3 = vmul.f32 0.2, %v6397_v38  ;;  %5149 = vmatmul.mubr.bf16.gmra.mrb[124].mxu1 %v4895_v28  ;;  %v4853_v26 = vmax.f32 %v6395_v15, %v4789_v59  ;;  %v7450_v59 = vld [vmem:[%s9697_s7 + $0x30] sm:$0xff]  }
 0x44b   :  { %v4792_v42 = vmul.f32 0.2, %v6398_v14  ;;  %v4854_v0 = vmax.f32 %v6396_v41, %v4790_v61  ;;  %6127 = vmatprep.subr.bf16.mxu1 %v7450_v59 }
 0x44c   :  { %v4855_v33 = vmax.f32 %v6397_v38, %v4791_v3  ;;  %6128 = vmatpush3.bf16.msra.mxu1 %v7450_v59 }
 0x44d   :  { %v4856_v6 = vmax.f32 %v6398_v14, %v4792_v42  ;;  %v4700_v37 = vpop.f32.mrb[108].mxu0 }
 0x44e   :  { %v6399_v56 = vadd.f32 %v4700_v37, %v9427_v63  ;;  %v4702_v11 = vpop.f32.mrb[109].mxu0  ;;  %v4897_v27 = vpack.c.bf16 %v4855_v33, %v4853_v26  ;;  %v7451_v33 = vld [vmem:[%s9697_s7 + $0x38] sm:$0xff]  }
 0x44f   :  { %v6400_v13 = vadd.f32 %v4702_v11, %v9431_v40  ;;  %v4704_v39 = vpop.f32.mrb[110].mxu0  ;;  %v4898_v57 = vpack.c.bf16 %v4856_v6, %v4854_v0  ;;  %6129 = vmatprep.subr.bf16.mxu1 %v7451_v33 }
 0x450   :  { %v4793_v30 = vmul.f32 0.2, %v6399_v56  ;;  %v6401_v32 = vadd.f32 %v4704_v39, %v9427_v63  ;;  %v4706_v46 = vpop.f32.mrb[111].mxu0  ;;  %6130 = vmatpush3.bf16.msra.mxu1 %v7451_v33 }
 0x451   :  { %v4794_v31 = vmul.f32 0.2, %v6400_v13  ;;  %v6402_v49 = vadd.f32 %v4706_v46, %v9431_v40  ;;  %5156 = vmatprep.mubr.bf16.mxu1 %v4898_v57 }
 0x452   :  { %v4795_v55 = vmul.f32 0.2, %v6401_v32  ;;  %5157 = vmatmul.mubr.bf16.gmra.mrb[128].mxu1 %v4897_v27  ;;  %v4857_v4 = vmax.f32 %v6399_v56, %v4793_v30 }
 0x453   :  { %v4796_v2 = vmul.f32 0.2, %v6402_v49  ;;  %v4858_v25 = vmax.f32 %v6400_v13, %v4794_v31 }
 0x454   :  { %v4859_v36 = vmax.f32 %v6401_v32, %v4795_v55 }
 0x455   :  { %v4860_v51 = vmax.f32 %v6402_v49, %v4796_v2  ;;  %v4710_v62 = vpop.f32.mrb[112].mxu0 }
 0x456   :  { %v6403_v20 = vadd.f32 %v4710_v62, %v9427_v63  ;;  %v4712_v54 = vpop.f32.mrb[113].mxu0  ;;  %v4899_v60 = vpack.c.bf16 %v4859_v36, %v4857_v4 }
 0x457   :  { %v6404_v29 = vadd.f32 %v4712_v54, %v9431_v40  ;;  %v4714_v21 = vpop.f32.mrb[114].mxu0  ;;  %v4900_v17 = vpack.c.bf16 %v4860_v51, %v4858_v25 }
 0x458   :  { %v4797_v23 = vmul.f32 0.2, %v6403_v20  ;;  %v6405_v24 = vadd.f32 %v4714_v21, %v9427_v63  ;;  %v4716_v16 = vpop.f32.mrb[115].mxu0 }
 0x459   :  { %v4798_v1 = vmul.f32 0.2, %v6404_v29  ;;  %v6406_v53 = vadd.f32 %v4716_v16, %v9431_v40  ;;  %5164 = vmatprep.mubr.bf16.mxu1 %v4900_v17 }
 0x45a   :  { %v4799_v10 = vmul.f32 0.2, %v6405_v24  ;;  %5165 = vmatmul.mubr.bf16.gmra.mrb[132].mxu1 %v4899_v60  ;;  %v4861_v19 = vmax.f32 %v6403_v20, %v4797_v23 }
 0x45b   :  { %v4800_v58 = vmul.f32 0.2, %v6406_v53  ;;  %v4862_v47 = vmax.f32 %v6404_v29, %v4798_v1 }
 0x45c   :  { %v4863_v35 = vmax.f32 %v6405_v24, %v4799_v10 }
 0x45d   :  { %v4864_v45 = vmax.f32 %v6406_v53, %v4800_v58  ;;  %v4720_v34 = vpop.f32.mrb[116].mxu0 }
 0x45e   :  { %v6407_v43 = vadd.f32 %v4720_v34, %v9427_v63  ;;  %v4722_v22 = vpop.f32.mrb[117].mxu0  ;;  %v4901_v8 = vpack.c.bf16 %v4863_v35, %v4861_v19 }
 0x45f   :  { %v6408_v50 = vadd.f32 %v4722_v22, %v9431_v40  ;;  %v4724_v9 = vpop.f32.mrb[118].mxu0  ;;  %v4902_v15 = vpack.c.bf16 %v4864_v45, %v4862_v47 }
 0x460   :  { %v4801_v7 = vmul.f32 0.2, %v6407_v43  ;;  %v6409_v28 = vadd.f32 %v4724_v9, %v9427_v63  ;;  %v4726_v41 = vpop.f32.mrb[119].mxu0 }
 0x461   :  { %v4802_v52 = vmul.f32 0.2, %v6408_v50  ;;  %v6410_v48 = vadd.f32 %v4726_v41, %v9431_v40  ;;  %5172 = vmatprep.mubr.bf16.mxu1 %v4902_v15 }
 0x462   :  { %v4803_v38 = vmul.f32 0.2, %v6409_v28  ;;  %5173 = vmatmul.mubr.bf16.gmra.mrb[136].mxu1 %v4901_v8  ;;  %v4865_v61 = vmax.f32 %v6407_v43, %v4801_v7 }
 0x463   :  { %v4804_v5 = vmul.f32 0.2, %v6410_v48  ;;  %v4866_v3 = vmax.f32 %v6408_v50, %v4802_v52 }
 0x464   :  { %v4867_v14 = vmax.f32 %v6409_v28, %v4803_v38 }
 0x465   :  { %v4868_v42 = vmax.f32 %v6410_v48, %v4804_v5  ;;  %v4730_v26 = vpop.f32.mrb[120].mxu0 }
 0x466   :  { %v6411_v0 = vadd.f32 %v4730_v26, %v9427_v63  ;;  %v4732_v6 = vpop.f32.mrb[121].mxu0  ;;  %v4903_v37 = vpack.c.bf16 %v4867_v14, %v4865_v61 }
 0x467   :  { %v6412_v56 = vadd.f32 %v4732_v6, %v9431_v40  ;;  %v4734_v11 = vpop.f32.mrb[122].mxu0  ;;  %v4904_v27 = vpack.c.bf16 %v4868_v42, %v4866_v3 }
 0x468   :  { %v4805_v13 = vmul.f32 0.2, %v6411_v0  ;;  %v6413_v39 = vadd.f32 %v4734_v11, %v9427_v63  ;;  %v4736_v57 = vpop.f32.mrb[123].mxu0 }
 0x469   :  { %v4806_v30 = vmul.f32 0.2, %v6412_v56  ;;  %v6414_v32 = vadd.f32 %v4736_v57, %v9431_v40  ;;  %5180 = vmatprep.mubr.bf16.mxu1 %v4904_v27 }
 0x46a   :  { %v4807_v46 = vmul.f32 0.2, %v6413_v39  ;;  %5181 = vmatmul.mubr.bf16.gmra.mrb[140].mxu1 %v4903_v37  ;;  %v4869_v49 = vmax.f32 %v6411_v0, %v4805_v13 }
 0x46b   :  { %v4808_v31 = vmul.f32 0.2, %v6414_v32  ;;  %v4870_v2 = vmax.f32 %v6412_v56, %v4806_v30 }
 0x46c   :  { %v4871_v55 = vmax.f32 %v6413_v39, %v4807_v46 }
 0x46d   :  { %v4872_v4 = vmax.f32 %v6414_v32, %v4808_v31  ;;  %v4740_v36 = vpop.f32.mrb[124].mxu0 }
 0x46e   :  { %v6415_v25 = vadd.f32 %v4740_v36, %v9427_v63  ;;  %v4742_v51 = vpop.f32.mrb[125].mxu0  ;;  %v4905_v62 = vpack.c.bf16 %v4871_v55, %v4869_v49 }
 0x46f   :  { %v6416_v18 = vadd.f32 %v4742_v51, %v9431_v40  ;;  %v4744_v20 = vpop.f32.mrb[126].mxu0  ;;  %v4906_v54 = vpack.c.bf16 %v4872_v4, %v4870_v2 }
 0x470   :  { %v4809_v60 = vmul.f32 0.2, %v6415_v25  ;;  %v6417_v29 = vadd.f32 %v4744_v20, %v9427_v63  ;;  %v4746_v21 = vpop.f32.mrb[127].mxu0  ;;  %v9524_v63 = vld [vmem:[%s9698_s6] ss:$0 sm:$0xff] }
 0x471   :  { %v4810_v17 = vmul.f32 0.2, %v6416_v18  ;;  %v6418_v23 = vadd.f32 %v4746_v21, %v9431_v40  ;;  %5188 = vmatprep.mubr.bf16.mxu1 %v4906_v54 }
 0x472   :  { %v4811_v24 = vmul.f32 0.2, %v6417_v29  ;;  %5189 = vmatmul.mubr.bf16.gmra.mrb[144].mxu1 %v4905_v62  ;;  %v4873_v1 = vmax.f32 %v6415_v25, %v4809_v60 }
 0x473   :  { %v4812_v16 = vmul.f32 0.2, %v6418_v23  ;;  %v4874_v44 = vmax.f32 %v6416_v18, %v4810_v17 }
 0x474   :  { %v4875_v53 = vmax.f32 %v6417_v29, %v4811_v24 }
 0x475   :  { %v4876_v10 = vmax.f32 %v6418_v23, %v4812_v16 }
 0x476   :  { %v4907_v58 = vpack.c.bf16 %v4875_v53, %v4873_v1 }
 0x477   :  { %v4908_v19 = vpack.c.bf16 %v4876_v10, %v4874_v44 }
 0x479   :  { %5196 = vmatprep.mubr.bf16.mxu1 %v4908_v19 }
 0x47a   :  { %5197 = vmatmul.mubr.bf16.gmra.mrb[148].mxu1 %v4907_v58 }
 0x4d5   :  { %v5995_v35 = vpop.f32.mrb[128].mxu0 }
 0x4d6   :  { %v5996_v47 = vpop.f32.mrb[129].mxu0 }
 0x4d7   :  { %v5997_v40 = vadd.f32 %v5996_v47, %v5995_v35  ;;  %v5998_v45 = vpop.f32.mrb[130].mxu0 }
 0x4d8   :  { %v5999_v34 = vpop.f32.mrb[131].mxu0 }
 0x4d9   :  { %v5079_v12 = vadd.f32 %v5997_v40, %v9524_v63  ;;  %v6000_v43 = vadd.f32 %v5999_v34, %v5998_v45 }
 0x4db   :  { %v5205_v22 = vmul.f32 0.2, %v5079_v12  ;;  %v5082_v8 = vadd.f32 %v6000_v43, %v9524_v63 }
 0x4dd   :  { %v5206_v50 = vmul.f32 0.2, %v5082_v8  ;;  %v6001_v9 = vpop.f32.mrb[132].mxu0  ;;  %v5237_v7 = vmax.f32 %v5079_v12, %v5205_v22 }
 0x4de   :  { %v6002_v15 = vpop.f32.mrb[133].mxu0 }
 0x4df   :  { %v5238_v28 = vmax.f32 %v5082_v8, %v5206_v50  ;;  %v6003_v41 = vadd.f32 %v6002_v15, %v6001_v9  ;;  %v6004_v52 = vpop.f32.mrb[134].mxu0 }
 0x4e0   :  { %v6005_v48 = vpop.f32.mrb[135].mxu0 }
 0x4e1   :  { %v5087_v59 = vadd.f32 %v6003_v41, %v9524_v63  ;;  %v6006_v38 = vadd.f32 %v6005_v48, %v6004_v52  ;;  %v5269_v5 = vpack.c.bf16 %v5238_v28, %v5237_v7 }
 0x4e3   :  { %v5207_v61 = vmul.f32 0.2, %v5087_v59  ;;  %v5090_v14 = vadd.f32 %v6006_v38, %v9524_v63  ;;  %6131 = vmatprep.mubr.bf16.mxu1 %v5269_v5 }
 0x4e5   :  { %v5208_v3 = vmul.f32 0.2, %v5090_v14  ;;  %v6007_v42 = vpop.f32.mrb[96].mxu1  ;;  %v5239_v33 = vmax.f32 %v5087_v59, %v5207_v61 }
 0x4e6   :  { %v6008_v26 = vpop.f32.mrb[97].mxu1 }
 0x4e7   :  { %v5240_v0 = vmax.f32 %v5090_v14, %v5208_v3  ;;  %v6009_v6 = vadd.f32 %v6008_v26, %v6007_v42  ;;  %v6010_v37 = vpop.f32.mrb[98].mxu1 }
 0x4e8   :  { %v6011_v56 = vpop.f32.mrb[99].mxu1 }
 0x4e9   :  { %v5270_v11 = vpack.c.bf16 %v5240_v0, %v5239_v33  ;;  %v5095_v27 = vadd.f32 %v6009_v6, %v9524_v63  ;;  %v6012_v13 = vadd.f32 %v6011_v56, %v6010_v37 }
 0x4eb   :  { %v5209_v39 = vmul.f32 0.2, %v5095_v27  ;;  %v5098_v57 = vadd.f32 %v6012_v13, %v9524_v63  ;;  %6132 = vmatmul.mubr.bf16.vlgmr.msra.gmra.mrb[152].mxu1 %v5270_v11 }
 0x4ed   :  { %v5210_v30 = vmul.f32 0.2, %v5098_v57  ;;  %v6013_v32 = vpop.f32.mrb[100].mxu1  ;;  %v5241_v31 = vmax.f32 %v5095_v27, %v5209_v39 }
 0x4ee   :  { %v6014_v46 = vpop.f32.mrb[101].mxu1 }
 0x4ef   :  { %v5242_v49 = vmax.f32 %v5098_v57, %v5210_v30  ;;  %v6015_v55 = vadd.f32 %v6014_v46, %v6013_v32  ;;  %v6016_v2 = vpop.f32.mrb[102].mxu1 }
 0x4f0   :  { %v6017_v4 = vpop.f32.mrb[103].mxu1 }
 0x4f1   :  { %v5103_v36 = vadd.f32 %v6015_v55, %v9524_v63  ;;  %v6018_v25 = vadd.f32 %v6017_v4, %v6016_v2  ;;  %v5271_v51 = vpack.c.bf16 %v5242_v49, %v5241_v31 }
 0x4f3   :  { %v5211_v62 = vmul.f32 0.2, %v5103_v36  ;;  %v5106_v18 = vadd.f32 %v6018_v25, %v9524_v63  ;;  %6135 = vmatprep.mubr.bf16.mxu1 %v5271_v51 }
 0x4f5   :  { %v5212_v20 = vmul.f32 0.2, %v5106_v18  ;;  %v6019_v54 = vpop.f32.mrb[104].mxu1  ;;  %v5243_v29 = vmax.f32 %v5103_v36, %v5211_v62 }
 0x4f6   :  { %v6020_v60 = vpop.f32.mrb[105].mxu1 }
 0x4f7   :  { %v5244_v21 = vmax.f32 %v5106_v18, %v5212_v20  ;;  %v6021_v17 = vadd.f32 %v6020_v60, %v6019_v54  ;;  %v6022_v23 = vpop.f32.mrb[106].mxu1 }
 0x4f8   :  { %v6023_v24 = vpop.f32.mrb[107].mxu1 }
 0x4f9   :  { %v5111_v16 = vadd.f32 %v6021_v17, %v9524_v63  ;;  %v6024_v1 = vadd.f32 %v6023_v24, %v6022_v23  ;;  %v5272_v53 = vpack.c.bf16 %v5244_v21, %v5243_v29 }
 0x4fb   :  { %v5213_v44 = vmul.f32 0.2, %v5111_v16  ;;  %v5114_v10 = vadd.f32 %v6024_v1, %v9524_v63  ;;  %6136 = vmatmul.mubr.bf16.gmra.mrb[156].mxu1 %v5272_v53 }
 0x4fd   :  { %v5214_v58 = vmul.f32 0.2, %v5114_v10  ;;  %v6025_v19 = vpop.f32.mrb[108].mxu1  ;;  %v5245_v47 = vmax.f32 %v5111_v16, %v5213_v44 }
 0x4fe   :  { %v6026_v35 = vpop.f32.mrb[109].mxu1 }
 0x4ff   :  { %v5246_v40 = vmax.f32 %v5114_v10, %v5214_v58  ;;  %v6027_v45 = vadd.f32 %v6026_v35, %v6025_v19  ;;  %v6028_v34 = vpop.f32.mrb[110].mxu1 }
 0x500   :  { %v6029_v12 = vpop.f32.mrb[111].mxu1 }
 0x501   :  { %v5119_v43 = vadd.f32 %v6027_v45, %v9524_v63  ;;  %v6030_v22 = vadd.f32 %v6029_v12, %v6028_v34  ;;  %v5273_v8 = vpack.c.bf16 %v5246_v40, %v5245_v47 }
 0x503   :  { %v5215_v50 = vmul.f32 0.2, %v5119_v43  ;;  %v5122_v9 = vadd.f32 %v6030_v22, %v9524_v63  ;;  %6139 = vmatprep.mubr.bf16.mxu1 %v5273_v8 }
 0x505   :  { %v5216_v15 = vmul.f32 0.2, %v5122_v9  ;;  %v6031_v7 = vpop.f32.mrb[112].mxu1  ;;  %v5247_v41 = vmax.f32 %v5119_v43, %v5215_v50 }
 0x506   :  { %v6032_v28 = vpop.f32.mrb[113].mxu1 }
 0x507   :  { %v5248_v52 = vmax.f32 %v5122_v9, %v5216_v15  ;;  %v6033_v48 = vadd.f32 %v6032_v28, %v6031_v7  ;;  %v6034_v59 = vpop.f32.mrb[114].mxu1 }
 0x508   :  { %v6035_v38 = vpop.f32.mrb[115].mxu1 }
 0x509   :  { %v5127_v5 = vadd.f32 %v6033_v48, %v9524_v63  ;;  %v6036_v61 = vadd.f32 %v6035_v38, %v6034_v59  ;;  %v5274_v14 = vpack.c.bf16 %v5248_v52, %v5247_v41 }
 0x50b   :  { %v5217_v3 = vmul.f32 0.2, %v5127_v5  ;;  %v5130_v42 = vadd.f32 %v6036_v61, %v9524_v63  ;;  %6140 = vmatmul.mubr.bf16.gmra.mrb[160].mxu1 %v5274_v14 }
 0x50d   :  { %v5218_v26 = vmul.f32 0.2, %v5130_v42  ;;  %v6037_v33 = vpop.f32.mrb[116].mxu1  ;;  %v5249_v6 = vmax.f32 %v5127_v5, %v5217_v3 }
 0x50e   :  { %v6038_v0 = vpop.f32.mrb[117].mxu1 }
 0x50f   :  { %v5250_v37 = vmax.f32 %v5130_v42, %v5218_v26  ;;  %v6039_v56 = vadd.f32 %v6038_v0, %v6037_v33  ;;  %v6040_v11 = vpop.f32.mrb[118].mxu1 }
 0x510   :  { %v6041_v27 = vpop.f32.mrb[119].mxu1 }
 0x511   :  { %v5135_v13 = vadd.f32 %v6039_v56, %v9524_v63  ;;  %v6042_v39 = vadd.f32 %v6041_v27, %v6040_v11  ;;  %v5275_v57 = vpack.c.bf16 %v5250_v37, %v5249_v6 }
 0x513   :  { %v5219_v30 = vmul.f32 0.2, %v5135_v13  ;;  %v5138_v32 = vadd.f32 %v6042_v39, %v9524_v63  ;;  %6143 = vmatprep.mubr.bf16.mxu1 %v5275_v57 }
 0x515   :  { %v5220_v46 = vmul.f32 0.2, %v5138_v32  ;;  %v6043_v31 = vpop.f32.mrb[120].mxu1  ;;  %v5251_v55 = vmax.f32 %v5135_v13, %v5219_v30 }
 0x516   :  { %v6044_v49 = vpop.f32.mrb[121].mxu1 }
 0x517   :  { %v5252_v2 = vmax.f32 %v5138_v32, %v5220_v46  ;;  %v6045_v4 = vadd.f32 %v6044_v49, %v6043_v31  ;;  %v6046_v36 = vpop.f32.mrb[122].mxu1 }
 0x518   :  { %v6047_v25 = vpop.f32.mrb[123].mxu1 }
 0x519   :  { %v5143_v51 = vadd.f32 %v6045_v4, %v9524_v63  ;;  %v6048_v62 = vadd.f32 %v6047_v25, %v6046_v36  ;;  %v5276_v18 = vpack.c.bf16 %v5252_v2, %v5251_v55 }
 0x51b   :  { %v5221_v20 = vmul.f32 0.2, %v5143_v51  ;;  %v5146_v54 = vadd.f32 %v6048_v62, %v9524_v63  ;;  %6144 = vmatmul.mubr.bf16.gmra.mrb[164].mxu1 %v5276_v18 }
 0x51d   :  { %v5222_v60 = vmul.f32 0.2, %v5146_v54  ;;  %v6049_v29 = vpop.f32.mrb[124].mxu1  ;;  %v5253_v17 = vmax.f32 %v5143_v51, %v5221_v20 }
 0x51e   :  { %v6050_v21 = vpop.f32.mrb[125].mxu1 }
 0x51f   :  { %v5254_v23 = vmax.f32 %v5146_v54, %v5222_v60  ;;  %v6051_v24 = vadd.f32 %v6050_v21, %v6049_v29  ;;  %v6052_v16 = vpop.f32.mrb[126].mxu1 }
 0x520   :  { %v6053_v1 = vpop.f32.mrb[127].mxu1 }
 0x521   :  { %v5151_v53 = vadd.f32 %v6051_v24, %v9524_v63  ;;  %v6054_v44 = vadd.f32 %v6053_v1, %v6052_v16  ;;  %v5277_v10 = vpack.c.bf16 %v5254_v23, %v5253_v17 }
 0x523   :  { %v5223_v58 = vmul.f32 0.2, %v5151_v53  ;;  %v5154_v19 = vadd.f32 %v6054_v44, %v9524_v63  ;;  %6147 = vmatprep.mubr.bf16.mxu1 %v5277_v10 }
 0x525   :  { %v5224_v35 = vmul.f32 0.2, %v5154_v19  ;;  %v6055_v47 = vpop.f32.mrb[128].mxu1  ;;  %v5255_v45 = vmax.f32 %v5151_v53, %v5223_v58 }
 0x526   :  { %v6056_v40 = vpop.f32.mrb[129].mxu1 }
 0x527   :  { %v5256_v34 = vmax.f32 %v5154_v19, %v5224_v35  ;;  %v6057_v12 = vadd.f32 %v6056_v40, %v6055_v47  ;;  %v6058_v43 = vpop.f32.mrb[130].mxu1 }
 0x528   :  { %v6059_v22 = vpop.f32.mrb[131].mxu1 }
 0x529   :  { %v5159_v8 = vadd.f32 %v6057_v12, %v9524_v63  ;;  %v6060_v50 = vadd.f32 %v6059_v22, %v6058_v43  ;;  %v5278_v9 = vpack.c.bf16 %v5256_v34, %v5255_v45 }
 0x52b   :  { %v5225_v15 = vmul.f32 0.2, %v5159_v8  ;;  %v5162_v7 = vadd.f32 %v6060_v50, %v9524_v63  ;;  %6148 = vmatmul.mubr.bf16.gmra.mrb[168].mxu1 %v5278_v9 }
 0x52d   :  { %v5226_v28 = vmul.f32 0.2, %v5162_v7  ;;  %v6061_v41 = vpop.f32.mrb[132].mxu1  ;;  %v5257_v48 = vmax.f32 %v5159_v8, %v5225_v15 }
 0x52e   :  { %v6062_v52 = vpop.f32.mrb[133].mxu1 }
 0x52f   :  { %v5258_v59 = vmax.f32 %v5162_v7, %v5226_v28  ;;  %v6063_v38 = vadd.f32 %v6062_v52, %v6061_v41  ;;  %v6064_v5 = vpop.f32.mrb[134].mxu1 }
 0x530   :  { %v6065_v61 = vpop.f32.mrb[135].mxu1 }
 0x531   :  { %v5167_v14 = vadd.f32 %v6063_v38, %v9524_v63  ;;  %v6066_v3 = vadd.f32 %v6065_v61, %v6064_v5  ;;  %v5279_v42 = vpack.c.bf16 %v5258_v59, %v5257_v48  ;;  %v9561_v5 = vld [vmem:[%s9699_s8] ss:$0 sm:$0xff] }
 0x533   :  { %v5227_v26 = vmul.f32 0.2, %v5167_v14  ;;  %v5170_v33 = vadd.f32 %v6066_v3, %v9524_v63  ;;  %6151 = vmatprep.mubr.bf16.mxu1 %v5279_v42 }
 0x535   :  { %v5228_v0 = vmul.f32 0.2, %v5170_v33  ;;  %v6067_v6 = vpop.f32.mrb[136].mxu1  ;;  %v5259_v56 = vmax.f32 %v5167_v14, %v5227_v26 }
 0x536   :  { %v6068_v37 = vpop.f32.mrb[137].mxu1 }
 0x537   :  { %v5260_v11 = vmax.f32 %v5170_v33, %v5228_v0  ;;  %v6069_v27 = vadd.f32 %v6068_v37, %v6067_v6  ;;  %v6070_v13 = vpop.f32.mrb[138].mxu1 }
 0x538   :  { %v6071_v39 = vpop.f32.mrb[139].mxu1 }
 0x539   :  { %v5175_v57 = vadd.f32 %v6069_v27, %v9524_v63  ;;  %v6072_v30 = vadd.f32 %v6071_v39, %v6070_v13  ;;  %v5280_v32 = vpack.c.bf16 %v5260_v11, %v5259_v56 }
 0x53b   :  { %v5229_v46 = vmul.f32 0.2, %v5175_v57  ;;  %v5178_v31 = vadd.f32 %v6072_v30, %v9524_v63  ;;  %6152 = vmatmul.mubr.bf16.gmra.mrb[172].mxu1 %v5280_v32 }
 0x53d   :  { %v5230_v49 = vmul.f32 0.2, %v5178_v31  ;;  %v6073_v55 = vpop.f32.mrb[140].mxu1  ;;  %v5261_v4 = vmax.f32 %v5175_v57, %v5229_v46 }
 0x53e   :  { %v6074_v2 = vpop.f32.mrb[141].mxu1 }
 0x53f   :  { %v5262_v36 = vmax.f32 %v5178_v31, %v5230_v49  ;;  %v6075_v25 = vadd.f32 %v6074_v2, %v6073_v55  ;;  %v6076_v51 = vpop.f32.mrb[142].mxu1 }
 0x540   :  { %v6077_v62 = vpop.f32.mrb[143].mxu1 }
 0x541   :  { %v5183_v18 = vadd.f32 %v6075_v25, %v9524_v63  ;;  %v6078_v20 = vadd.f32 %v6077_v62, %v6076_v51  ;;  %v5281_v54 = vpack.c.bf16 %v5262_v36, %v5261_v4 }
 0x543   :  { %v5231_v60 = vmul.f32 0.2, %v5183_v18  ;;  %v5186_v29 = vadd.f32 %v6078_v20, %v9524_v63  ;;  %6155 = vmatprep.mubr.bf16.mxu1 %v5281_v54 }
 0x545   :  { %v5232_v21 = vmul.f32 0.2, %v5186_v29  ;;  %v6079_v17 = vpop.f32.mrb[144].mxu1  ;;  %v5263_v24 = vmax.f32 %v5183_v18, %v5231_v60 }
 0x546   :  { %v6080_v23 = vpop.f32.mrb[145].mxu1 }
 0x547   :  { %v5264_v16 = vmax.f32 %v5186_v29, %v5232_v21  ;;  %v6081_v1 = vadd.f32 %v6080_v23, %v6079_v17  ;;  %v6082_v53 = vpop.f32.mrb[146].mxu1 }
 0x548   :  { %v6083_v44 = vpop.f32.mrb[147].mxu1 }
 0x549   :  { %v5191_v10 = vadd.f32 %v6081_v1, %v9524_v63  ;;  %v6084_v58 = vadd.f32 %v6083_v44, %v6082_v53  ;;  %v5282_v19 = vpack.c.bf16 %v5264_v16, %v5263_v24 }
 0x54b   :  { %v5233_v35 = vmul.f32 0.2, %v5191_v10  ;;  %v5194_v47 = vadd.f32 %v6084_v58, %v9524_v63  ;;  %6156 = vmatmul.mubr.bf16.gmra.mrb[176].mxu1 %v5282_v19 }
 0x54d   :  { %v5234_v40 = vmul.f32 0.2, %v5194_v47  ;;  %v6085_v45 = vpop.f32.mrb[148].mxu1  ;;  %v5265_v12 = vmax.f32 %v5191_v10, %v5233_v35 }
 0x54e   :  { %v6086_v34 = vpop.f32.mrb[149].mxu1 }
 0x54f   :  { %v5266_v43 = vmax.f32 %v5194_v47, %v5234_v40  ;;  %v6087_v22 = vadd.f32 %v6086_v34, %v6085_v45  ;;  %v6088_v8 = vpop.f32.mrb[150].mxu1 }
 0x550   :  { %v6089_v50 = vpop.f32.mrb[151].mxu1 }
 0x551   :  { %v5199_v9 = vadd.f32 %v6087_v22, %v9524_v63  ;;  %v6090_v15 = vadd.f32 %v6089_v50, %v6088_v8  ;;  %v5283_v7 = vpack.c.bf16 %v5266_v43, %v5265_v12 }
 0x553   :  { %v5235_v28 = vmul.f32 0.2, %v5199_v9  ;;  %v5202_v41 = vadd.f32 %v6090_v15, %v9524_v63  ;;  %6159 = vmatprep.mubr.bf16.mxu1 %v5283_v7 }
 0x555   :  { %v5236_v52 = vmul.f32 0.2, %v5202_v41  ;;  %v5267_v48 = vmax.f32 %v5199_v9, %v5235_v28 }
 0x557   :  { %v5268_v59 = vmax.f32 %v5202_v41, %v5236_v52 }
 0x559   :  { %v5284_v38 = vpack.c.bf16 %v5268_v59, %v5267_v48 }
 0x55b   :  { %6160 = vmatmul.mubr.bf16.gmra.mrb[180].mxu1 %v5284_v38 }
 0x5be   :  { %v6133_v61 = vpop.f32.mrb[152].mxu1 }
 0x5bf   :  { %v5399_v14 = vadd.f32 %v6133_v61, %v9561_v5  ;;  %v5390_v3 = vpop.f32.mrb[153].mxu1 }
 0x5c0   :  { %v5391_v42 = vadd.f32 %v9561_v5, %v5390_v3  ;;  %v6134_v26 = vpop.f32.mrb[154].mxu1 }
 0x5c1   :  { %5519 = vst [vmem:[%s9700_s9 + $0x10] sm:$0xff] %v5399_v14  ;;  %v5402_v63 = vadd.f32 %v6134_v26, %v9561_v5  ;;  %v5393_v33 = vpop.f32.mrb[155].mxu1 }
 0x5c2   :  { %5517 = vst [vmem:[%s9700_s9] sm:$0xff] %v5391_v42  ;;  %v5394_v0 = vadd.f32 %v9561_v5, %v5393_v33 }
 0x5c3   :  { %5520 = vst [vmem:[%s9700_s9 + $0x18] sm:$0xff] %v5402_v63 }
 0x5c4   :  { %5518 = vst [vmem:[%s9700_s9 + $0x8] sm:$0xff] %v5394_v0 }
 0x5ce   :  { %v6137_v6 = vpop.f32.mrb[156].mxu1 }
 0x5cf   :  { %v5415_v37 = vadd.f32 %v6137_v6, %v9561_v5  ;;  %v5406_v56 = vpop.f32.mrb[157].mxu1 }
 0x5d0   :  { %v5407_v11 = vadd.f32 %v9561_v5, %v5406_v56  ;;  %v6138_v27 = vpop.f32.mrb[158].mxu1 }
 0x5d1   :  { %5523 = vst [vmem:[%s9700_s9 + $0x30] sm:$0xff] %v5415_v37  ;;  %v5418_v13 = vadd.f32 %v6138_v27, %v9561_v5  ;;  %v5409_v39 = vpop.f32.mrb[159].mxu1 }
 0x5d2   :  { %5521 = vst [vmem:[%s9700_s9 + $0x20] sm:$0xff] %v5407_v11  ;;  %v5410_v57 = vadd.f32 %v9561_v5, %v5409_v39 }
 0x5d3   :  { %5524 = vst [vmem:[%s9700_s9 + $0x38] sm:$0xff] %v5418_v13 }
 0x5d4   :  { %5522 = vst [vmem:[%s9700_s9 + $0x28] sm:$0xff] %v5410_v57 }
 0x5de   :  { %v6141_v30 = vpop.f32.mrb[160].mxu1 }
 0x5df   :  { %v5431_v32 = vadd.f32 %v6141_v30, %v9561_v5  ;;  %v5422_v46 = vpop.f32.mrb[161].mxu1 }
 0x5e0   :  { %v5423_v31 = vadd.f32 %v9561_v5, %v5422_v46  ;;  %v6142_v49 = vpop.f32.mrb[162].mxu1 }
 0x5e1   :  { %5527 = vst [vmem:[%s9700_s9 + $0x50] sm:$0xff] %v5431_v32  ;;  %v5434_v55 = vadd.f32 %v6142_v49, %v9561_v5  ;;  %v5425_v2 = vpop.f32.mrb[163].mxu1 }
 0x5e2   :  { %5525 = vst [vmem:[%s9700_s9 + $0x40] sm:$0xff] %v5423_v31  ;;  %v5426_v4 = vadd.f32 %v9561_v5, %v5425_v2 }
 0x5e3   :  { %5528 = vst [vmem:[%s9700_s9 + $0x58] sm:$0xff] %v5434_v55 }
 0x5e4   :  { %5526 = vst [vmem:[%s9700_s9 + $0x48] sm:$0xff] %v5426_v4 }
 0x5ee   :  { %v6145_v36 = vpop.f32.mrb[164].mxu1 }
 0x5ef   :  { %v5447_v25 = vadd.f32 %v6145_v36, %v9561_v5  ;;  %v5438_v51 = vpop.f32.mrb[165].mxu1 }
 0x5f0   :  { %v5439_v62 = vadd.f32 %v9561_v5, %v5438_v51  ;;  %v6146_v18 = vpop.f32.mrb[166].mxu1 }
 0x5f1   :  { %5531 = vst [vmem:[%s9700_s9 + $0x70] sm:$0xff] %v5447_v25  ;;  %v5450_v20 = vadd.f32 %v6146_v18, %v9561_v5  ;;  %v5441_v54 = vpop.f32.mrb[167].mxu1 }
 0x5f2   :  { %5529 = vst [vmem:[%s9700_s9 + $0x60] sm:$0xff] %v5439_v62  ;;  %v5442_v60 = vadd.f32 %v9561_v5, %v5441_v54 }
 0x5f3   :  { %5532 = vst [vmem:[%s9700_s9 + $0x78] sm:$0xff] %v5450_v20 }
 0x5f4   :  { %5530 = vst [vmem:[%s9700_s9 + $0x68] sm:$0xff] %v5442_v60 }
 0x5fe   :  { %v6149_v29 = vpop.f32.mrb[168].mxu1 }
 0x5ff   :  { %v5463_v21 = vadd.f32 %v6149_v29, %v9561_v5  ;;  %v5454_v17 = vpop.f32.mrb[169].mxu1 }
 0x600   :  { %v5455_v23 = vadd.f32 %v9561_v5, %v5454_v17  ;;  %v6150_v24 = vpop.f32.mrb[170].mxu1 }
 0x601   :  { %5535 = vst [vmem:[%s9700_s9 + $0x90] sm:$0xff] %v5463_v21  ;;  %v5466_v16 = vadd.f32 %v6150_v24, %v9561_v5  ;;  %v5457_v1 = vpop.f32.mrb[171].mxu1 }
 0x602   :  { %5533 = vst [vmem:[%s9700_s9 + $0x80] sm:$0xff] %v5455_v23  ;;  %v5458_v53 = vadd.f32 %v9561_v5, %v5457_v1 }
 0x603   :  { %5536 = vst [vmem:[%s9700_s9 + $0x98] sm:$0xff] %v5466_v16 }
 0x604   :  { %5534 = vst [vmem:[%s9700_s9 + $0x88] sm:$0xff] %v5458_v53 }
 0x60e   :  { %v6153_v44 = vpop.f32.mrb[172].mxu1 }
 0x60f   :  { %v5479_v10 = vadd.f32 %v6153_v44, %v9561_v5  ;;  %v5470_v58 = vpop.f32.mrb[173].mxu1 }
 0x610   :  { %v5471_v19 = vadd.f32 %v9561_v5, %v5470_v58  ;;  %v6154_v35 = vpop.f32.mrb[174].mxu1 }
 0x611   :  { %5539 = vst [vmem:[%s9700_s9 + $0xb0] sm:$0xff] %v5479_v10  ;;  %v5482_v47 = vadd.f32 %v6154_v35, %v9561_v5  ;;  %v5473_v40 = vpop.f32.mrb[175].mxu1 }
 0x612   :  { %5537 = vst [vmem:[%s9700_s9 + $0xa0] sm:$0xff] %v5471_v19  ;;  %v5474_v45 = vadd.f32 %v9561_v5, %v5473_v40 }
 0x613   :  { %5540 = vst [vmem:[%s9700_s9 + $0xb8] sm:$0xff] %v5482_v47 }
 0x614   :  { %5538 = vst [vmem:[%s9700_s9 + $0xa8] sm:$0xff] %v5474_v45 }
 0x61e   :  { %v6157_v34 = vpop.f32.mrb[176].mxu1 }
 0x61f   :  { %v5495_v12 = vadd.f32 %v6157_v34, %v9561_v5  ;;  %v5486_v43 = vpop.f32.mrb[177].mxu1 }
 0x620   :  { %v5487_v22 = vadd.f32 %v9561_v5, %v5486_v43  ;;  %v6158_v8 = vpop.f32.mrb[178].mxu1 }
 0x621   :  { %5543 = vst [vmem:[%s9700_s9 + $0xd0] sm:$0xff] %v5495_v12  ;;  %v5498_v50 = vadd.f32 %v6158_v8, %v9561_v5  ;;  %v5489_v9 = vpop.f32.mrb[179].mxu1 }
 0x622   :  { %5541 = vst [vmem:[%s9700_s9 + $0xc0] sm:$0xff] %v5487_v22  ;;  %v5490_v15 = vadd.f32 %v9561_v5, %v5489_v9 }
 0x623   :  { %5544 = vst [vmem:[%s9700_s9 + $0xd8] sm:$0xff] %v5498_v50 }
 0x624   :  { %5542 = vst [vmem:[%s9700_s9 + $0xc8] sm:$0xff] %v5490_v15 }
 0x62e   :  { %v6161_v7 = vpop.f32.mrb[180].mxu1 }
 0x62f   :  { %v5511_v28 = vadd.f32 %v6161_v7, %v9561_v5  ;;  %v5502_v41 = vpop.f32.mrb[181].mxu1 }
 0x630   :  { %v5503_v52 = vadd.f32 %v9561_v5, %v5502_v41  ;;  %v6162_v48 = vpop.f32.mrb[182].mxu1 }
 0x631   :  { %5547 = vst [vmem:[%s9700_s9 + $0xf0] sm:$0xff] %v5511_v28  ;;  %v5514_v59 = vadd.f32 %v6162_v48, %v9561_v5  ;;  %v5505_v38 = vpop.f32.mrb[183].mxu1 }
 0x632   :  { %5545 = vst [vmem:[%s9700_s9 + $0xe0] sm:$0xff] %v5503_v52  ;;  %v5506_v61 = vadd.f32 %v9561_v5, %v5505_v38 }
 0x633   :  { %5548 = vst [vmem:[%s9700_s9 + $0xf8] sm:$0xff] %v5514_v59 }
 0x634   :  { %5546 = vst [vmem:[%s9700_s9 + $0xe8] sm:$0xff] %v5506_v61 }

</bundles_post_ra>
